<compile_context>
chip_gen: v5e
topology: v5e:2x2
jax: 0.10.0
libtpu: 0.0.40
codegen_flags: <defaults>
</compile_context>

<pallas_src>
import functools
import math

import jax
import jax.numpy as jnp
from jax.experimental import pallas as pl
from jax.experimental.pallas import tpu as pltpu

LN_EPS = 1e-5      # nn.LayerNorm default eps
AVG_EPS = 1e-12    # AvgPoolSequence eps
NEG_INF = -1e30    # stand-in for -inf in masked attention logits


def _round_up(x, m):
    return -(-x // m) * m


# --------------------------------------------------------------------------
# Fused kernel: all encoder layers + masked avg-pool for one batch block.
# Grid = (batch_blocks, n_layers); activation resident in VMEM scratch.
# --------------------------------------------------------------------------
def _fused_encoder_kernel(x_ref, mask_ref, maskt_ref,
                          wq_ref, wk_ref, wv_ref, bq_ref, bk_ref, bv_ref,
                          wo_ref, bo_ref, w1_ref, b1_ref, w2_ref, b2_ref,
                          g1_ref, be1_ref, g2_ref, be2_ref,
                          out_ref, x_sc, *,
                          n_heads, d_real, head_block, resident_weights, ff_chunk):
    layer = pl.program_id(1)
    n_layers = pl.num_programs(1)

    # Load the activation block into the VMEM-resident scratch on layer 0.
    @pl.when(layer == 0)
    def _():
        x_sc[...] = x_ref[...]

    Bb, T, Dp = x_sc.shape
    H = n_heads
    HB = head_block                      # per-head lane block (multiple of 128)
    M = Bb * T
    FFp = w1_ref.shape[-1]

    # Per-layer weight views: dynamic layer index when the whole stack is
    # VMEM-resident, static 0 when streaming one layer per grid step.
    w = layer if resident_weights else 0
    wq = wq_ref.at[w]; wk = wk_ref.at[w]; wv = wv_ref.at[w]
    bq = bq_ref.at[w]; bk = bk_ref.at[w]; bv = bv_ref.at[w]
    wo = wo_ref.at[w]; bo = bo_ref.at[w]
    w1 = w1_ref.at[w]; b1 = b1_ref.at[w]
    w2 = w2_ref.at[w]; b2 = b2_ref.at[w]
    g1 = g1_ref.at[w]; be1 = be1_ref.at[w]
    g2 = g2_ref.at[w]; be2 = be2_ref.at[w]

    inv_d = 1.0 / d_real
    pad_d = Dp != d_real
    if pad_d:
        lane_mask = (jax.lax.broadcasted_iota(jnp.int32, (1, Dp), 1)
                     < d_real).astype(jnp.float32)

    def layer_norm(xv, g, b):
        # Padded lanes of xv are zero by construction; statistics over real D.
        mu = jnp.sum(xv, axis=-1, keepdims=True) * inv_d
        d = xv - mu
        d2 = d * d
        if pad_d:
            d2 = d2 * lane_mask
        var = jnp.sum(d2, axis=-1, keepdims=True) * inv_d
        return d * jax.lax.rsqrt(var + LN_EPS) * g + b

    # Additive key-padding bias, hoisted out of the head loop.  [Bb, 1, T]
    bias = (1.0 - mask_ref[...]) * NEG_INF

    # ---- masked multi-head self-attention ---------------------------------
    xm = x_sc[...].reshape(M, Dp).astype(jnp.bfloat16)       # bf16 MXU inputs
    q = jnp.dot(xm, wq[...], preferred_element_type=jnp.float32) + bq[...]
    k = jnp.dot(xm, wk[...], preferred_element_type=jnp.float32) + bk[...]
    v = jnp.dot(xm, wv[...], preferred_element_type=jnp.float32) + bv[...]
    q = q.astype(jnp.bfloat16).reshape(Bb, T, H * HB)        # scale folded in Wq
    k = k.astype(jnp.bfloat16).reshape(Bb, T, H * HB)
    v = v.astype(jnp.bfloat16).reshape(Bb, T, H * HB)

    attn = jnp.zeros((M, Dp), jnp.float32)
    for h in range(H):                                        # 128-aligned head blocks
        lo = h * HB
        s = jnp.einsum('bqd,bkd->bqk', q[:, :, lo:lo + HB], k[:, :, lo:lo + HB],
                       preferred_element_type=jnp.float32)    # [Bb, T, T]
        s = s + bias
        s = s - jnp.max(s, axis=-1, keepdims=True)
        p = jnp.exp(s)
        p = p * pl.reciprocal(jnp.sum(p, axis=-1, keepdims=True), approx=True)
        ctx = jnp.einsum('bqk,bkd->bqd', p.astype(jnp.bfloat16),
                         v[:, :, lo:lo + HB],
                         preferred_element_type=jnp.float32)  # [Bb, T, HB]
        # Accumulate the output projection per head (no lane concatenate).
        attn = attn + jnp.dot(ctx.reshape(M, HB).astype(jnp.bfloat16),
                              wo[lo:lo + HB, :],
                              preferred_element_type=jnp.float32)
    attn = attn + bo[...]

    # Residual + LayerNorm1 (re-read x_sc here to shorten the f32 live range).
    x1 = layer_norm(x_sc[...].reshape(M, Dp) + attn, g1[...], be1[...])

    # ---- ReLU feed-forward, chunked along the FF axis ----------------------
    x1b = x1.astype(jnp.bfloat16)
    h2 = jnp.zeros((M, Dp), jnp.float32)
    for c0 in range(0, FFp, ff_chunk):
        c1 = min(FFp, c0 + ff_chunk)
        h1c = jnp.maximum(
            jnp.dot(x1b, w1[:, c0:c1], preferred_element_type=jnp.float32)
            + b1[:, c0:c1], 0.0)
        h2 = h2 + jnp.dot(h1c.astype(jnp.bfloat16), w2[c0:c1, :],
                          preferred_element_type=jnp.float32)
    h2 = h2 + b2[...]

    # Residual + LayerNorm2, write back to the resident scratch.
    x2 = layer_norm(x1 + h2, g2[...], be2[...])
    x_sc[...] = x2.reshape(Bb, T, Dp)

    # ---- masked average pooling (VPU multiply-reduce; only HBM store) ------
    @pl.when(layer == n_layers - 1)
    def _():
        mcol = maskt_ref[...]                                 # [Bb, T, 1]
        length = jnp.sum(mcol, axis=1, keepdims=True)         # [Bb, 1, 1]
        wts = mcol * (1.0 / (length + AVG_EPS))               # [Bb, T, 1]
        out_ref[...] = jnp.sum(x2.reshape(Bb, T, Dp) * wts, axis=1, keepdims=True)


# --------------------------------------------------------------------------
# Device-aware sizing.
# --------------------------------------------------------------------------
def _vmem_capacity_bytes():
    try:
        return int(pltpu.get_tpu_info().vmem_capacity_bytes)
    except Exception:
        pass
    try:
        kind = jax.devices()[0].device_kind.lower()
        if "v7" in kind:
            return 64 * 1024 * 1024
    except Exception:
        pass
    return 128 * 1024 * 1024


def _choose_config(B, Tp, Dp, QW, FFp, weight_bytes):
    cap = _vmem_capacity_bytes()
    vmem_limit = min(int(cap * 0.85), 112 * 1024 * 1024)
    # v5e/v6e (128 MiB VMEM): M ~ 512 rows; v7x (64 MiB, 2 TCs): M ~ 256 rows.
    target_rows = 512 if cap >= (96 << 20) else 256
    bb = max(1, target_rows // Tp)
    if bb >= B:
        Bb = B
    else:
        align = 128 // math.gcd(128, Tp)      # keep Bb*Tp a multiple of 128
        Bb = max(align, (bb // align) * align)
        if Bb >= B:
            Bb = B
    Bpad = -(-B // Bb) * Bb
    M = Bb * Tp
    ff_c = min(FFp, 512)
    # Rough per-step VMEM need: x block (2 buffers) + scratch + q/k/v bf16 +
    # f32 temporaries + one FFN chunk.
    act_bytes = (3 * Bb * Tp * Dp * 4
                 + M * (3 * QW * 2 + 6 * Dp * 4 + ff_c * 4))
    resident = (act_bytes + 2 * weight_bytes) <= int(0.7 * vmem_limit)
    return Bb, Bpad, vmem_limit, resident, ff_c


# --------------------------------------------------------------------------
# Wrapper: padding, batch blocking, BlockSpecs.
# --------------------------------------------------------------------------
def fused_encoder(feat, valid_mask, packed, n_heads):
    """feat: [B, T, D] f32 (already pos-encoded); valid_mask: [B, T] bool."""
    B, T, D = feat.shape
    L, Dp, QW = packed['wq'].shape
    FFp = packed['w1'].shape[2]
    assert QW % n_heads == 0
    HB = QW // n_heads

    # Pad D -> Dp (lane-dense) and T -> multiple of 8 (free in-kernel reshapes).
    Tp = _round_up(T, 8)
    mask3 = valid_mask.astype(jnp.float32).reshape(B, 1, T)
    x = feat
    if Dp != D:
        x = jnp.concatenate([x, jnp.zeros((B, T, Dp - D), x.dtype)], axis=-1)
    if Tp != T:
        x = jnp.concatenate([x, jnp.zeros((B, Tp - T, Dp), x.dtype)], axis=1)
        mask3 = jnp.concatenate([mask3, jnp.zeros((B, 1, Tp - T), mask3.dtype)], axis=2)

    weight_names = ('wq', 'wk', 'wv', 'bq', 'bk', 'bv', 'wo', 'bo',
                    'w1', 'b1', 'w2', 'b2', 'g1', 'be1', 'g2', 'be2')
    weights = [packed[k] for k in weight_names]
    weight_bytes = sum(int(a.size) * a.dtype.itemsize for a in weights)

    Bb, Bpad, vmem_limit, resident, ff_chunk = _choose_config(
        B, Tp, Dp, QW, FFp, weight_bytes)

    if Bpad != B:   # padded batch rows are fully masked -> pooled to zero, sliced off
        x = jnp.concatenate([x, jnp.zeros((Bpad - B, Tp, Dp), x.dtype)], axis=0)
        mask3 = jnp.concatenate([mask3, jnp.zeros((Bpad - B, 1, Tp), mask3.dtype)], axis=0)
    maskt = jnp.swapaxes(mask3, 1, 2)                       # [Bpad, Tp, 1] for pooling

    grid = (Bpad // Bb, L)

    def amap(b, l):
        return (b, 0, 0)

    if resident:
        def wmap(b, l):                                      # fetched once, stays resident
            return (0, 0, 0)
        wdim = L
    else:
        def wmap(b, l):                                      # per-layer streaming fallback
            return (l, 0, 0)
        wdim = 1

    w_specs = [pl.BlockSpec((wdim,) + tuple(a.shape[1:]), wmap) for a in weights]

    kernel = functools.partial(_fused_encoder_kernel,
                               n_heads=n_heads, d_real=D, head_block=HB,
                               resident_weights=resident, ff_chunk=ff_chunk)
    out = pl.pallas_call(
        kernel,
        out_shape=jax.ShapeDtypeStruct((Bpad, 1, Dp), jnp.float32),
        grid=grid,
        in_specs=[
            pl.BlockSpec((Bb, Tp, Dp), amap),    # activations
            pl.BlockSpec((Bb, 1, Tp), amap),     # key mask (attention bias)
            pl.BlockSpec((Bb, Tp, 1), amap),     # column mask (pooling weights)
        ] + w_specs,
        out_specs=pl.BlockSpec((Bb, 1, Dp), amap),
        scratch_shapes=[pltpu.VMEM((Bb, Tp, Dp), jnp.float32)],
        compiler_params=pltpu.CompilerParams(
            dimension_semantics=("parallel", "arbitrary"),
            vmem_limit_bytes=vmem_limit),
    )(x, mask3, maskt, *weights)
    return out[:B, 0, :D]


# --------------------------------------------------------------------------
# One-time weight packing (outside jit): stack over layers, transpose for
# row-major matmuls, fold 1/sqrt(dh) into Wq/bq, pad D/FF to multiples of
# 128, lay the QKV / out-proj head axes out in 128-lane-aligned blocks,
# cast matmul weights to bf16.  LN gammas are zero-padded so padded lanes
# stay exactly zero through every layer.
# --------------------------------------------------------------------------
def pack_single_encoder(enc, n_heads):
    layers = enc['layers']
    D = layers[0]['wo'].shape[0]
    FF = layers[0]['w1'].shape[0]
    H = n_heads
    assert D % H == 0
    dh = D // H
    HB = _round_up(dh, 128)
    QW = H * HB
    Dp = _round_up(D, 128)
    FFp = _round_up(FF, 128)
    scale = 1.0 / math.sqrt(dh)

    def pack_qkv(wqkv, bqkv, sel, scl):
        wt = wqkv[sel * D:(sel + 1) * D, :].T * scl           # [D_in, D_out]
        bt = bqkv[sel * D:(sel + 1) * D] * scl                # [D_out]
        wp = jnp.zeros((Dp, H, HB), jnp.float32)
        wp = wp.at[:D, :, :dh].set(wt.reshape(D, H, dh))
        bp = jnp.zeros((H, HB), jnp.float32).at[:, :dh].set(bt.reshape(H, dh))
        return wp.reshape(Dp, QW).astype(jnp.bfloat16), bp.reshape(1, QW)

    def pad_row_d(v):
        return jnp.zeros((1, Dp), jnp.float32).at[0, :D].set(v)

    def pack_layer(lp):
        wq, bq = pack_qkv(lp['wqkv'], lp['bqkv'], 0, scale)   # scale folded into Q
        wk, bk = pack_qkv(lp['wqkv'], lp['bqkv'], 1, 1.0)
        wv, bv = pack_qkv(lp['wqkv'], lp['bqkv'], 2, 1.0)
        wo_t = lp['wo'].T                                     # [D(ctx), D(out)]
        wo = jnp.zeros((H, HB, Dp), jnp.float32)
        wo = wo.at[:, :dh, :D].set(wo_t.reshape(H, dh, D))
        wo = wo.reshape(QW, Dp).astype(jnp.bfloat16)
        w1 = jnp.zeros((Dp, FFp), jnp.float32).at[:D, :FF].set(lp['w1'].T)
        w2 = jnp.zeros((FFp, Dp), jnp.float32).at[:FF, :D].set(lp['w2'].T)
        b1 = jnp.zeros((1, FFp), jnp.float32).at[0, :FF].set(lp['b1'])
        return dict(
            wq=wq, wk=wk, wv=wv, bq=bq, bk=bk, bv=bv,
            wo=wo, bo=pad_row_d(lp['bo']),
            w1=w1.astype(jnp.bfloat16), b1=b1,
            w2=w2.astype(jnp.bfloat16), b2=pad_row_d(lp['b2']),
            g1=pad_row_d(lp['g1']), be1=pad_row_d(lp['be1']),
            g2=pad_row_d(lp['g2']), be2=pad_row_d(lp['be2']))

    packed_layers = [pack_layer(lp) for lp in layers]
    stacked = {k: jnp.stack([pli[k] for pli in packed_layers], axis=0)
               for k in packed_layers[0]}
    stacked['pos'] = enc['pos']                                # [num_pos, D] f32
    return stacked


def pack_params(params, n_heads):
    return dict(
        word_embedding=params['word_embedding'],
        tfs={k: pack_single_encoder(v, n_heads) for k, v in params['tfs'].items()},
        merger={k: pack_single_encoder(v, n_heads) for k, v in params['merger'].items()},
    )


# --------------------------------------------------------------------------
# Module-level forward (plain-JAX glue around the fused kernel).
# --------------------------------------------------------------------------
def single_transformer_encoder(enc_packed, feat, ignore_mask, n_heads):
    """feat: [B, T, D]; ignore_mask: [B, T] bool, True = padded position."""
    T = feat.shape[1]
    feat = feat + enc_packed['pos'][:T][None, :, :]    # LearnedPositionalEncoding
    # TODO(synk): dropout layers (p=0.1) are omitted — eval/inference semantics.
    valid = jnp.logical_not(ignore_mask)
    return fused_encoder(feat, valid, enc_packed, n_heads)


def recipe_transformer_encoder(packed, tokens, name, n_heads):
    """Mirrors RecipeTransformerEncoder.forward (2-D or 3-D token inputs)."""
    if tokens.ndim == 2:
        # NOTE: rows whose tokens are all padding yield a zero vector here
        # (PyTorch would propagate NaN through a fully-masked softmax).
        ignore_mask = tokens == 0
        emb = jnp.take(packed['word_embedding'], tokens, axis=0)
        return single_transformer_encoder(packed['tfs'][name], emb, ignore_mask, n_heads)

    B, N, T = tokens.shape
    tok_rs = tokens.reshape(B * N, T)
    ignore_mask = tok_rs == 0
    ignore_mask = ignore_mask.at[:, 0].set(False)              # first position never ignored
    emb = jnp.take(packed['word_embedding'], tok_rs, axis=0)
    out = single_transformer_encoder(packed['tfs'][name], emb, ignore_mask, n_heads)
    out = out.reshape(B, N, -1)
    mask_list = (tokens > 0).sum(axis=-1) > 0                  # non-empty sub-sequences
    return single_transformer_encoder(packed['merger'][name], out,
                                      jnp.logical_not(mask_list), n_heads)


# --------------------------------------------------------------------------
# Deterministic parameter construction (shapes from the PyTorch __init__).
# --------------------------------------------------------------------------
def init_params(key, vocab_size, hidden_size, n_heads, n_layers,
                dim_feedforward=2048, num_pos_embeddings=50):
    keys = iter(jax.random.split(key, 512))

    def xavier_normal(shape):
        fan_out, fan_in = shape
        std = math.sqrt(2.0 / (fan_in + fan_out))
        return std * jax.random.normal(next(keys), shape, jnp.float32)

    def make_layer(d, ff):
        return dict(
            wqkv=xavier_normal((3 * d, d)), bqkv=jnp.zeros((3 * d,), jnp.float32),
            wo=xavier_normal((d, d)),       bo=jnp.zeros((d,), jnp.float32),
            w1=xavier_normal((ff, d)),      b1=jnp.zeros((ff,), jnp.float32),
            w2=xavier_normal((d, ff)),      b2=jnp.zeros((d,), jnp.float32),
            g1=jnp.ones((d,), jnp.float32), be1=jnp.zeros((d,), jnp.float32),
            g2=jnp.ones((d,), jnp.float32), be2=jnp.zeros((d,), jnp.float32),
        )

    def make_encoder(d):
        return dict(
            pos=xavier_normal((num_pos_embeddings, d)),
            layers=[make_layer(d, dim_feedforward) for _ in range(n_layers)],
        )

    return dict(
        word_embedding=jax.random.normal(next(keys), (vocab_size, hidden_size), jnp.float32),
        tfs={n: make_encoder(hidden_size)
             for n in ('title', 'ingredients', 'instructions')},
        merger={n: make_encoder(hidden_size)
                for n in ('ingredients', 'instructions')},
    )


if __name__ == "__main__":
    vocab_size, hidden_size, n_heads, n_layers = 50, 32, 4, 2
    B, N, T = 2, 3, 8

    root = jax.random.PRNGKey(0)
    pkey, k1, k2 = jax.random.split(root, 3)
    # dim_feedforward=2048 is the nn.TransformerEncoderLayer default used by the module.
    params = init_params(pkey, vocab_size, hidden_size, n_heads, n_layers,
                         dim_feedforward=2048)
    packed = pack_params(params, n_heads)          # one-time pre-pack, outside jit

    # 2-D input path ('title'): tokens with some trailing padding (0).
    title_tokens = jax.random.randint(k1, (B, T), 1, vocab_size, dtype=jnp.int32)
    title_tokens = title_tokens.at[:, -2:].set(0)

    # 3-D input path ('ingredients'): exercises both tfs[...] and merger[...].
    ingr_tokens = jax.random.randint(k2, (B, N, T), 0, vocab_size, dtype=jnp.int32)
    ingr_tokens = ingr_tokens.at[:, 0, 0].set(jnp.maximum(ingr_tokens[:, 0, 0], 1))

    encode = jax.jit(recipe_transformer_encoder, static_argnames=('name', 'n_heads'))
    title_out = encode(packed, title_tokens, name='title', n_heads=n_heads)
    ingr_out = encode(packed, ingr_tokens, name='ingredients', n_heads=n_heads)
    jax.block_until_ready((title_out, ingr_out))

    assert title_out.shape == (B, hidden_size), title_out.shape
    assert ingr_out.shape == (B, hidden_size), ingr_out.shape
    assert bool(jnp.all(jnp.isfinite(title_out))) and bool(jnp.all(jnp.isfinite(ingr_out)))
    print("KERNEL_OK")
</pallas_src>

<mosaic_0001>
module attributes {stable_mosaic.version = 11 : i64} {
  func.func @_fused_encoder_kernel(%arg0: i32, %arg1: i32, %arg2: memref<2x8x128xf32, #tpu.memory_space<vmem>>, %arg3: memref<2x1x8xf32, #tpu.memory_space<vmem>>, %arg4: memref<2x8x1xf32, #tpu.memory_space<vmem>>, %arg5: memref<2x128x512xbf16, #tpu.memory_space<vmem>>, %arg6: memref<2x128x512xbf16, #tpu.memory_space<vmem>>, %arg7: memref<2x128x512xbf16, #tpu.memory_space<vmem>>, %arg8: memref<2x1x512xf32, #tpu.memory_space<vmem>>, %arg9: memref<2x1x512xf32, #tpu.memory_space<vmem>>, %arg10: memref<2x1x512xf32, #tpu.memory_space<vmem>>, %arg11: memref<2x512x128xbf16, #tpu.memory_space<vmem>>, %arg12: memref<2x1x128xf32, #tpu.memory_space<vmem>>, %arg13: memref<2x128x2048xbf16, #tpu.memory_space<vmem>>, %arg14: memref<2x1x2048xf32, #tpu.memory_space<vmem>>, %arg15: memref<2x2048x128xbf16, #tpu.memory_space<vmem>>, %arg16: memref<2x1x128xf32, #tpu.memory_space<vmem>>, %arg17: memref<2x1x128xf32, #tpu.memory_space<vmem>>, %arg18: memref<2x1x128xf32, #tpu.memory_space<vmem>>, %arg19: memref<2x1x128xf32, #tpu.memory_space<vmem>>, %arg20: memref<2x1x128xf32, #tpu.memory_space<vmem>>, %arg21: memref<2x1x128xf32, #tpu.memory_space<vmem>>, %arg22: memref<2x8x128xf32, #tpu.memory_space<vmem>>) attributes {dimension_semantics = [#tpu.dimension_semantics<parallel>, #tpu.dimension_semantics<arbitrary>], iteration_bounds = array<i64: 1, 2>, scalar_prefetch = 0 : i64, scratch_operands = 1 : i64, tpu.core_type = #tpu.core_type<tc>, window_params = [{transform_indices = @transform_0, window_bounds = array<i64: 2, 8, 128>}, {transform_indices = @transform_1, window_bounds = array<i64: 2, 1, 8>}, {transform_indices = @transform_2, window_bounds = array<i64: 2, 8, 1>}, {pipeline_mode = #tpu.pipeline_mode<synchronous>, transform_indices = @transform_3, window_bounds = array<i64: 2, 128, 512>}, {pipeline_mode = #tpu.pipeline_mode<synchronous>, transform_indices = @transform_4, window_bounds = array<i64: 2, 128, 512>}, {pipeline_mode = #tpu.pipeline_mode<synchronous>, transform_indices = @transform_5, window_bounds = array<i64: 2, 128, 512>}, {pipeline_mode = #tpu.pipeline_mode<synchronous>, transform_indices = @transform_6, window_bounds = array<i64: 2, 1, 512>}, {pipeline_mode = #tpu.pipeline_mode<synchronous>, transform_indices = @transform_7, window_bounds = array<i64: 2, 1, 512>}, {pipeline_mode = #tpu.pipeline_mode<synchronous>, transform_indices = @transform_8, window_bounds = array<i64: 2, 1, 512>}, {pipeline_mode = #tpu.pipeline_mode<synchronous>, transform_indices = @transform_9, window_bounds = array<i64: 2, 512, 128>}, {pipeline_mode = #tpu.pipeline_mode<synchronous>, transform_indices = @transform_10, window_bounds = array<i64: 2, 1, 128>}, {pipeline_mode = #tpu.pipeline_mode<synchronous>, transform_indices = @transform_11, window_bounds = array<i64: 2, 128, 2048>}, {pipeline_mode = #tpu.pipeline_mode<synchronous>, transform_indices = @transform_12, window_bounds = array<i64: 2, 1, 2048>}, {pipeline_mode = #tpu.pipeline_mode<synchronous>, transform_indices = @transform_13, window_bounds = array<i64: 2, 2048, 128>}, {pipeline_mode = #tpu.pipeline_mode<synchronous>, transform_indices = @transform_14, window_bounds = array<i64: 2, 1, 128>}, {pipeline_mode = #tpu.pipeline_mode<synchronous>, transform_indices = @transform_15, window_bounds = array<i64: 2, 1, 128>}, {pipeline_mode = #tpu.pipeline_mode<synchronous>, transform_indices = @transform_16, window_bounds = array<i64: 2, 1, 128>}, {pipeline_mode = #tpu.pipeline_mode<synchronous>, transform_indices = @transform_17, window_bounds = array<i64: 2, 1, 128>}, {pipeline_mode = #tpu.pipeline_mode<synchronous>, transform_indices = @transform_18, window_bounds = array<i64: 2, 1, 128>}, {transform_indices = @transform_19, window_bounds = array<i64: 2, 1, 128>}]} {
    %c0_i32 = arith.constant 0 : i32
    %0 = arith.cmpi eq, %arg1, %c0_i32 : i32
    %1 = arith.extui %0 : i1 to i32
    %c0_i32_0 = arith.constant 0 : i32
    %2 = arith.cmpi ne, %1, %c0_i32_0 : i32
    scf.if %2 {
      %c0_143 = arith.constant 0 : index
      %c0_144 = arith.constant 0 : index
      %c0_145 = arith.constant 0 : index
      %295 = vector.load %arg2[%c0_143, %c0_144, %c0_145] : memref<2x8x128xf32, #tpu.memory_space<vmem>>, vector<2x8x128xf32>
      %c0_146 = arith.constant 0 : index
      %c0_147 = arith.constant 0 : index
      %c0_148 = arith.constant 0 : index
      %296 = vector.load %arg22[%c0_146, %c0_147, %c0_148] : memref<2x8x128xf32, #tpu.memory_space<vmem>>, vector<2x8x128xf32>
      tpu.vector_store %arg22[%c0_146, %c0_147, %c0_148], %295 {strides = array<i32>} : memref<2x8x128xf32, #tpu.memory_space<vmem>>, vector<2x8x128xf32>,
    } else {
    }
    %3 = tpu.iota {dimensions = array<i32: 1>} : vector<1x128xi32>
    %c32_i32 = arith.constant 32 : i32
    %4 = vector.broadcast %c32_i32 : i32 to vector<1x128xi32>
    %5 = arith.cmpi slt, %3, %4 : vector<1x128xi32>
    %6 = arith.extui %5 : vector<1x128xi1> to vector<1x128xi32>
    %7 = arith.sitofp %6 : vector<1x128xi32> to vector<1x128xf32>
    %c0 = arith.constant 0 : index
    %c0_1 = arith.constant 0 : index
    %c0_2 = arith.constant 0 : index
    %8 = vector.load %arg3[%c0, %c0_1, %c0_2] : memref<2x1x8xf32, #tpu.memory_space<vmem>>, vector<2x1x8xf32>
    %cst = arith.constant 1.000000e+00 : f32
    %9 = vector.broadcast %cst : f32 to vector<2x1x8xf32>
    %10 = arith.subf %9, %8 : vector<2x1x8xf32>
    %cst_3 = arith.constant -1.000000e+30 : f32
    %11 = vector.broadcast %cst_3 : f32 to vector<2x1x8xf32>
    %12 = arith.mulf %10, %11 : vector<2x1x8xf32>
    %c0_4 = arith.constant 0 : index
    %c0_5 = arith.constant 0 : index
    %c0_6 = arith.constant 0 : index
    %13 = vector.load %arg22[%c0_4, %c0_5, %c0_6] : memref<2x8x128xf32, #tpu.memory_space<vmem>>, vector<2x8x128xf32>
    %14 = vector.shape_cast %13 : vector<2x8x128xf32> to vector<16x128xf32>
    %15 = arith.truncf %14 : vector<16x128xf32> to vector<16x128xbf16>
    %16 = arith.index_cast %arg1 : i32 to index
    %c0_7 = arith.constant 0 : index
    %c0_8 = arith.constant 0 : index
    %17 = vector.load %arg5[%16, %c0_7, %c0_8] : memref<2x128x512xbf16, #tpu.memory_space<vmem>>, vector<1x128x512xbf16>
    %18 = vector.shape_cast %17 : vector<1x128x512xbf16> to vector<128x512xbf16>
    %cst_9 = arith.constant dense<0.000000e+00> : vector<16x512xf32>
    %19 = tpu.matmul %15, %18, %cst_9 {dimension_numbers = #tpu.dot_dimension_numbers<[1], [0], [0], [1], [0, 0, 1, 1], [], []>} : vector<16x128xbf16>, vector<128x512xbf16>, vector<16x512xf32> -> vector<16x512xf32>
    %20 = arith.index_cast %arg1 : i32 to index
    %c0_10 = arith.constant 0 : index
    %c0_11 = arith.constant 0 : index
    %21 = vector.load %arg8[%20, %c0_10, %c0_11] : memref<2x1x512xf32, #tpu.memory_space<vmem>>, vector<1x1x512xf32>
    %22 = vector.shape_cast %21 : vector<1x1x512xf32> to vector<1x512xf32>
    %23 = vector.broadcast %22 : vector<1x512xf32> to vector<16x512xf32>
    %24 = arith.addf %19, %23 : vector<16x512xf32>
    %25 = arith.index_cast %arg1 : i32 to index
    %c0_12 = arith.constant 0 : index
    %c0_13 = arith.constant 0 : index
    %26 = vector.load %arg6[%25, %c0_12, %c0_13] : memref<2x128x512xbf16, #tpu.memory_space<vmem>>, vector<1x128x512xbf16>
    %27 = vector.shape_cast %26 : vector<1x128x512xbf16> to vector<128x512xbf16>
    %cst_14 = arith.constant dense<0.000000e+00> : vector<16x512xf32>
    %28 = tpu.matmul %15, %27, %cst_14 {dimension_numbers = #tpu.dot_dimension_numbers<[1], [0], [0], [1], [0, 0, 1, 1], [], []>} : vector<16x128xbf16>, vector<128x512xbf16>, vector<16x512xf32> -> vector<16x512xf32>
    %29 = arith.index_cast %arg1 : i32 to index
    %c0_15 = arith.constant 0 : index
    %c0_16 = arith.constant 0 : index
    %30 = vector.load %arg9[%29, %c0_15, %c0_16] : memref<2x1x512xf32, #tpu.memory_space<vmem>>, vector<1x1x512xf32>
    %31 = vector.shape_cast %30 : vector<1x1x512xf32> to vector<1x512xf32>
    %32 = vector.broadcast %31 : vector<1x512xf32> to vector<16x512xf32>
    %33 = arith.addf %28, %32 : vector<16x512xf32>
    %34 = arith.index_cast %arg1 : i32 to index
    %c0_17 = arith.constant 0 : index
    %c0_18 = arith.constant 0 : index
    %35 = vector.load %arg7[%34, %c0_17, %c0_18] : memref<2x128x512xbf16, #tpu.memory_space<vmem>>, vector<1x128x512xbf16>
    %36 = vector.shape_cast %35 : vector<1x128x512xbf16> to vector<128x512xbf16>
    %cst_19 = arith.constant dense<0.000000e+00> : vector<16x512xf32>
    %37 = tpu.matmul %15, %36, %cst_19 {dimension_numbers = #tpu.dot_dimension_numbers<[1], [0], [0], [1], [0, 0, 1, 1], [], []>} : vector<16x128xbf16>, vector<128x512xbf16>, vector<16x512xf32> -> vector<16x512xf32>
    %38 = arith.index_cast %arg1 : i32 to index
    %c0_20 = arith.constant 0 : index
    %c0_21 = arith.constant 0 : index
    %39 = vector.load %arg10[%38, %c0_20, %c0_21] : memref<2x1x512xf32, #tpu.memory_space<vmem>>, vector<1x1x512xf32>
    %40 = vector.shape_cast %39 : vector<1x1x512xf32> to vector<1x512xf32>
    %41 = vector.broadcast %40 : vector<1x512xf32> to vector<16x512xf32>
    %42 = arith.addf %37, %41 : vector<16x512xf32>
    %43 = arith.truncf %24 : vector<16x512xf32> to vector<16x512xbf16>
    %44 = vector.shape_cast %43 : vector<16x512xbf16> to vector<2x8x512xbf16>
    %45 = arith.truncf %33 : vector<16x512xf32> to vector<16x512xbf16>
    %46 = vector.shape_cast %45 : vector<16x512xbf16> to vector<2x8x512xbf16>
    %47 = arith.truncf %42 : vector<16x512xf32> to vector<16x512xbf16>
    %48 = vector.shape_cast %47 : vector<16x512xbf16> to vector<2x8x512xbf16>
    %cst_22 = arith.constant 0.000000e+00 : f32
    %49 = vector.broadcast %cst_22 : f32 to vector<16x128xf32>
    %50 = vector.extract_strided_slice %44 {offsets = [0, 0, 0], sizes = [2, 8, 128], strides = [1, 1, 1]} : vector<2x8x512xbf16> to vector<2x8x128xbf16>
    %51 = vector.extract_strided_slice %46 {offsets = [0, 0, 0], sizes = [2, 8, 128], strides = [1, 1, 1]} : vector<2x8x512xbf16> to vector<2x8x128xbf16>
    "tpu.trace_start"() <{level = 10 : i32, message = "bqd,bkd->bqk"}> : () -> ()
    %cst_23 = arith.constant dense<0.000000e+00> : vector<2x8x8xf32>
    %52 = tpu.matmul %50, %51, %cst_23 {dimension_numbers = #tpu.dot_dimension_numbers<[2], [2], [1], [1], [0, 0, 0, 1, 1, 1], [0], [0]>} : vector<2x8x128xbf16>, vector<2x8x128xbf16>, vector<2x8x8xf32> -> vector<2x8x8xf32>
    "tpu.trace_stop"() : () -> ()
    %53 = vector.broadcast %12 : vector<2x1x8xf32> to vector<2x8x8xf32>
    %54 = arith.addf %52, %53 : vector<2x8x8xf32>
    %cst_24 = arith.constant dense<0xFF800000> : vector<2x8xf32>
    %55 = vector.multi_reduction <maximumf>, %54, %cst_24 [2] : vector<2x8x8xf32> to vector<2x8xf32>
    %56 = vector.shape_cast %55 : vector<2x8xf32> to vector<2x8x1xf32>
    %57 = vector.broadcast %56 : vector<2x8x1xf32> to vector<2x8x8xf32>
    %58 = arith.subf %54, %57 : vector<2x8x8xf32>
    %59 = math.exp %58 : vector<2x8x8xf32>
    %cst_25 = arith.constant dense<0.000000e+00> : vector<2x8xf32>
    %60 = vector.multi_reduction <add>, %59, %cst_25 [2] : vector<2x8x8xf32> to vector<2x8xf32>
    %61 = vector.shape_cast %60 : vector<2x8xf32> to vector<2x8x1xf32>
    %62 = tpu.reciprocal %61 {approx = true} : vector<2x8x1xf32> -> vector<2x8x1xf32>
    %63 = vector.broadcast %62 : vector<2x8x1xf32> to vector<2x8x8xf32>
    %64 = arith.mulf %59, %63 : vector<2x8x8xf32>
    %65 = arith.truncf %64 : vector<2x8x8xf32> to vector<2x8x8xbf16>
    %66 = vector.extract_strided_slice %48 {offsets = [0, 0, 0], sizes = [2, 8, 128], strides = [1, 1, 1]} : vector<2x8x512xbf16> to vector<2x8x128xbf16>
    "tpu.trace_start"() <{level = 10 : i32, message = "bqk,bkd->bqd"}> : () -> ()
    %cst_26 = arith.constant dense<0.000000e+00> : vector<2x8x128xf32>
    %67 = tpu.matmul %65, %66, %cst_26 {dimension_numbers = #tpu.dot_dimension_numbers<[2], [1], [1], [2], [0, 0, 0, 1, 1, 2], [0], [0]>} : vector<2x8x8xbf16>, vector<2x8x128xbf16>, vector<2x8x128xf32> -> vector<2x8x128xf32>
    "tpu.trace_stop"() : () -> ()
    %68 = vector.shape_cast %67 : vector<2x8x128xf32> to vector<16x128xf32>
    %69 = arith.truncf %68 : vector<16x128xf32> to vector<16x128xbf16>
    %c0_i32_27 = arith.constant 0 : i32
    %c0_i32_28 = arith.constant 0 : i32
    %70 = tpu.memref_slice %arg11[%arg1, %c0_i32_27, %c0_i32_28] : memref<2x512x128xbf16, #tpu.memory_space<vmem>> -> memref<1x512x128xbf16, #tpu.memory_space<vmem>>
    %71 = tpu.memref_squeeze %70 : memref<1x512x128xbf16, #tpu.memory_space<vmem>> -> memref<512x128xbf16, #tpu.memory_space<vmem>>
    %c0_29 = arith.constant 0 : index
    %c0_30 = arith.constant 0 : index
    %72 = vector.load %71[%c0_29, %c0_30] : memref<512x128xbf16, #tpu.memory_space<vmem>>, vector<128x128xbf16>
    %cst_31 = arith.constant dense<0.000000e+00> : vector<16x128xf32>
    %73 = tpu.matmul %69, %72, %cst_31 {dimension_numbers = #tpu.dot_dimension_numbers<[1], [0], [0], [1], [0, 0, 1, 1], [], []>} : vector<16x128xbf16>, vector<128x128xbf16>, vector<16x128xf32> -> vector<16x128xf32>
    %74 = arith.addf %49, %73 : vector<16x128xf32>
    %75 = vector.extract_strided_slice %44 {offsets = [0, 0, 128], sizes = [2, 8, 128], strides = [1, 1, 1]} : vector<2x8x512xbf16> to vector<2x8x128xbf16>
    %76 = vector.extract_strided_slice %46 {offsets = [0, 0, 128], sizes = [2, 8, 128], strides = [1, 1, 1]} : vector<2x8x512xbf16> to vector<2x8x128xbf16>
    "tpu.trace_start"() <{level = 10 : i32, message = "bqd,bkd->bqk"}> : () -> ()
    %cst_32 = arith.constant dense<0.000000e+00> : vector<2x8x8xf32>
    %77 = tpu.matmul %75, %76, %cst_32 {dimension_numbers = #tpu.dot_dimension_numbers<[2], [2], [1], [1], [0, 0, 0, 1, 1, 1], [0], [0]>} : vector<2x8x128xbf16>, vector<2x8x128xbf16>, vector<2x8x8xf32> -> vector<2x8x8xf32>
    "tpu.trace_stop"() : () -> ()
    %78 = vector.broadcast %12 : vector<2x1x8xf32> to vector<2x8x8xf32>
    %79 = arith.addf %77, %78 : vector<2x8x8xf32>
    %cst_33 = arith.constant dense<0xFF800000> : vector<2x8xf32>
    %80 = vector.multi_reduction <maximumf>, %79, %cst_33 [2] : vector<2x8x8xf32> to vector<2x8xf32>
    %81 = vector.shape_cast %80 : vector<2x8xf32> to vector<2x8x1xf32>
    %82 = vector.broadcast %81 : vector<2x8x1xf32> to vector<2x8x8xf32>
    %83 = arith.subf %79, %82 : vector<2x8x8xf32>
    %84 = math.exp %83 : vector<2x8x8xf32>
    %cst_34 = arith.constant dense<0.000000e+00> : vector<2x8xf32>
    %85 = vector.multi_reduction <add>, %84, %cst_34 [2] : vector<2x8x8xf32> to vector<2x8xf32>
    %86 = vector.shape_cast %85 : vector<2x8xf32> to vector<2x8x1xf32>
    %87 = tpu.reciprocal %86 {approx = true} : vector<2x8x1xf32> -> vector<2x8x1xf32>
    %88 = vector.broadcast %87 : vector<2x8x1xf32> to vector<2x8x8xf32>
    %89 = arith.mulf %84, %88 : vector<2x8x8xf32>
    %90 = arith.truncf %89 : vector<2x8x8xf32> to vector<2x8x8xbf16>
    %91 = vector.extract_strided_slice %48 {offsets = [0, 0, 128], sizes = [2, 8, 128], strides = [1, 1, 1]} : vector<2x8x512xbf16> to vector<2x8x128xbf16>
    "tpu.trace_start"() <{level = 10 : i32, message = "bqk,bkd->bqd"}> : () -> ()
    %cst_35 = arith.constant dense<0.000000e+00> : vector<2x8x128xf32>
    %92 = tpu.matmul %90, %91, %cst_35 {dimension_numbers = #tpu.dot_dimension_numbers<[2], [1], [1], [2], [0, 0, 0, 1, 1, 2], [0], [0]>} : vector<2x8x8xbf16>, vector<2x8x128xbf16>, vector<2x8x128xf32> -> vector<2x8x128xf32>
    "tpu.trace_stop"() : () -> ()
    %93 = vector.shape_cast %92 : vector<2x8x128xf32> to vector<16x128xf32>
    %94 = arith.truncf %93 : vector<16x128xf32> to vector<16x128xbf16>
    %c0_i32_36 = arith.constant 0 : i32
    %c0_i32_37 = arith.constant 0 : i32
    %95 = tpu.memref_slice %arg11[%arg1, %c0_i32_36, %c0_i32_37] : memref<2x512x128xbf16, #tpu.memory_space<vmem>> -> memref<1x512x128xbf16, #tpu.memory_space<vmem>>
    %96 = tpu.memref_squeeze %95 : memref<1x512x128xbf16, #tpu.memory_space<vmem>> -> memref<512x128xbf16, #tpu.memory_space<vmem>>
    %c128 = arith.constant 128 : index
    %c0_38 = arith.constant 0 : index
    %97 = vector.load %96[%c128, %c0_38] : memref<512x128xbf16, #tpu.memory_space<vmem>>, vector<128x128xbf16>
    %cst_39 = arith.constant dense<0.000000e+00> : vector<16x128xf32>
    %98 = tpu.matmul %94, %97, %cst_39 {dimension_numbers = #tpu.dot_dimension_numbers<[1], [0], [0], [1], [0, 0, 1, 1], [], []>} : vector<16x128xbf16>, vector<128x128xbf16>, vector<16x128xf32> -> vector<16x128xf32>
    %99 = arith.addf %74, %98 : vector<16x128xf32>
    %100 = vector.extract_strided_slice %44 {offsets = [0, 0, 256], sizes = [2, 8, 128], strides = [1, 1, 1]} : vector<2x8x512xbf16> to vector<2x8x128xbf16>
    %101 = vector.extract_strided_slice %46 {offsets = [0, 0, 256], sizes = [2, 8, 128], strides = [1, 1, 1]} : vector<2x8x512xbf16> to vector<2x8x128xbf16>
    "tpu.trace_start"() <{level = 10 : i32, message = "bqd,bkd->bqk"}> : () -> ()
    %cst_40 = arith.constant dense<0.000000e+00> : vector<2x8x8xf32>
    %102 = tpu.matmul %100, %101, %cst_40 {dimension_numbers = #tpu.dot_dimension_numbers<[2], [2], [1], [1], [0, 0, 0, 1, 1, 1], [0], [0]>} : vector<2x8x128xbf16>, vector<2x8x128xbf16>, vector<2x8x8xf32> -> vector<2x8x8xf32>
    "tpu.trace_stop"() : () -> ()
    %103 = vector.broadcast %12 : vector<2x1x8xf32> to vector<2x8x8xf32>
    %104 = arith.addf %102, %103 : vector<2x8x8xf32>
    %cst_41 = arith.constant dense<0xFF800000> : vector<2x8xf32>
    %105 = vector.multi_reduction <maximumf>, %104, %cst_41 [2] : vector<2x8x8xf32> to vector<2x8xf32>
    %106 = vector.shape_cast %105 : vector<2x8xf32> to vector<2x8x1xf32>
    %107 = vector.broadcast %106 : vector<2x8x1xf32> to vector<2x8x8xf32>
    %108 = arith.subf %104, %107 : vector<2x8x8xf32>
    %109 = math.exp %108 : vector<2x8x8xf32>
    %cst_42 = arith.constant dense<0.000000e+00> : vector<2x8xf32>
    %110 = vector.multi_reduction <add>, %109, %cst_42 [2] : vector<2x8x8xf32> to vector<2x8xf32>
    %111 = vector.shape_cast %110 : vector<2x8xf32> to vector<2x8x1xf32>
    %112 = tpu.reciprocal %111 {approx = true} : vector<2x8x1xf32> -> vector<2x8x1xf32>
    %113 = vector.broadcast %112 : vector<2x8x1xf32> to vector<2x8x8xf32>
    %114 = arith.mulf %109, %113 : vector<2x8x8xf32>
    %115 = arith.truncf %114 : vector<2x8x8xf32> to vector<2x8x8xbf16>
    %116 = vector.extract_strided_slice %48 {offsets = [0, 0, 256], sizes = [2, 8, 128], strides = [1, 1, 1]} : vector<2x8x512xbf16> to vector<2x8x128xbf16>
    "tpu.trace_start"() <{level = 10 : i32, message = "bqk,bkd->bqd"}> : () -> ()
    %cst_43 = arith.constant dense<0.000000e+00> : vector<2x8x128xf32>
    %117 = tpu.matmul %115, %116, %cst_43 {dimension_numbers = #tpu.dot_dimension_numbers<[2], [1], [1], [2], [0, 0, 0, 1, 1, 2], [0], [0]>} : vector<2x8x8xbf16>, vector<2x8x128xbf16>, vector<2x8x128xf32> -> vector<2x8x128xf32>
    "tpu.trace_stop"() : () -> ()
    %118 = vector.shape_cast %117 : vector<2x8x128xf32> to vector<16x128xf32>
    %119 = arith.truncf %118 : vector<16x128xf32> to vector<16x128xbf16>
    %c0_i32_44 = arith.constant 0 : i32
    %c0_i32_45 = arith.constant 0 : i32
    %120 = tpu.memref_slice %arg11[%arg1, %c0_i32_44, %c0_i32_45] : memref<2x512x128xbf16, #tpu.memory_space<vmem>> -> memref<1x512x128xbf16, #tpu.memory_space<vmem>>
    %121 = tpu.memref_squeeze %120 : memref<1x512x128xbf16, #tpu.memory_space<vmem>> -> memref<512x128xbf16, #tpu.memory_space<vmem>>
    %c256 = arith.constant 256 : index
    %c0_46 = arith.constant 0 : index
    %122 = vector.load %121[%c256, %c0_46] : memref<512x128xbf16, #tpu.memory_space<vmem>>, vector<128x128xbf16>
    %cst_47 = arith.constant dense<0.000000e+00> : vector<16x128xf32>
    %123 = tpu.matmul %119, %122, %cst_47 {dimension_numbers = #tpu.dot_dimension_numbers<[1], [0], [0], [1], [0, 0, 1, 1], [], []>} : vector<16x128xbf16>, vector<128x128xbf16>, vector<16x128xf32> -> vector<16x128xf32>
    %124 = arith.addf %99, %123 : vector<16x128xf32>
    %125 = vector.extract_strided_slice %44 {offsets = [0, 0, 384], sizes = [2, 8, 128], strides = [1, 1, 1]} : vector<2x8x512xbf16> to vector<2x8x128xbf16>
    %126 = vector.extract_strided_slice %46 {offsets = [0, 0, 384], sizes = [2, 8, 128], strides = [1, 1, 1]} : vector<2x8x512xbf16> to vector<2x8x128xbf16>
    "tpu.trace_start"() <{level = 10 : i32, message = "bqd,bkd->bqk"}> : () -> ()
    %cst_48 = arith.constant dense<0.000000e+00> : vector<2x8x8xf32>
    %127 = tpu.matmul %125, %126, %cst_48 {dimension_numbers = #tpu.dot_dimension_numbers<[2], [2], [1], [1], [0, 0, 0, 1, 1, 1], [0], [0]>} : vector<2x8x128xbf16>, vector<2x8x128xbf16>, vector<2x8x8xf32> -> vector<2x8x8xf32>
    "tpu.trace_stop"() : () -> ()
    %128 = vector.broadcast %12 : vector<2x1x8xf32> to vector<2x8x8xf32>
    %129 = arith.addf %127, %128 : vector<2x8x8xf32>
    %cst_49 = arith.constant dense<0xFF800000> : vector<2x8xf32>
    %130 = vector.multi_reduction <maximumf>, %129, %cst_49 [2] : vector<2x8x8xf32> to vector<2x8xf32>
    %131 = vector.shape_cast %130 : vector<2x8xf32> to vector<2x8x1xf32>
    %132 = vector.broadcast %131 : vector<2x8x1xf32> to vector<2x8x8xf32>
    %133 = arith.subf %129, %132 : vector<2x8x8xf32>
    %134 = math.exp %133 : vector<2x8x8xf32>
    %cst_50 = arith.constant dense<0.000000e+00> : vector<2x8xf32>
    %135 = vector.multi_reduction <add>, %134, %cst_50 [2] : vector<2x8x8xf32> to vector<2x8xf32>
    %136 = vector.shape_cast %135 : vector<2x8xf32> to vector<2x8x1xf32>
    %137 = tpu.reciprocal %136 {approx = true} : vector<2x8x1xf32> -> vector<2x8x1xf32>
    %138 = vector.broadcast %137 : vector<2x8x1xf32> to vector<2x8x8xf32>
    %139 = arith.mulf %134, %138 : vector<2x8x8xf32>
    %140 = arith.truncf %139 : vector<2x8x8xf32> to vector<2x8x8xbf16>
    %141 = vector.extract_strided_slice %48 {offsets = [0, 0, 384], sizes = [2, 8, 128], strides = [1, 1, 1]} : vector<2x8x512xbf16> to vector<2x8x128xbf16>
    "tpu.trace_start"() <{level = 10 : i32, message = "bqk,bkd->bqd"}> : () -> ()
    %cst_51 = arith.constant dense<0.000000e+00> : vector<2x8x128xf32>
    %142 = tpu.matmul %140, %141, %cst_51 {dimension_numbers = #tpu.dot_dimension_numbers<[2], [1], [1], [2], [0, 0, 0, 1, 1, 2], [0], [0]>} : vector<2x8x8xbf16>, vector<2x8x128xbf16>, vector<2x8x128xf32> -> vector<2x8x128xf32>
    "tpu.trace_stop"() : () -> ()
    %143 = vector.shape_cast %142 : vector<2x8x128xf32> to vector<16x128xf32>
    %144 = arith.truncf %143 : vector<16x128xf32> to vector<16x128xbf16>
    %c0_i32_52 = arith.constant 0 : i32
    %c0_i32_53 = arith.constant 0 : i32
    %145 = tpu.memref_slice %arg11[%arg1, %c0_i32_52, %c0_i32_53] : memref<2x512x128xbf16, #tpu.memory_space<vmem>> -> memref<1x512x128xbf16, #tpu.memory_space<vmem>>
    %146 = tpu.memref_squeeze %145 : memref<1x512x128xbf16, #tpu.memory_space<vmem>> -> memref<512x128xbf16, #tpu.memory_space<vmem>>
    %c384 = arith.constant 384 : index
    %c0_54 = arith.constant 0 : index
    %147 = vector.load %146[%c384, %c0_54] : memref<512x128xbf16, #tpu.memory_space<vmem>>, vector<128x128xbf16>
    %cst_55 = arith.constant dense<0.000000e+00> : vector<16x128xf32>
    %148 = tpu.matmul %144, %147, %cst_55 {dimension_numbers = #tpu.dot_dimension_numbers<[1], [0], [0], [1], [0, 0, 1, 1], [], []>} : vector<16x128xbf16>, vector<128x128xbf16>, vector<16x128xf32> -> vector<16x128xf32>
    %149 = arith.addf %124, %148 : vector<16x128xf32>
    %150 = arith.index_cast %arg1 : i32 to index
    %c0_56 = arith.constant 0 : index
    %c0_57 = arith.constant 0 : index
    %151 = vector.load %arg12[%150, %c0_56, %c0_57] : memref<2x1x128xf32, #tpu.memory_space<vmem>>, vector<1x1x128xf32>
    %152 = vector.shape_cast %151 : vector<1x1x128xf32> to vector<1x128xf32>
    %153 = vector.broadcast %152 : vector<1x128xf32> to vector<16x128xf32>
    %154 = arith.addf %149, %153 : vector<16x128xf32>
    %c0_58 = arith.constant 0 : index
    %c0_59 = arith.constant 0 : index
    %c0_60 = arith.constant 0 : index
    %155 = vector.load %arg22[%c0_58, %c0_59, %c0_60] : memref<2x8x128xf32, #tpu.memory_space<vmem>>, vector<2x8x128xf32>
    %156 = vector.shape_cast %155 : vector<2x8x128xf32> to vector<16x128xf32>
    %157 = arith.addf %156, %154 : vector<16x128xf32>
    %158 = arith.index_cast %arg1 : i32 to index
    %c0_61 = arith.constant 0 : index
    %c0_62 = arith.constant 0 : index
    %159 = vector.load %arg17[%158, %c0_61, %c0_62] : memref<2x1x128xf32, #tpu.memory_space<vmem>>, vector<1x1x128xf32>
    %160 = vector.shape_cast %159 : vector<1x1x128xf32> to vector<1x128xf32>
    %161 = arith.index_cast %arg1 : i32 to index
    %c0_63 = arith.constant 0 : index
    %c0_64 = arith.constant 0 : index
    %162 = vector.load %arg18[%161, %c0_63, %c0_64] : memref<2x1x128xf32, #tpu.memory_space<vmem>>, vector<1x1x128xf32>
    %163 = vector.shape_cast %162 : vector<1x1x128xf32> to vector<1x128xf32>
    %cst_65 = arith.constant dense<0.000000e+00> : vector<16xf32>
    %164 = vector.multi_reduction <add>, %157, %cst_65 [1] : vector<16x128xf32> to vector<16xf32>
    %165 = vector.shape_cast %164 : vector<16xf32> to vector<16x1xf32>
    %cst_66 = arith.constant 3.125000e-02 : f32
    %166 = vector.broadcast %cst_66 : f32 to vector<16x1xf32>
    %167 = arith.mulf %165, %166 : vector<16x1xf32>
    %168 = vector.broadcast %167 : vector<16x1xf32> to vector<16x128xf32>
    %169 = arith.subf %157, %168 : vector<16x128xf32>
    %170 = arith.mulf %169, %169 : vector<16x128xf32>
    %171 = vector.broadcast %7 : vector<1x128xf32> to vector<16x128xf32>
    %172 = arith.mulf %170, %171 : vector<16x128xf32>
    %cst_67 = arith.constant dense<0.000000e+00> : vector<16xf32>
    %173 = vector.multi_reduction <add>, %172, %cst_67 [1] : vector<16x128xf32> to vector<16xf32>
    %174 = vector.shape_cast %173 : vector<16xf32> to vector<16x1xf32>
    %cst_68 = arith.constant 3.125000e-02 : f32
    %175 = vector.broadcast %cst_68 : f32 to vector<16x1xf32>
    %176 = arith.mulf %174, %175 : vector<16x1xf32>
    %cst_69 = arith.constant 9.99999974E-6 : f32
    %177 = vector.broadcast %cst_69 : f32 to vector<16x1xf32>
    %178 = arith.addf %176, %177 : vector<16x1xf32>
    %179 = math.rsqrt %178 : vector<16x1xf32>
    %180 = vector.broadcast %179 : vector<16x1xf32> to vector<16x128xf32>
    %181 = arith.mulf %169, %180 : vector<16x128xf32>
    %182 = vector.broadcast %160 : vector<1x128xf32> to vector<16x128xf32>
    %183 = arith.mulf %181, %182 : vector<16x128xf32>
    %184 = vector.broadcast %163 : vector<1x128xf32> to vector<16x128xf32>
    %185 = arith.addf %183, %184 : vector<16x128xf32>
    %186 = arith.truncf %185 : vector<16x128xf32> to vector<16x128xbf16>
    %cst_70 = arith.constant 0.000000e+00 : f32
    %187 = vector.broadcast %cst_70 : f32 to vector<16x128xf32>
    %c0_i32_71 = arith.constant 0 : i32
    %c0_i32_72 = arith.constant 0 : i32
    %188 = tpu.memref_slice %arg13[%arg1, %c0_i32_71, %c0_i32_72] : memref<2x128x2048xbf16, #tpu.memory_space<vmem>> -> memref<1x128x2048xbf16, #tpu.memory_space<vmem>>
    %189 = tpu.memref_squeeze %188 : memref<1x128x2048xbf16, #tpu.memory_space<vmem>> -> memref<128x2048xbf16, #tpu.memory_space<vmem>>
    %c0_73 = arith.constant 0 : index
    %c0_74 = arith.constant 0 : index
    %190 = vector.load %189[%c0_73, %c0_74] : memref<128x2048xbf16, #tpu.memory_space<vmem>>, vector<128x512xbf16>
    %cst_75 = arith.constant dense<0.000000e+00> : vector<16x512xf32>
    %191 = tpu.matmul %186, %190, %cst_75 {dimension_numbers = #tpu.dot_dimension_numbers<[1], [0], [0], [1], [0, 0, 1, 1], [], []>} : vector<16x128xbf16>, vector<128x512xbf16>, vector<16x512xf32> -> vector<16x512xf32>
    %c0_i32_76 = arith.constant 0 : i32
    %c0_i32_77 = arith.constant 0 : i32
    %192 = tpu.memref_slice %arg14[%arg1, %c0_i32_76, %c0_i32_77] : memref<2x1x2048xf32, #tpu.memory_space<vmem>> -> memref<1x1x2048xf32, #tpu.memory_space<vmem>>
    %193 = tpu.memref_squeeze %192 : memref<1x1x2048xf32, #tpu.memory_space<vmem>> -> memref<1x2048xf32, #tpu.memory_space<vmem>>
    %c0_78 = arith.constant 0 : index
    %c0_79 = arith.constant 0 : index
    %194 = vector.load %193[%c0_78, %c0_79] : memref<1x2048xf32, #tpu.memory_space<vmem>>, vector<1x512xf32>
    %195 = vector.broadcast %194 : vector<1x512xf32> to vector<16x512xf32>
    %196 = arith.addf %191, %195 : vector<16x512xf32>
    %cst_80 = arith.constant 0.000000e+00 : f32
    %197 = vector.broadcast %cst_80 : f32 to vector<16x512xf32>
    %198 = arith.maximumf %196, %197 : vector<16x512xf32>
    %199 = arith.truncf %198 : vector<16x512xf32> to vector<16x512xbf16>
    %c0_i32_81 = arith.constant 0 : i32
    %c0_i32_82 = arith.constant 0 : i32
    %200 = tpu.memref_slice %arg15[%arg1, %c0_i32_81, %c0_i32_82] : memref<2x2048x128xbf16, #tpu.memory_space<vmem>> -> memref<1x2048x128xbf16, #tpu.memory_space<vmem>>
    %201 = tpu.memref_squeeze %200 : memref<1x2048x128xbf16, #tpu.memory_space<vmem>> -> memref<2048x128xbf16, #tpu.memory_space<vmem>>
    %c0_83 = arith.constant 0 : index
    %c0_84 = arith.constant 0 : index
    %202 = vector.load %201[%c0_83, %c0_84] : memref<2048x128xbf16, #tpu.memory_space<vmem>>, vector<512x128xbf16>
    %cst_85 = arith.constant dense<0.000000e+00> : vector<16x128xf32>
    %203 = tpu.matmul %199, %202, %cst_85 {dimension_numbers = #tpu.dot_dimension_numbers<[1], [0], [0], [1], [0, 0, 1, 1], [], []>} : vector<16x512xbf16>, vector<512x128xbf16>, vector<16x128xf32> -> vector<16x128xf32>
    %204 = arith.addf %187, %203 : vector<16x128xf32>
    %c0_i32_86 = arith.constant 0 : i32
    %c0_i32_87 = arith.constant 0 : i32
    %205 = tpu.memref_slice %arg13[%arg1, %c0_i32_86, %c0_i32_87] : memref<2x128x2048xbf16, #tpu.memory_space<vmem>> -> memref<1x128x2048xbf16, #tpu.memory_space<vmem>>
    %206 = tpu.memref_squeeze %205 : memref<1x128x2048xbf16, #tpu.memory_space<vmem>> -> memref<128x2048xbf16, #tpu.memory_space<vmem>>
    %c0_88 = arith.constant 0 : index
    %c512 = arith.constant 512 : index
    %207 = vector.load %206[%c0_88, %c512] : memref<128x2048xbf16, #tpu.memory_space<vmem>>, vector<128x512xbf16>
    %cst_89 = arith.constant dense<0.000000e+00> : vector<16x512xf32>
    %208 = tpu.matmul %186, %207, %cst_89 {dimension_numbers = #tpu.dot_dimension_numbers<[1], [0], [0], [1], [0, 0, 1, 1], [], []>} : vector<16x128xbf16>, vector<128x512xbf16>, vector<16x512xf32> -> vector<16x512xf32>
    %c0_i32_90 = arith.constant 0 : i32
    %c0_i32_91 = arith.constant 0 : i32
    %209 = tpu.memref_slice %arg14[%arg1, %c0_i32_90, %c0_i32_91] : memref<2x1x2048xf32, #tpu.memory_space<vmem>> -> memref<1x1x2048xf32, #tpu.memory_space<vmem>>
    %210 = tpu.memref_squeeze %209 : memref<1x1x2048xf32, #tpu.memory_space<vmem>> -> memref<1x2048xf32, #tpu.memory_space<vmem>>
    %c0_92 = arith.constant 0 : index
    %c512_93 = arith.constant 512 : index
    %211 = vector.load %210[%c0_92, %c512_93] : memref<1x2048xf32, #tpu.memory_space<vmem>>, vector<1x512xf32>
    %212 = vector.broadcast %211 : vector<1x512xf32> to vector<16x512xf32>
    %213 = arith.addf %208, %212 : vector<16x512xf32>
    %cst_94 = arith.constant 0.000000e+00 : f32
    %214 = vector.broadcast %cst_94 : f32 to vector<16x512xf32>
    %215 = arith.maximumf %213, %214 : vector<16x512xf32>
    %216 = arith.truncf %215 : vector<16x512xf32> to vector<16x512xbf16>
    %c0_i32_95 = arith.constant 0 : i32
    %c0_i32_96 = arith.constant 0 : i32
    %217 = tpu.memref_slice %arg15[%arg1, %c0_i32_95, %c0_i32_96] : memref<2x2048x128xbf16, #tpu.memory_space<vmem>> -> memref<1x2048x128xbf16, #tpu.memory_space<vmem>>
    %218 = tpu.memref_squeeze %217 : memref<1x2048x128xbf16, #tpu.memory_space<vmem>> -> memref<2048x128xbf16, #tpu.memory_space<vmem>>
    %c512_97 = arith.constant 512 : index
    %c0_98 = arith.constant 0 : index
    %219 = vector.load %218[%c512_97, %c0_98] : memref<2048x128xbf16, #tpu.memory_space<vmem>>, vector<512x128xbf16>
    %cst_99 = arith.constant dense<0.000000e+00> : vector<16x128xf32>
    %220 = tpu.matmul %216, %219, %cst_99 {dimension_numbers = #tpu.dot_dimension_numbers<[1], [0], [0], [1], [0, 0, 1, 1], [], []>} : vector<16x512xbf16>, vector<512x128xbf16>, vector<16x128xf32> -> vector<16x128xf32>
    %221 = arith.addf %204, %220 : vector<16x128xf32>
    %c0_i32_100 = arith.constant 0 : i32
    %c0_i32_101 = arith.constant 0 : i32
    %222 = tpu.memref_slice %arg13[%arg1, %c0_i32_100, %c0_i32_101] : memref<2x128x2048xbf16, #tpu.memory_space<vmem>> -> memref<1x128x2048xbf16, #tpu.memory_space<vmem>>
    %223 = tpu.memref_squeeze %222 : memref<1x128x2048xbf16, #tpu.memory_space<vmem>> -> memref<128x2048xbf16, #tpu.memory_space<vmem>>
    %c0_102 = arith.constant 0 : index
    %c1024 = arith.constant 1024 : index
    %224 = vector.load %223[%c0_102, %c1024] : memref<128x2048xbf16, #tpu.memory_space<vmem>>, vector<128x512xbf16>
    %cst_103 = arith.constant dense<0.000000e+00> : vector<16x512xf32>
    %225 = tpu.matmul %186, %224, %cst_103 {dimension_numbers = #tpu.dot_dimension_numbers<[1], [0], [0], [1], [0, 0, 1, 1], [], []>} : vector<16x128xbf16>, vector<128x512xbf16>, vector<16x512xf32> -> vector<16x512xf32>
    %c0_i32_104 = arith.constant 0 : i32
    %c0_i32_105 = arith.constant 0 : i32
    %226 = tpu.memref_slice %arg14[%arg1, %c0_i32_104, %c0_i32_105] : memref<2x1x2048xf32, #tpu.memory_space<vmem>> -> memref<1x1x2048xf32, #tpu.memory_space<vmem>>
    %227 = tpu.memref_squeeze %226 : memref<1x1x2048xf32, #tpu.memory_space<vmem>> -> memref<1x2048xf32, #tpu.memory_space<vmem>>
    %c0_106 = arith.constant 0 : index
    %c1024_107 = arith.constant 1024 : index
    %228 = vector.load %227[%c0_106, %c1024_107] : memref<1x2048xf32, #tpu.memory_space<vmem>>, vector<1x512xf32>
    %229 = vector.broadcast %228 : vector<1x512xf32> to vector<16x512xf32>
    %230 = arith.addf %225, %229 : vector<16x512xf32>
    %cst_108 = arith.constant 0.000000e+00 : f32
    %231 = vector.broadcast %cst_108 : f32 to vector<16x512xf32>
    %232 = arith.maximumf %230, %231 : vector<16x512xf32>
    %233 = arith.truncf %232 : vector<16x512xf32> to vector<16x512xbf16>
    %c0_i32_109 = arith.constant 0 : i32
    %c0_i32_110 = arith.constant 0 : i32
    %234 = tpu.memref_slice %arg15[%arg1, %c0_i32_109, %c0_i32_110] : memref<2x2048x128xbf16, #tpu.memory_space<vmem>> -> memref<1x2048x128xbf16, #tpu.memory_space<vmem>>
    %235 = tpu.memref_squeeze %234 : memref<1x2048x128xbf16, #tpu.memory_space<vmem>> -> memref<2048x128xbf16, #tpu.memory_space<vmem>>
    %c1024_111 = arith.constant 1024 : index
    %c0_112 = arith.constant 0 : index
    %236 = vector.load %235[%c1024_111, %c0_112] : memref<2048x128xbf16, #tpu.memory_space<vmem>>, vector<512x128xbf16>
    %cst_113 = arith.constant dense<0.000000e+00> : vector<16x128xf32>
    %237 = tpu.matmul %233, %236, %cst_113 {dimension_numbers = #tpu.dot_dimension_numbers<[1], [0], [0], [1], [0, 0, 1, 1], [], []>} : vector<16x512xbf16>, vector<512x128xbf16>, vector<16x128xf32> -> vector<16x128xf32>
    %238 = arith.addf %221, %237 : vector<16x128xf32>
    %c0_i32_114 = arith.constant 0 : i32
    %c0_i32_115 = arith.constant 0 : i32
    %239 = tpu.memref_slice %arg13[%arg1, %c0_i32_114, %c0_i32_115] : memref<2x128x2048xbf16, #tpu.memory_space<vmem>> -> memref<1x128x2048xbf16, #tpu.memory_space<vmem>>
    %240 = tpu.memref_squeeze %239 : memref<1x128x2048xbf16, #tpu.memory_space<vmem>> -> memref<128x2048xbf16, #tpu.memory_space<vmem>>
    %c0_116 = arith.constant 0 : index
    %c1536 = arith.constant 1536 : index
    %241 = vector.load %240[%c0_116, %c1536] : memref<128x2048xbf16, #tpu.memory_space<vmem>>, vector<128x512xbf16>
    %cst_117 = arith.constant dense<0.000000e+00> : vector<16x512xf32>
    %242 = tpu.matmul %186, %241, %cst_117 {dimension_numbers = #tpu.dot_dimension_numbers<[1], [0], [0], [1], [0, 0, 1, 1], [], []>} : vector<16x128xbf16>, vector<128x512xbf16>, vector<16x512xf32> -> vector<16x512xf32>
    %c0_i32_118 = arith.constant 0 : i32
    %c0_i32_119 = arith.constant 0 : i32
    %243 = tpu.memref_slice %arg14[%arg1, %c0_i32_118, %c0_i32_119] : memref<2x1x2048xf32, #tpu.memory_space<vmem>> -> memref<1x1x2048xf32, #tpu.memory_space<vmem>>
    %244 = tpu.memref_squeeze %243 : memref<1x1x2048xf32, #tpu.memory_space<vmem>> -> memref<1x2048xf32, #tpu.memory_space<vmem>>
    %c0_120 = arith.constant 0 : index
    %c1536_121 = arith.constant 1536 : index
    %245 = vector.load %244[%c0_120, %c1536_121] : memref<1x2048xf32, #tpu.memory_space<vmem>>, vector<1x512xf32>
    %246 = vector.broadcast %245 : vector<1x512xf32> to vector<16x512xf32>
    %247 = arith.addf %242, %246 : vector<16x512xf32>
    %cst_122 = arith.constant 0.000000e+00 : f32
    %248 = vector.broadcast %cst_122 : f32 to vector<16x512xf32>
    %249 = arith.maximumf %247, %248 : vector<16x512xf32>
    %250 = arith.truncf %249 : vector<16x512xf32> to vector<16x512xbf16>
    %c0_i32_123 = arith.constant 0 : i32
    %c0_i32_124 = arith.constant 0 : i32
    %251 = tpu.memref_slice %arg15[%arg1, %c0_i32_123, %c0_i32_124] : memref<2x2048x128xbf16, #tpu.memory_space<vmem>> -> memref<1x2048x128xbf16, #tpu.memory_space<vmem>>
    %252 = tpu.memref_squeeze %251 : memref<1x2048x128xbf16, #tpu.memory_space<vmem>> -> memref<2048x128xbf16, #tpu.memory_space<vmem>>
    %c1536_125 = arith.constant 1536 : index
    %c0_126 = arith.constant 0 : index
    %253 = vector.load %252[%c1536_125, %c0_126] : memref<2048x128xbf16, #tpu.memory_space<vmem>>, vector<512x128xbf16>
    %cst_127 = arith.constant dense<0.000000e+00> : vector<16x128xf32>
    %254 = tpu.matmul %250, %253, %cst_127 {dimension_numbers = #tpu.dot_dimension_numbers<[1], [0], [0], [1], [0, 0, 1, 1], [], []>} : vector<16x512xbf16>, vector<512x128xbf16>, vector<16x128xf32> -> vector<16x128xf32>
    %255 = arith.addf %238, %254 : vector<16x128xf32>
    %256 = arith.index_cast %arg1 : i32 to index
    %c0_128 = arith.constant 0 : index
    %c0_129 = arith.constant 0 : index
    %257 = vector.load %arg16[%256, %c0_128, %c0_129] : memref<2x1x128xf32, #tpu.memory_space<vmem>>, vector<1x1x128xf32>
    %258 = vector.shape_cast %257 : vector<1x1x128xf32> to vector<1x128xf32>
    %259 = vector.broadcast %258 : vector<1x128xf32> to vector<16x128xf32>
    %260 = arith.addf %255, %259 : vector<16x128xf32>
    %261 = arith.addf %185, %260 : vector<16x128xf32>
    %262 = arith.index_cast %arg1 : i32 to index
    %c0_130 = arith.constant 0 : index
    %c0_131 = arith.constant 0 : index
    %263 = vector.load %arg19[%262, %c0_130, %c0_131] : memref<2x1x128xf32, #tpu.memory_space<vmem>>, vector<1x1x128xf32>
    %264 = vector.shape_cast %263 : vector<1x1x128xf32> to vector<1x128xf32>
    %265 = arith.index_cast %arg1 : i32 to index
    %c0_132 = arith.constant 0 : index
    %c0_133 = arith.constant 0 : index
    %266 = vector.load %arg20[%265, %c0_132, %c0_133] : memref<2x1x128xf32, #tpu.memory_space<vmem>>, vector<1x1x128xf32>
    %267 = vector.shape_cast %266 : vector<1x1x128xf32> to vector<1x128xf32>
    %cst_134 = arith.constant dense<0.000000e+00> : vector<16xf32>
    %268 = vector.multi_reduction <add>, %261, %cst_134 [1] : vector<16x128xf32> to vector<16xf32>
    %269 = vector.shape_cast %268 : vector<16xf32> to vector<16x1xf32>
    %cst_135 = arith.constant 3.125000e-02 : f32
    %270 = vector.broadcast %cst_135 : f32 to vector<16x1xf32>
    %271 = arith.mulf %269, %270 : vector<16x1xf32>
    %272 = vector.broadcast %271 : vector<16x1xf32> to vector<16x128xf32>
    %273 = arith.subf %261, %272 : vector<16x128xf32>
    %274 = arith.mulf %273, %273 : vector<16x128xf32>
    %275 = vector.broadcast %7 : vector<1x128xf32> to vector<16x128xf32>
    %276 = arith.mulf %274, %275 : vector<16x128xf32>
    %cst_136 = arith.constant dense<0.000000e+00> : vector<16xf32>
    %277 = vector.multi_reduction <add>, %276, %cst_136 [1] : vector<16x128xf32> to vector<16xf32>
    %278 = vector.shape_cast %277 : vector<16xf32> to vector<16x1xf32>
    %cst_137 = arith.constant 3.125000e-02 : f32
    %279 = vector.broadcast %cst_137 : f32 to vector<16x1xf32>
    %280 = arith.mulf %278, %279 : vector<16x1xf32>
    %cst_138 = arith.constant 9.99999974E-6 : f32
    %281 = vector.broadcast %cst_138 : f32 to vector<16x1xf32>
    %282 = arith.addf %280, %281 : vector<16x1xf32>
    %283 = math.rsqrt %282 : vector<16x1xf32>
    %284 = vector.broadcast %283 : vector<16x1xf32> to vector<16x128xf32>
    %285 = arith.mulf %273, %284 : vector<16x128xf32>
    %286 = vector.broadcast %264 : vector<1x128xf32> to vector<16x128xf32>
    %287 = arith.mulf %285, %286 : vector<16x128xf32>
    %288 = vector.broadcast %267 : vector<1x128xf32> to vector<16x128xf32>
    %289 = arith.addf %287, %288 : vector<16x128xf32>
    %290 = vector.shape_cast %289 : vector<16x128xf32> to vector<2x8x128xf32>
    %c0_139 = arith.constant 0 : index
    %c0_140 = arith.constant 0 : index
    %c0_141 = arith.constant 0 : index
    %291 = vector.load %arg22[%c0_139, %c0_140, %c0_141] : memref<2x8x128xf32, #tpu.memory_space<vmem>>, vector<2x8x128xf32>
    tpu.vector_store %arg22[%c0_139, %c0_140, %c0_141], %290 {strides = array<i32>} : memref<2x8x128xf32, #tpu.memory_space<vmem>>, vector<2x8x128xf32>,
    %c1_i32 = arith.constant 1 : i32
    %292 = arith.cmpi eq, %arg1, %c1_i32 : i32
    %293 = arith.extui %292 : i1 to i32
    %c0_i32_142 = arith.constant 0 : i32
    %294 = arith.cmpi ne, %293, %c0_i32_142 : i32
    scf.if %294 {
      %c0_143 = arith.constant 0 : index
      %c0_144 = arith.constant 0 : index
      %c0_145 = arith.constant 0 : index
      %295 = vector.load %arg4[%c0_143, %c0_144, %c0_145] : memref<2x8x1xf32, #tpu.memory_space<vmem>>, vector<2x8x1xf32>
      %cst_146 = arith.constant dense<0.000000e+00> : vector<2x1xf32>
      %296 = vector.multi_reduction <add>, %295, %cst_146 [1] : vector<2x8x1xf32> to vector<2x1xf32>
      %297 = vector.shape_cast %296 : vector<2x1xf32> to vector<2x1x1xf32>
      %cst_147 = arith.constant 9.99999996E-13 : f32
      %298 = vector.broadcast %cst_147 : f32 to vector<2x1x1xf32>
      %299 = arith.addf %297, %298 : vector<2x1x1xf32>
      %cst_148 = arith.constant 1.000000e+00 : f32
      %300 = vector.broadcast %cst_148 : f32 to vector<2x1x1xf32>
      %301 = arith.divf %300, %299 : vector<2x1x1xf32>
      %302 = vector.broadcast %301 : vector<2x1x1xf32> to vector<2x8x1xf32>
      %303 = arith.mulf %295, %302 : vector<2x8x1xf32>
      %304 = vector.shape_cast %289 : vector<16x128xf32> to vector<2x8x128xf32>
      %305 = vector.broadcast %303 : vector<2x8x1xf32> to vector<2x8x128xf32>
      %306 = arith.mulf %304, %305 : vector<2x8x128xf32>
      %cst_149 = arith.constant dense<0.000000e+00> : vector<2x128xf32>
      %307 = vector.multi_reduction <add>, %306, %cst_149 [1] : vector<2x8x128xf32> to vector<2x128xf32>
      %308 = vector.shape_cast %307 : vector<2x128xf32> to vector<2x1x128xf32>
      %c0_150 = arith.constant 0 : index
      %c0_151 = arith.constant 0 : index
      %c0_152 = arith.constant 0 : index
      %309 = vector.load %arg21[%c0_150, %c0_151, %c0_152] : memref<2x1x128xf32, #tpu.memory_space<vmem>>, vector<2x1x128xf32>
      tpu.vector_store %arg21[%c0_150, %c0_151, %c0_152], %308 {strides = array<i32>} : memref<2x1x128xf32, #tpu.memory_space<vmem>>, vector<2x1x128xf32>,
    } else {
    }
    return
  }
  func.func @transform_0(%arg0: i32, %arg1: i32) -> (i32, i32, i32) {
    %c0_i32 = arith.constant 0 : i32
    %c0_i32_0 = arith.constant 0 : i32
    %c0_i32_1 = arith.constant 0 : i32
    return %arg0, %c0_i32, %c0_i32_0 : i32, i32, i32
  }
  func.func @transform_1(%arg0: i32, %arg1: i32) -> (i32, i32, i32) {
    %c0_i32 = arith.constant 0 : i32
    %c0_i32_0 = arith.constant 0 : i32
    %c0_i32_1 = arith.constant 0 : i32
    return %arg0, %c0_i32, %c0_i32_0 : i32, i32, i32
  }
  func.func @transform_2(%arg0: i32, %arg1: i32) -> (i32, i32, i32) {
    %c0_i32 = arith.constant 0 : i32
    %c0_i32_0 = arith.constant 0 : i32
    %c0_i32_1 = arith.constant 0 : i32
    return %arg0, %c0_i32, %c0_i32_0 : i32, i32, i32
  }
  func.func @transform_3(%arg0: i32, %arg1: i32) -> (i32, i32, i32) {
    %c0_i32 = arith.constant 0 : i32
    %c0_i32_0 = arith.constant 0 : i32
    %c0_i32_1 = arith.constant 0 : i32
    %c0_i32_2 = arith.constant 0 : i32
    return %c0_i32, %c0_i32_0, %c0_i32_1 : i32, i32, i32
  }
  func.func @transform_4(%arg0: i32, %arg1: i32) -> (i32, i32, i32) {
    %c0_i32 = arith.constant 0 : i32
    %c0_i32_0 = arith.constant 0 : i32
    %c0_i32_1 = arith.constant 0 : i32
    %c0_i32_2 = arith.constant 0 : i32
    return %c0_i32, %c0_i32_0, %c0_i32_1 : i32, i32, i32
  }
  func.func @transform_5(%arg0: i32, %arg1: i32) -> (i32, i32, i32) {
    %c0_i32 = arith.constant 0 : i32
    %c0_i32_0 = arith.constant 0 : i32
    %c0_i32_1 = arith.constant 0 : i32
    %c0_i32_2 = arith.constant 0 : i32
    return %c0_i32, %c0_i32_0, %c0_i32_1 : i32, i32, i32
  }
  func.func @transform_6(%arg0: i32, %arg1: i32) -> (i32, i32, i32) {
    %c0_i32 = arith.constant 0 : i32
    %c0_i32_0 = arith.constant 0 : i32
    %c0_i32_1 = arith.constant 0 : i32
    %c0_i32_2 = arith.constant 0 : i32
    return %c0_i32, %c0_i32_0, %c0_i32_1 : i32, i32, i32
  }
  func.func @transform_7(%arg0: i32, %arg1: i32) -> (i32, i32, i32) {
    %c0_i32 = arith.constant 0 : i32
    %c0_i32_0 = arith.constant 0 : i32
    %c0_i32_1 = arith.constant 0 : i32
    %c0_i32_2 = arith.constant 0 : i32
    return %c0_i32, %c0_i32_0, %c0_i32_1 : i32, i32, i32
  }
  func.func @transform_8(%arg0: i32, %arg1: i32) -> (i32, i32, i32) {
    %c0_i32 = arith.constant 0 : i32
    %c0_i32_0 = arith.constant 0 : i32
    %c0_i32_1 = arith.constant 0 : i32
    %c0_i32_2 = arith.constant 0 : i32
    return %c0_i32, %c0_i32_0, %c0_i32_1 : i32, i32, i32
  }
  func.func @transform_9(%arg0: i32, %arg1: i32) -> (i32, i32, i32) {
    %c0_i32 = arith.constant 0 : i32
    %c0_i32_0 = arith.constant 0 : i32
    %c0_i32_1 = arith.constant 0 : i32
    %c0_i32_2 = arith.constant 0 : i32
    return %c0_i32, %c0_i32_0, %c0_i32_1 : i32, i32, i32
  }
  func.func @transform_10(%arg0: i32, %arg1: i32) -> (i32, i32, i32) {
    %c0_i32 = arith.constant 0 : i32
    %c0_i32_0 = arith.constant 0 : i32
    %c0_i32_1 = arith.constant 0 : i32
    %c0_i32_2 = arith.constant 0 : i32
    return %c0_i32, %c0_i32_0, %c0_i32_1 : i32, i32, i32
  }
  func.func @transform_11(%arg0: i32, %arg1: i32) -> (i32, i32, i32) {
    %c0_i32 = arith.constant 0 : i32
    %c0_i32_0 = arith.constant 0 : i32
    %c0_i32_1 = arith.constant 0 : i32
    %c0_i32_2 = arith.constant 0 : i32
    return %c0_i32, %c0_i32_0, %c0_i32_1 : i32, i32, i32
  }
  func.func @transform_12(%arg0: i32, %arg1: i32) -> (i32, i32, i32) {
    %c0_i32 = arith.constant 0 : i32
    %c0_i32_0 = arith.constant 0 : i32
    %c0_i32_1 = arith.constant 0 : i32
    %c0_i32_2 = arith.constant 0 : i32
    return %c0_i32, %c0_i32_0, %c0_i32_1 : i32, i32, i32
  }
  func.func @transform_13(%arg0: i32, %arg1: i32) -> (i32, i32, i32) {
    %c0_i32 = arith.constant 0 : i32
    %c0_i32_0 = arith.constant 0 : i32
    %c0_i32_1 = arith.constant 0 : i32
    %c0_i32_2 = arith.constant 0 : i32
    return %c0_i32, %c0_i32_0, %c0_i32_1 : i32, i32, i32
  }
  func.func @transform_14(%arg0: i32, %arg1: i32) -> (i32, i32, i32) {
    %c0_i32 = arith.constant 0 : i32
    %c0_i32_0 = arith.constant 0 : i32
    %c0_i32_1 = arith.constant 0 : i32
    %c0_i32_2 = arith.constant 0 : i32
    return %c0_i32, %c0_i32_0, %c0_i32_1 : i32, i32, i32
  }
  func.func @transform_15(%arg0: i32, %arg1: i32) -> (i32, i32, i32) {
    %c0_i32 = arith.constant 0 : i32
    %c0_i32_0 = arith.constant 0 : i32
    %c0_i32_1 = arith.constant 0 : i32
    %c0_i32_2 = arith.constant 0 : i32
    return %c0_i32, %c0_i32_0, %c0_i32_1 : i32, i32, i32
  }
  func.func @transform_16(%arg0: i32, %arg1: i32) -> (i32, i32, i32) {
    %c0_i32 = arith.constant 0 : i32
    %c0_i32_0 = arith.constant 0 : i32
    %c0_i32_1 = arith.constant 0 : i32
    %c0_i32_2 = arith.constant 0 : i32
    return %c0_i32, %c0_i32_0, %c0_i32_1 : i32, i32, i32
  }
  func.func @transform_17(%arg0: i32, %arg1: i32) -> (i32, i32, i32) {
    %c0_i32 = arith.constant 0 : i32
    %c0_i32_0 = arith.constant 0 : i32
    %c0_i32_1 = arith.constant 0 : i32
    %c0_i32_2 = arith.constant 0 : i32
    return %c0_i32, %c0_i32_0, %c0_i32_1 : i32, i32, i32
  }
  func.func @transform_18(%arg0: i32, %arg1: i32) -> (i32, i32, i32) {
    %c0_i32 = arith.constant 0 : i32
    %c0_i32_0 = arith.constant 0 : i32
    %c0_i32_1 = arith.constant 0 : i32
    %c0_i32_2 = arith.constant 0 : i32
    return %c0_i32, %c0_i32_0, %c0_i32_1 : i32, i32, i32
  }
  func.func @transform_19(%arg0: i32, %arg1: i32) -> (i32, i32, i32) {
    %c0_i32 = arith.constant 0 : i32
    %c0_i32_0 = arith.constant 0 : i32
    %c0_i32_1 = arith.constant 0 : i32
    return %arg0, %c0_i32, %c0_i32_0 : i32, i32, i32
  }
}

</mosaic_0001>

<bundles_post_ra>
// kernel: recipe_transformer_encoder.1
= control target key start
LH: loop header
LB: loop body
LE: loop exit
PB: predicated region body
PF: predicated region fallthrough
CT: control target
= control target key end

     0   :  { %s8574_s0 = inlined_call_operand.vmem [shape: f32[2,8,128], index: 0, kind: input, shape index: {}]   ;;  %s8575_s1 = inlined_call_operand.vmem [shape: f32[2,1,8], index: 1, kind: input, shape index: {}]   ;;  %s8576_s2 = inlined_call_operand.vmem [shape: f32[2,8,1], index: 2, kind: input, shape index: {}]   ;;  %s8577_s3 = inlined_call_operand.hbm [shape: bf16[2,128,512], index: 3, kind: input, shape index: {}]   ;;  %s8578_s4 = inlined_call_operand.hbm [shape: bf16[2,128,512], index: 4, kind: input, shape index: {}]   ;;  %s8579_s5 = inlined_call_operand.hbm [shape: bf16[2,128,512], index: 5, kind: input, shape index: {}]   ;;  %s8580_s6 = inlined_call_operand.vmem [shape: f32[2,1,512], index: 6, kind: input, shape index: {}]   ;;  %s8581_s7 = inlined_call_operand.vmem [shape: f32[2,1,512], index: 7, kind: input, shape index: {}]   ;;  %s8582_s8 = inlined_call_operand.vmem [shape: f32[2,1,512], index: 8, kind: input, shape index: {}]   ;;  %s8583_s9 = inlined_call_operand.hbm [shape: bf16[2,512,128], index: 9, kind: input, shape index: {}]   ;;  %s8584_s10 = inlined_call_operand.vmem [shape: f32[2,1,128], index: 10, kind: input, shape index: {}]   ;;  %s8585_s11 = inlined_call_operand.hbm [shape: bf16[2,128,2048], index: 11, kind: input, shape index: {}]   ;;  %s8586_s12 = inlined_call_operand.vmem [shape: f32[2,1,2048], index: 12, kind: input, shape index: {}]   ;;  %s8587_s13 = inlined_call_operand.hbm [shape: bf16[2,2048,128], index: 13, kind: input, shape index: {}]   ;;  %s8588_s14 = inlined_call_operand.vmem [shape: f32[2,1,128], index: 14, kind: input, shape index: {}]   ;;  %s8589_s15 = inlined_call_operand.vmem [shape: f32[2,1,128], index: 15, kind: input, shape index: {}]   ;;  %s8590_s16 = inlined_call_operand.vmem [shape: f32[2,1,128], index: 16, kind: input, shape index: {}]   ;;  %s8591_s17 = inlined_call_operand.vmem [shape: f32[2,1,128], index: 17, kind: input, shape index: {}]   ;;  %s8592_s18 = inlined_call_operand.vmem [shape: f32[2,1,128], index: 18, kind: input, shape index: {}]   ;;  %s8593_s19 = inlined_call_operand.hbm [shape: f32[2,1,128], index: 19, kind: output, shape index: {}]  }
   0x1   :  { %8604 = sst [smem:[#allocation21_spill]] %s8574_s0 }
   0x2   :  { %8605 = sst [smem:[#allocation22_spill]] %s8575_s1 }
   0x3   :  { %8606 = sst [smem:[#allocation23_spill]] %s8576_s2 }
   0x4   :  { %8607 = sst [smem:[#allocation24_spill]] %s8577_s3 }
   0x5   :  { %8608 = sst [smem:[#allocation25_spill]] %s8578_s4 }
   0x6   :  { %8609 = sst [smem:[#allocation26_spill]] %s8583_s9 }
   0x7   :  { %8610 = sst [smem:[#allocation27_spill]] %s8586_s12 }
   0x8   :  { %8611 = sst [smem:[#allocation28_spill]] %s8588_s14 }
   0x9   :  { %8612 = sst [smem:[#allocation29_spill]] %s8591_s17 }
   0xa   :  { %8613 = sst [smem:[#allocation30_spill]] %s8592_s18 }
   0xb   :  { %8614 = sst [smem:[#allocation31_spill]] %s8593_s19 }
   0xc   :  { %24 = vsyncpa [#allocation4], 0 }
   0xd   :  { %25 = vsyncpa [#allocation7], 0 }
   0xe   :  { %26 = vsyncpa [#allocation10], 0 }
   0xf   :  { %27 = vsyncpa [#allocation13], 0 }
  0x10   :  { %28 = vsyncpa [#allocation5], 0  ;;  %s7507_s0 = smov 0   ;;  %s7509_s30 = smov 0  }
  0x11   :  { %s7511_s20 = smov 0  }
  0x12 LB: > { %8615 = sst [smem:[#allocation20_spill]] %s7389_s20  ;;  %s8597_s21 = sadd.s32 4294967295, %s7389_s20   ;;  %s7389_s20 = sphi %s7511_s20, %s34_s20   ;;  %s7385_s30 = sphi %s7509_s30, %s8636_s30   ;;  %s7381_s0 = sphi %s7507_s0, %s8635_s0  }
  0x13   : > { %p5019_p0 = scmp.ge.s32.totalorder %s7389_s20, 1  ;;  %p491_p1 = scmp.lt.s32.totalorder %s7389_s20, 3 }
  0x14   : > { %p7527_p2 = scmp.eq.s32.totalorder %s8597_s21, 0  ;;  %s8617_s4 = sld [smem:[#allocation25_spill]] }
  0x15   : > { %p7534_p3 = pnand %p5019_p0, %p491_p1  ;;  %s8619_s9 = sld [smem:[#allocation26_spill]] }
  0x16   : > { %s7391_s27 = smov [#allocation6]   ;;  %s7392_s22 = smov [#allocation9]  }
  0x17   : > { %p7015_p4 = pneg %p7534_p3  ;;  %s544_s28 = sshll.u32 %s7391_s27, 4  ;;  %s545_s28 = int_to_ptr.vmem [resolvable:$true] %s544_s28 }
  0x18   : > { %s581_s2 = sshll.u32 %s7392_s22, 4  ;;  %s7393_s21 = smov 256   ;;  %s582_s2 = int_to_ptr.vmem [resolvable:$true] %s581_s2 }
  0x19   : > { %p7545_p5 = pnand %p7527_p2, %p7015_p4  ;;  %s7394_s25 = smov 16  }
  0x1a   : > { %s542_s23 = sshll.u32 %s8617_s4, 4  ;;  %s8602_s3 = smov 64   ;;  %s543_s23 = int_to_ptr.hbm [resolvable:$true] %s542_s23 }
  0x1b   : > { %s579_s26 = sshll.u32 %s8619_s9, 4  ;;  %s8601_s4 = smov 4   ;;  %s580_s26 = int_to_ptr.hbm [resolvable:$true] %s579_s26 }
  0x1c   : > { %7021 = dma.hbm_to_vmem [thread:$0]  (!%p7545_p5), %s543_s23, 8192, %s545_s28, [#allocation7], %s7393_s21, %s7393_s21, %s7394_s25  }
  0x1d   : > { %7027 = dma.hbm_to_vmem [thread:$0]  (!%p7545_p5), %s580_s26, 8192, %s582_s2, [#allocation10], %s8602_s3, %s8602_s3, %s8601_s4  }
  0x1e   : > { %s8621_s19 = sld [smem:[#allocation24_spill]]  ;;  %s43_s18 = sadd.s32 1, %s7385_s30 }
  0x1f   : > { %p44_p6 = scmp.ge.s32.totalorder %s43_s18, 2  ;;  %s7397_s22 = smov [#allocation3]  }
  0x20   : > { %s530_s17 = sshll.u32 %s7397_s22, 4  ;;  %s556_s23 = sshll.u32 %s8579_s5, 4  ;;  %s531_s17 = int_to_ptr.vmem [resolvable:$true] %s530_s17  ;;  %s557_s23 = int_to_ptr.hbm [resolvable:$true] %s556_s23 }
  0x21   : > { %s8638_s18 = smov (%p44_p6, %s43_s18), 0  ;;  %s7398_s28 = smov [#allocation8]  }
  0x22   : > { %s558_s2 = sshll.u32 %s7398_s28, 4  ;;  %s7399_s12 = smov [#allocation11]   ;;  %s559_s2 = int_to_ptr.vmem [resolvable:$true] %s558_s2 }
  0x23   : > { %7024 = dma.hbm_to_vmem [thread:$0]  (!%p7545_p5), %s557_s23, 8192, %s559_s2, [#allocation7], %s7393_s21, %s7393_s21, %s7394_s25  }
  0x24   : > { %s528_s20 = sshll.u32 %s8621_s19, 4  ;;  %s596_s19 = sshll.u32 %s8585_s11, 4  ;;  %s529_s20 = int_to_ptr.hbm [resolvable:$true] %s528_s20  ;;  %s597_s19 = int_to_ptr.hbm [resolvable:$true] %s596_s19 }
  0x25   : > { %7018 = dma.hbm_to_vmem [thread:$0]  (!%p7545_p5), %s529_s20, 8192, %s531_s17, [#allocation4], %s7393_s21, %s7393_s21, %s7394_s25  }
  0x26   : > { %s598_s14 = sshll.u32 %s7399_s12, 4  ;;  %s613_s4 = sshll.u32 %s8587_s13, 4  ;;  %s599_s14 = int_to_ptr.vmem [resolvable:$true] %s598_s14  ;;  %s614_s4 = int_to_ptr.hbm [resolvable:$true] %s613_s4 }
  0x27   : > { %s7400_s3 = smov 1024   ;;  %s8622_s17 = smov 64  }
  0x28   : > { %7030 = dma.hbm_to_vmem [thread:$0]  (!%p7545_p5), %s597_s19, 32768, %s599_s14, [#allocation10], %s7400_s3, %s7400_s3, %s8622_s17  }
  0x29   : > { %s7401_s20 = smov [#allocation12]   ;;  %s8623_s9 = smov 4  }
  0x2a   : > { %s615_s26 = sshll.u32 %s7401_s20, 4  ;;  %646 = sbr.rel (%p7534_p3) target bundleno = 3135 (0xc3f), region = 96  ;;  %s616_s26 = int_to_ptr.vmem [resolvable:$true] %s615_s26 }
  0x2b   : > { %7033 = dma.hbm_to_vmem [thread:$0]  (!%p7545_p5), %s614_s4, 32768, %s616_s26, [#allocation13], %s8622_s17, %s8622_s17, %s8623_s9  }
  0x2f   : > { %7360 = dma.done.wait (%p7527_p2), [#allocation4], 8192  }
  0x30   : > { %7362 = vsyncadd (%p7527_p2), [#allocation4], 4294959104 }
  0x31   : > { %7364 = dma.done.wait (%p7527_p2), [#allocation7], 16384  }
  0x32   : > { %7366 = vsyncadd (%p7527_p2), [#allocation7], 4294950912 }
  0x33   : > { %7368 = dma.done.wait (%p7527_p2), [#allocation10], 40960  }
  0x34   : > { %7370 = vsyncadd (%p7527_p2), [#allocation10], 4294926336 }
  0x35   : > { %7372 = dma.done.wait (%p7527_p2), [#allocation13], 32768  }
  0x36   : > { %7374 = vsyncadd (%p7527_p2), [#allocation13], 4294934528  ;;  %p5036_p7 = scmp.ne.s32.totalorder %s7381_s0, 0 }
  0x37   : > { %s8624_s24 = sld [smem:[#allocation21_spill]] (!%p5036_p7) }
  0x38   : > { %754 = sbr.rel (%p5036_p7) target bundleno = 64 (0x40), region = 124 }
  0x3d   : > { %v755_v0 = vld [vmem:[%s8624_s24] sm:$0xff]  ;;  %v756_v1 = vld [vmem:[%s8624_s24 + $0x8] sm:$0xff] }
  0x3e   : > { %757 = vst [vmem:[#allocation2] sm:$0xff] %v755_v0 }
  0x3f   : > { %758 = vst [vmem:[#allocation2 + $0x8] sm:$0xff] %v756_v1 }
  0x40 PF: > { %s7609_s3 = sshll.u32 %s7381_s0, 8  ;;  %s7725_s28 = sshll.u32 %s7381_s0, 2  ;;  %vm1630_vm0 = vcmask 1043456   ;;  %vm1602_vm1 = vcmask 64512  }
  0x41   : > { %s7612_s1 = scalar_lea.vmem [#allocation3], %s7609_s3  ;;  %s7647_s23 = scalar_lea.vmem [#allocation6], %s7609_s3 }
  0x42   : > { %v5155_v2 = vld [vmem:[%s7612_s1 + $0xe0] sm:$0xf]  ;;  %v6628_v3 = vld [vmem:[%s7612_s1 + $0xec] sm:$0xf0]  ;;  %v6626_v4 = vld [vmem:[%s7612_s1 + $0xe4] sm:$0xf]  ;;  %s1070_s14 = scalar_lea.vmem %s8581_s7, %s7725_s28  ;;  %s809_s17 = scalar_lea.vmem %s8580_s6, %s7725_s28 }
  0x43   : > { %v5156_v5 = vor.u32 %v6628_v3, %v5155_v2  ;;  %v5157_v6 = vld [vmem:[%s7612_s1 + $0xf0] sm:$0xf0]  ;;  %v5139_v7 = vld [vmem:[%s7612_s1 + $0xc0] sm:$0xf]  ;;  %v6624_v8 = vld [vmem:[%s7612_s1 + $0xcc] sm:$0xf0]  ;;  %s1331_s9 = scalar_lea.vmem %s8582_s8, %s7725_s28  ;;  %s2284_s28 = scalar_lea.vmem %s8584_s10, %s7381_s0 }
  0x44   : > { %v5160_v9 = vor.u32 %v6626_v4, %v5157_v6  ;;  %v6622_v10 = vld [vmem:[%s7612_s1 + $0xc4] sm:$0xf]  ;;  %v5141_v11 = vld [vmem:[%s7612_s1 + $0xd0] sm:$0xf0]  ;;  %v5140_v12 = vor.u32 %v6624_v8, %v5139_v7  ;;  %v5123_v14 = vld [vmem:[%s7612_s1 + $0xa0] sm:$0xf] }
  0x45   : > { %980 = vmatpush.bf16.msra.mxu0 %v5156_v5  ;;  %v5144_v13 = vor.u32 %v6622_v10, %v5141_v11  ;;  %v6620_v15 = vld [vmem:[%s7612_s1 + $0xac] sm:$0xf0]  ;;  %v6618_v16 = vld [vmem:[%s7612_s1 + $0xa4] sm:$0xf]  ;;  %v5125_v17 = vld [vmem:[%s7612_s1 + $0xb0] sm:$0xf0] }
  0x46   : > { %994 = vmatpush.bf16.msra.mxu1 %v5160_v9  ;;  %v5124_v18 = vor.u32 %v6620_v15, %v5123_v14  ;;  %v5128_v19 = vor.u32 %v6618_v16, %v5125_v17  ;;  %v5107_v20 = vld [vmem:[%s7612_s1 + $0x80] sm:$0xf]  ;;  %v6616_v21 = vld [vmem:[%s7612_s1 + $0x8c] sm:$0xf0]  ;;  %v6614_v22 = vld [vmem:[%s7612_s1 + $0x84] sm:$0xf] }
  0x47   : > { %v5109_v23 = vld [vmem:[%s7612_s1 + $0x90] sm:$0xf0]  ;;  %v5108_v24 = vor.u32 %v6616_v21, %v5107_v20  ;;  %v5091_v26 = vld [vmem:[%s7612_s1 + $0x60] sm:$0xf]  ;;  %v6612_v27 = vld [vmem:[%s7612_s1 + $0x6c] sm:$0xf0] }
  0x48   : > { %v5112_v25 = vor.u32 %v6614_v22, %v5109_v23  ;;  %v6610_v28 = vld [vmem:[%s7612_s1 + $0x64] sm:$0xf]  ;;  %v5093_v29 = vld [vmem:[%s7612_s1 + $0x70] sm:$0xf0]  ;;  %v5092_v30 = vor.u32 %v6612_v27, %v5091_v26  ;;  %v5075_v32 = vld [vmem:[%s7612_s1 + $0x40] sm:$0xf] }
  0x49   : > { %981 = vmatpush.bf16.msra.mxu0 %v5140_v12  ;;  %v5096_v31 = vor.u32 %v6610_v28, %v5093_v29  ;;  %v6608_v33 = vld [vmem:[%s7612_s1 + $0x4c] sm:$0xf0]  ;;  %v6606_v34 = vld [vmem:[%s7612_s1 + $0x44] sm:$0xf]  ;;  %v5077_v35 = vld [vmem:[%s7612_s1 + $0x50] sm:$0xf0] }
  0x4a   : > { %995 = vmatpush.bf16.msra.mxu1 %v5144_v13  ;;  %v5076_v36 = vor.u32 %v6608_v33, %v5075_v32  ;;  %v5080_v37 = vor.u32 %v6606_v34, %v5077_v35  ;;  %v5059_v38 = vld [vmem:[%s7612_s1 + $0x20] sm:$0xf]  ;;  %v6604_v39 = vld [vmem:[%s7612_s1 + $0x2c] sm:$0xf0]  ;;  %v6602_v40 = vld [vmem:[%s7612_s1 + $0x24] sm:$0xf] }
  0x4b   : > { %v5061_v41 = vld [vmem:[%s7612_s1 + $0x30] sm:$0xf0]  ;;  %v5060_v42 = vor.u32 %v6604_v39, %v5059_v38  ;;  %v5043_v44 = vld [vmem:[%s7612_s1] sm:$0xf]  ;;  %v6600_v45 = vld [vmem:[%s7612_s1 + $0xc] sm:$0xf0] }
  0x4c   : > { %v5064_v43 = vor.u32 %v6602_v40, %v5061_v41  ;;  %v6598_v46 = vld [vmem:[%s7612_s1 + $0x4] sm:$0xf]  ;;  %v5045_v47 = vld [vmem:[%s7612_s1 + $0x10] sm:$0xf0]  ;;  %v5284_v48 = vld [vmem:[%s7647_s23 + $0xe0] sm:$0xf]  ;;  %v5044_v52 = vor.u32 %v6600_v45, %v5043_v44 }
  0x4d   : > { %982 = vmatpush.bf16.msra.mxu0 %v5124_v18  ;;  %v6661_v49 = vld [vmem:[%s7647_s23 + $0xec] sm:$0xf0]  ;;  %v6659_v50 = vld [vmem:[%s7647_s23 + $0xe4] sm:$0xf]  ;;  %v5286_v51 = vld [vmem:[%s7647_s23 + $0xf0] sm:$0xf0]  ;;  %v5048_v55 = vor.u32 %v6598_v46, %v5045_v47 }
  0x4e   : > { %996 = vmatpush.bf16.msra.mxu1 %v5128_v19  ;;  %v770_v53 = vld [vmem:[#allocation2] sm:$0xff]  ;;  %v771_v54 = vld [vmem:[#allocation2 + $0x8] sm:$0xff]  ;;  %v5285_v56 = vor.u32 %v6661_v49, %v5284_v48  ;;  %v5289_v57 = vor.u32 %v6659_v50, %v5286_v51  ;;  %v6657_v59 = vld [vmem:[%s7647_s23 + $0xcc] sm:$0xf0]  ;;  %s7686_s19 = scalar_lea.vmem [#allocation8], %s7609_s3  ;;  %s8625_s29 = sld [smem:[#allocation22_spill]] }
  0x4f   : > { %v5268_v58 = vld [vmem:[%s7647_s23 + $0xc0] sm:$0xf]  ;;  %v6655_v60 = vld [vmem:[%s7647_s23 + $0xc4] sm:$0xf]  ;;  %v5270_v61 = vld [vmem:[%s7647_s23 + $0xd0] sm:$0xf0]  ;;  %v7657_v62 = vpack.c.bf16 %v771_v54, %v770_v53 }
  0x50   : > { %v5269_v63 = vor.u32 %v6657_v59, %v5268_v58  ;;  %v5273_v0 = vor.u32 %v6655_v60, %v5270_v61  ;;  %v5252_v1 = vld [vmem:[%s7647_s23 + $0xa0] sm:$0xf]  ;;  %v6653_v2 = vld [vmem:[%s7647_s23 + $0xac] sm:$0xf0]  ;;  %v6651_v3 = vld [vmem:[%s7647_s23 + $0xa4] sm:$0xf] }
  0x51   : > { %983 = vmatpush.bf16.msra.mxu0 %v5108_v24  ;;  %v5254_v4 = vld [vmem:[%s7647_s23 + $0xb0] sm:$0xf0]  ;;  %v5253_v5 = vor.u32 %v6653_v2, %v5252_v1  ;;  %v5236_v7 = vld [vmem:[%s7647_s23 + $0x80] sm:$0xf]  ;;  %v6649_v8 = vld [vmem:[%s7647_s23 + $0x8c] sm:$0xf0] }
  0x52   : > { %997 = vmatpush.bf16.msra.mxu1 %v5112_v25  ;;  %v5257_v6 = vor.u32 %v6651_v3, %v5254_v4  ;;  %v6647_v9 = vld [vmem:[%s7647_s23 + $0x84] sm:$0xf]  ;;  %v5238_v10 = vld [vmem:[%s7647_s23 + $0x90] sm:$0xf0]  ;;  %v5237_v11 = vor.u32 %v6649_v8, %v5236_v7  ;;  %v5220_v13 = vld [vmem:[%s7647_s23 + $0x60] sm:$0xf] }
  0x53   : > { %v5241_v12 = vor.u32 %v6647_v9, %v5238_v10  ;;  %v6645_v14 = vld [vmem:[%s7647_s23 + $0x6c] sm:$0xf0]  ;;  %v6643_v15 = vld [vmem:[%s7647_s23 + $0x64] sm:$0xf]  ;;  %v5222_v16 = vld [vmem:[%s7647_s23 + $0x70] sm:$0xf0] }
  0x54   : > { %v5221_v17 = vor.u32 %v6645_v14, %v5220_v13  ;;  %v5225_v18 = vor.u32 %v6643_v15, %v5222_v16  ;;  %v5204_v19 = vld [vmem:[%s7647_s23 + $0x40] sm:$0xf]  ;;  %v6641_v20 = vld [vmem:[%s7647_s23 + $0x4c] sm:$0xf0]  ;;  %v6639_v21 = vld [vmem:[%s7647_s23 + $0x44] sm:$0xf] }
  0x55   : > { %984 = vmatpush.bf16.msra.mxu0 %v5092_v30  ;;  %v5206_v22 = vld [vmem:[%s7647_s23 + $0x50] sm:$0xf0]  ;;  %v5205_v23 = vor.u32 %v6641_v20, %v5204_v19  ;;  %v5188_v25 = vld [vmem:[%s7647_s23 + $0x20] sm:$0xf]  ;;  %v6637_v26 = vld [vmem:[%s7647_s23 + $0x2c] sm:$0xf0] }
  0x56   : > { %998 = vmatpush.bf16.msra.mxu1 %v5096_v31  ;;  %v5209_v24 = vor.u32 %v6639_v21, %v5206_v22  ;;  %v6635_v27 = vld [vmem:[%s7647_s23 + $0x24] sm:$0xf]  ;;  %v5190_v28 = vld [vmem:[%s7647_s23 + $0x30] sm:$0xf0]  ;;  %v5189_v29 = vor.u32 %v6637_v26, %v5188_v25  ;;  %v5172_v31 = vld [vmem:[%s7647_s23] sm:$0xf] }
  0x57   : > { %v5193_v30 = vor.u32 %v6635_v27, %v5190_v28  ;;  %v6633_v32 = vld [vmem:[%s7647_s23 + $0xc] sm:$0xf0]  ;;  %v6631_v33 = vld [vmem:[%s7647_s23 + $0x4] sm:$0xf]  ;;  %v5174_v34 = vld [vmem:[%s7647_s23 + $0x10] sm:$0xf0] }
  0x58   : > { %v5413_v35 = vld [vmem:[%s7686_s19 + $0xe0] sm:$0xf]  ;;  %v5415_v38 = vld [vmem:[%s7686_s19 + $0xf0] sm:$0xf0]  ;;  %v5173_v39 = vor.u32 %v6633_v32, %v5172_v31  ;;  %v5177_v40 = vor.u32 %v6631_v33, %v5174_v34  ;;  %v6690_v44 = vld [vmem:[%s7686_s19 + $0xcc] sm:$0xf0] }
  0x59   : > { %985 = vmatpush.bf16.msra.mxu0 %v5076_v36  ;;  %v6694_v36 = vld [vmem:[%s7686_s19 + $0xec] sm:$0xf0]  ;;  %v6688_v45 = vld [vmem:[%s7686_s19 + $0xc4] sm:$0xf]  ;;  %v5399_v46 = vld [vmem:[%s7686_s19 + $0xd0] sm:$0xf0] }
  0x5a   : > { %999 = vmatpush.bf16.msra.mxu1 %v5080_v37  ;;  %v6692_v37 = vld [vmem:[%s7686_s19 + $0xe4] sm:$0xf]  ;;  %v5414_v41 = vor.u32 %v6694_v36, %v5413_v35  ;;  %v5402_v48 = vor.u32 %v6688_v45, %v5399_v46  ;;  %v5381_v49 = vld [vmem:[%s7686_s19 + $0xa0] sm:$0xf]  ;;  %v6686_v50 = vld [vmem:[%s7686_s19 + $0xac] sm:$0xf0] }
  0x5b   : > { %v6684_v51 = vld [vmem:[%s7686_s19 + $0xa4] sm:$0xf]  ;;  %v5382_v53 = vor.u32 %v6686_v50, %v5381_v49  ;;  %v5367_v59 = vld [vmem:[%s7686_s19 + $0x90] sm:$0xf0]  ;;  %v5349_v61 = vld [vmem:[%s7686_s19 + $0x60] sm:$0xf] }
  0x5c   : > { %v5351_v2 = vld [vmem:[%s7686_s19 + $0x70] sm:$0xf0]  ;;  %v5333_v4 = vld [vmem:[%s7686_s19 + $0x40] sm:$0xf]  ;;  %v6627_v36 = vld [vmem:[%s7612_s1 + $0xec] sm:$0xf] }
  0x5d   : > { %986 = vmatpush.bf16.msra.mxu0 %v5060_v42  ;;  %v5418_v42 = vor.u32 %v6692_v37, %v5415_v38  ;;  %v5335_v8 = vld [vmem:[%s7686_s19 + $0x50] sm:$0xf0]  ;;  %v5317_v10 = vld [vmem:[%s7686_s19 + $0x20] sm:$0xf]  ;;  %v5165_v37 = vld [vmem:[%s7612_s1 + $0xf8] sm:$0xf0] }
  0x5e   : > { %1000 = vmatpush.bf16.msra.mxu1 %v5064_v43  ;;  %v5397_v43 = vld [vmem:[%s7686_s19 + $0xc0] sm:$0xf]  ;;  %v5319_v14 = vld [vmem:[%s7686_s19 + $0x30] sm:$0xf0]  ;;  %v6629_v45 = vld [vmem:[%s7612_s1 + $0xf4] sm:$0xf0] }
  0x5f   : > { %v5398_v47 = vor.u32 %v6690_v44, %v5397_v43  ;;  %v5301_v16 = vld [vmem:[%s7686_s19] sm:$0xf]  ;;  %v5303_v20 = vld [vmem:[%s7686_s19 + $0x10] sm:$0xf0]  ;;  %v6619_v46 = vld [vmem:[%s7612_s1 + $0xac] sm:$0xf] }
  0x60   : > { %v7731_v26 = vld [vmem:[%s1070_s14] sm:$0xf]  ;;  %v5133_v50 = vld [vmem:[%s7612_s1 + $0xb8] sm:$0xf0]  ;;  %s2295_s14 = scalar_lea.vmem %s8589_s15, %s7381_s0  ;;  %s6729_s20 = sshll.u32 %s7381_s0, 10 }
  0x61   : > { %987 = vmatpush.bf16.msra.mxu0 %v5044_v52  ;;  %v5383_v52 = vld [vmem:[%s7686_s19 + $0xb0] sm:$0xf0]  ;;  %v1073_v27 = vperm.slane %v7731_v26, 0  ;;  %v1074_v28 = vperm.slane %v7731_v26, 1  ;;  %s8003_s26 = scalar_lea.vmem [#allocation11], %s6729_s20  ;;  %s8627_s27 = sld [smem:[#allocation28_spill]] }
  0x62   : > { %1001 = vmatpush.bf16.msra.mxu1 %v5048_v55  ;;  %v5386_v54 = vor.u32 %v6684_v51, %v5383_v52  ;;  %v5365_v55 = vld [vmem:[%s7686_s19 + $0x80] sm:$0xf]  ;;  %v5147_v51 = vld [vmem:[%s7612_s1 + $0xc8] sm:$0xf]  ;;  %v6625_v52 = vld [vmem:[%s7612_s1 + $0xd4] sm:$0xf0] }
  0x63   : > { %s8629_s25 = sld [smem:[#allocation30_spill]]  ;;  %p6592_p8 = scmp.ne.s32.totalorder %s7381_s0, 1 }
  0x64   : > { %988 = vmatmul.bf16.vlgmr.msra.gmra.mxu0 %v7657_v62 }
  0x65   : > { %1241 = vmatpush.bf16.msrb.mxu0 %v5285_v56  ;;  %1002 = vmatmul.bf16.vlgmr.msra.gmra.mxu1 %v7657_v62  ;;  %v6682_v56 = vld [vmem:[%s7686_s19 + $0x8c] sm:$0xf0] }
  0x66   : > { %1255 = vmatpush.bf16.msrb.mxu1 %v5289_v57  ;;  %v6680_v57 = vld [vmem:[%s7686_s19 + $0x84] sm:$0xf]  ;;  %v5366_v58 = vor.u32 %v6682_v56, %v5365_v55  ;;  %v5148_v56 = vor.u32 %v6625_v52, %v5147_v51  ;;  %v5262_v51 = vld [vmem:[%s7647_s23 + $0xb8] sm:$0xf0] }
  0x67   : > { %v5370_v60 = vor.u32 %v6680_v57, %v5367_v59  ;;  %v5131_v59 = vld [vmem:[%s7612_s1 + $0xa8] sm:$0xf]  ;;  %s4691_s22 = scalar_lea.vmem %s8627_s27, %s7381_s0 }
  0x69   : > { %1242 = vmatpush.bf16.msrb.mxu0 %v5269_v63  ;;  %v6678_v63 = vld [vmem:[%s7686_s19 + $0x6c] sm:$0xf0] }
  0x6a   : > { %1256 = vmatpush.bf16.msrb.mxu1 %v5273_v0  ;;  %v6676_v0 = vld [vmem:[%s7686_s19 + $0x64] sm:$0xf]  ;;  %v5350_v1 = vor.u32 %v6678_v63, %v5349_v61  ;;  %v6615_v63 = vld [vmem:[%s7612_s1 + $0x8c] sm:$0xf] }
  0x6b   : > { %v5354_v3 = vor.u32 %v6676_v0, %v5351_v2  ;;  %v5117_v0 = vld [vmem:[%s7612_s1 + $0x98] sm:$0xf0] }
  0x6d   : > { %1243 = vmatpush.bf16.msrb.mxu0 %v5253_v5  ;;  %v6674_v5 = vld [vmem:[%s7686_s19 + $0x4c] sm:$0xf0] }
  0x6e   : > { %1257 = vmatpush.bf16.msrb.mxu1 %v5257_v6  ;;  %v6672_v6 = vld [vmem:[%s7686_s19 + $0x44] sm:$0xf]  ;;  %v5334_v7 = vor.u32 %v6674_v5, %v5333_v4  ;;  %v5120_v4 = vor.u32 %v6615_v63, %v5117_v0  ;;  %v5115_v5 = vld [vmem:[%s7612_s1 + $0x88] sm:$0xf]  ;;  %v6644_v63 = vld [vmem:[%s7647_s23 + $0x6c] sm:$0xf] }
  0x6f   : > { %v5338_v9 = vor.u32 %v6672_v6, %v5335_v8  ;;  %v6617_v6 = vld [vmem:[%s7612_s1 + $0x94] sm:$0xf0]  ;;  %v5230_v0 = vld [vmem:[%s7647_s23 + $0x78] sm:$0xf0] }
  0x71   : > { %1244 = vmatpush.bf16.msrb.mxu0 %v5237_v11  ;;  %v6670_v11 = vld [vmem:[%s7686_s19 + $0x2c] sm:$0xf0] }
  0x72   : > { %1258 = vmatpush.bf16.msrb.mxu1 %v5241_v12  ;;  %v6668_v12 = vld [vmem:[%s7686_s19 + $0x24] sm:$0xf]  ;;  %v5318_v13 = vor.u32 %v6670_v11, %v5317_v10  ;;  %v5101_v10 = vld [vmem:[%s7612_s1 + $0x78] sm:$0xf0]  ;;  %v5116_v11 = vor.u32 %v6617_v6, %v5115_v5  ;;  %v6640_v5 = vld [vmem:[%s7647_s23 + $0x4c] sm:$0xf] }
  0x73   : > { %v5322_v15 = vor.u32 %v6668_v12, %v5319_v14  ;;  %v6613_v14 = vld [vmem:[%s7612_s1 + $0x74] sm:$0xf0]  ;;  %v5214_v6 = vld [vmem:[%s7647_s23 + $0x58] sm:$0xf0] }
  0x75   : > { %1245 = vmatpush.bf16.msrb.mxu0 %v5221_v17  ;;  %v6666_v17 = vld [vmem:[%s7686_s19 + $0xc] sm:$0xf0] }
  0x76   : > { %1259 = vmatpush.bf16.msrb.mxu1 %v5225_v18  ;;  %v6664_v18 = vld [vmem:[%s7686_s19 + $0x4] sm:$0xf]  ;;  %v5302_v19 = vor.u32 %v6666_v17, %v5301_v16  ;;  %v6607_v16 = vld [vmem:[%s7612_s1 + $0x4c] sm:$0xf]  ;;  %v5085_v17 = vld [vmem:[%s7612_s1 + $0x58] sm:$0xf0] }
  0x77   : > { %v5306_v21 = vor.u32 %v6664_v18, %v5303_v20  ;;  %v5083_v20 = vld [vmem:[%s7612_s1 + $0x48] sm:$0xf] }
  0x79   : > { %1246 = vmatpush.bf16.msrb.mxu0 %v5205_v23 }
  0x7a   : > { %1260 = vmatpush.bf16.msrb.mxu1 %v5209_v24 }
  0x7d   : > { %1247 = vmatpush.bf16.msrb.mxu0 %v5189_v29  ;;  %v7739_v29 = vld [vmem:[%s809_s17] sm:$0xf]  ;;  %s2297_s17 = scalar_lea.vmem %s8590_s16, %s7381_s0 }
  0x7e   : > { %1261 = vmatpush.bf16.msrb.mxu1 %v5193_v30  ;;  %v812_v34 = vperm.slane %v7739_v29, 0  ;;  %v813_v35 = vperm.slane %v7739_v29, 1 }
  0x81   : > { %1248 = vmatpush.bf16.msrb.mxu0 %v5173_v39  ;;  %v5168_v39 = vor.u32 %v6627_v36, %v5165_v37  ;;  %v5051_v37 = vld [vmem:[%s7612_s1 + $0x8] sm:$0xf] }
  0x82   : > { %1262 = vmatpush.bf16.msrb.mxu1 %v5177_v40  ;;  %v6623_v40 = vld [vmem:[%s7612_s1 + $0xcc] sm:$0xf] }
  0x83   : > { %1022 = vmatpush.bf16.msra.mxu3 %v5168_v39 }
  0x84   : > { %1249 = vmatmul.bf16.vlgmr.msrb.gmra.mxu0 %v7657_v62 }
  0x85   : > { %1502 = vmatpush.bf16.msra.mxu0 %v5414_v41  ;;  %1263 = vmatmul.bf16.vlgmr.msrb.gmra.mxu1 %v7657_v62  ;;  %v5149_v41 = vld [vmem:[%s7612_s1 + $0xd8] sm:$0xf0] }
  0x86   : > { %1516 = vmatpush.bf16.msra.mxu1 %v5418_v42  ;;  %v5163_v42 = vld [vmem:[%s7612_s1 + $0xe8] sm:$0xf]  ;;  %v5152_v44 = vor.u32 %v6623_v40, %v5149_v41  ;;  %v6662_v41 = vld [vmem:[%s7647_s23 + $0xf4] sm:$0xf0] }
  0x87   : > { %v5164_v49 = vor.u32 %v6629_v45, %v5163_v42  ;;  %v5292_v40 = vld [vmem:[%s7647_s23 + $0xe8] sm:$0xf]  ;;  %v6656_v42 = vld [vmem:[%s7647_s23 + $0xcc] sm:$0xf] }
  0x88   : > { %1023 = vmatpush.bf16.msra.mxu3 %v5152_v44  ;;  %v5293_v45 = vor.u32 %v6662_v41, %v5292_v40  ;;  %v5389_v41 = vld [vmem:[%s7686_s19 + $0xa8] sm:$0xf] }
  0x89   : > { %1503 = vmatpush.bf16.msra.mxu0 %v5398_v47  ;;  %1008 = vmatpush.bf16.msra.mxu2 %v5164_v49  ;;  %v6658_v49 = vld [vmem:[%s7647_s23 + $0xd4] sm:$0xf0] }
  0x8a   : > { %1517 = vmatpush.bf16.msra.mxu1 %v5402_v48 }
  0x8d   : > { %1504 = vmatpush.bf16.msra.mxu0 %v5382_v53  ;;  %1009 = vmatpush.bf16.msra.mxu2 %v5148_v56  ;;  %v6648_v56 = vld [vmem:[%s7647_s23 + $0x8c] sm:$0xf] }
  0x8e   : > { %1518 = vmatpush.bf16.msra.mxu1 %v5386_v54 }
  0x91   : > { %1505 = vmatpush.bf16.msra.mxu0 %v5366_v58  ;;  %v5136_v58 = vor.u32 %v6619_v46, %v5133_v50  ;;  %v6652_v50 = vld [vmem:[%s7647_s23 + $0xac] sm:$0xf] }
  0x92   : > { %1519 = vmatpush.bf16.msra.mxu1 %v5370_v60  ;;  %v6621_v60 = vld [vmem:[%s7612_s1 + $0xb4] sm:$0xf0] }
  0x93   : > { %v5132_v2 = vor.u32 %v6621_v60, %v5131_v59  ;;  %1024 = vmatpush.bf16.msra.mxu3 %v5136_v58  ;;  %v5244_v60 = vld [vmem:[%s7647_s23 + $0x88] sm:$0xf] }
  0x95   : > { %1506 = vmatpush.bf16.msra.mxu0 %v5350_v1  ;;  %1010 = vmatpush.bf16.msra.mxu2 %v5132_v2  ;;  %v5233_v2 = vor.u32 %v6644_v63, %v5230_v0  ;;  %v5341_v63 = vld [vmem:[%s7686_s19 + $0x48] sm:$0xf]  ;;  %v6675_v0 = vld [vmem:[%s7686_s19 + $0x54] sm:$0xf0] }
  0x96   : > { %1520 = vmatpush.bf16.msra.mxu1 %v5354_v3 }
  0x97   : > { %1025 = vmatpush.bf16.msra.mxu3 %v5120_v4  ;;  %v6646_v4 = vld [vmem:[%s7647_s23 + $0x74] sm:$0xf0] }
  0x99   : > { %1507 = vmatpush.bf16.msra.mxu0 %v5334_v7  ;;  %1011 = vmatpush.bf16.msra.mxu2 %v5116_v11  ;;  %v6636_v11 = vld [vmem:[%s7647_s23 + $0x2c] sm:$0xf] }
  0x9a   : > { %1521 = vmatpush.bf16.msra.mxu1 %v5338_v9  ;;  %v6611_v9 = vld [vmem:[%s7612_s1 + $0x6c] sm:$0xf] }
  0x9b   : > { %v5104_v12 = vor.u32 %v6611_v9, %v5101_v10  ;;  %v5212_v9 = vld [vmem:[%s7647_s23 + $0x48] sm:$0xf]  ;;  %v6642_v10 = vld [vmem:[%s7647_s23 + $0x54] sm:$0xf0] }
  0x9d   : > { %1508 = vmatpush.bf16.msra.mxu0 %v5318_v13  ;;  %v5099_v13 = vld [vmem:[%s7612_s1 + $0x68] sm:$0xf]  ;;  %1026 = vmatpush.bf16.msra.mxu3 %v5104_v12  ;;  %v5198_v12 = vld [vmem:[%s7647_s23 + $0x38] sm:$0xf0] }
  0x9e   : > { %1522 = vmatpush.bf16.msra.mxu1 %v5322_v15  ;;  %v5100_v18 = vor.u32 %v6613_v14, %v5099_v13  ;;  %v5213_v13 = vor.u32 %v6642_v10, %v5212_v9  ;;  %v5201_v14 = vor.u32 %v6636_v11, %v5198_v12  ;;  %v5325_v9 = vld [vmem:[%s7686_s19 + $0x28] sm:$0xf]  ;;  %v6671_v10 = vld [vmem:[%s7686_s19 + $0x34] sm:$0xf0]  ;;  %v6665_v11 = vld [vmem:[%s7686_s19 + $0xc] sm:$0xf] }
  0x9f   : > { %v5311_v12 = vld [vmem:[%s7686_s19 + $0x18] sm:$0xf0] }
  0xa0   : > { %1012 = vmatpush.bf16.msra.mxu2 %v5100_v18  ;;  %v5182_v18 = vld [vmem:[%s7647_s23 + $0x18] sm:$0xf0] }
  0xa1   : > { %1509 = vmatpush.bf16.msra.mxu0 %v5302_v19  ;;  %v5088_v19 = vor.u32 %v6607_v16, %v5085_v17  ;;  %v6638_v16 = vld [vmem:[%s7647_s23 + $0x34] sm:$0xf0]  ;;  %v6632_v17 = vld [vmem:[%s7647_s23 + $0xc] sm:$0xf] }
  0xa2   : > { %1523 = vmatpush.bf16.msra.mxu1 %v5306_v21  ;;  %v6609_v21 = vld [vmem:[%s7612_s1 + $0x54] sm:$0xf0] }
  0xa3   : > { %1027 = vmatpush.bf16.msra.mxu3 %v5088_v19  ;;  %v6693_v19 = vld [vmem:[%s7686_s19 + $0xec] sm:$0xf] }
  0xa4   : > { %1510 = vmatmul.bf16.vlgmr.msra.gmra.mxu0 %v7657_v62 }
  0xa5   : > { %1524 = vmatmul.bf16.vlgmr.msra.gmra.mxu1 %v7657_v62 }
  0xe1   : > { %v989_v22 = vpop.f32.mrf.mxu0 }
  0xe2   : > { %v1003_v23 = vpop.f32.mrf.mxu1  ;;  %v990_v47 = vadd.f32 %v989_v22, %v812_v34  ;;  %v6603_v22 = vld [vmem:[%s7612_s1 + $0x2c] sm:$0xf] }
  0xe3   : > { %v1004_v48 = vadd.f32 %v1003_v23, %v813_v35  ;;  %v5069_v23 = vld [vmem:[%s7612_s1 + $0x38] sm:$0xf0] }
  0xe5   : > { %v1558_v61 = vpack.c.bf16 %v1004_v48, %v990_v47  ;;  %v5276_v48 = vld [vmem:[%s7647_s23 + $0xc8] sm:$0xf] }
  0xe6   : > { %v5277_v52 = vor.u32 %v6658_v49, %v5276_v48  ;;  %v6683_v48 = vld [vmem:[%s7686_s19 + $0x94] sm:$0xf0]  ;;  %v6677_v49 = vld [vmem:[%s7686_s19 + $0x6c] sm:$0xf] }
  0xe9   : > { %v991_v24 = vpop.f32.mrf.mxu0 }
  0xea   : > { %v1005_v25 = vpop.f32.mrf.mxu1  ;;  %v992_v7 = vadd.f32 %v991_v24, %v812_v34  ;;  %v5084_v24 = vor.u32 %v6609_v21, %v5083_v20  ;;  %v5294_v34 = vld [vmem:[%s7647_s23 + $0xf8] sm:$0xf0] }
  0xeb   : > { %v1006_v8 = vadd.f32 %v1005_v25, %v813_v35  ;;  %v5072_v25 = vor.u32 %v6603_v22, %v5069_v23  ;;  %v5423_v20 = vld [vmem:[%s7686_s19 + $0xf8] sm:$0xf0]  ;;  %v5185_v22 = vor.u32 %v6632_v17, %v5182_v18  ;;  %v5180_v23 = vld [vmem:[%s7647_s23 + $0x8] sm:$0xf]  ;;  %v6667_v17 = vld [vmem:[%s7686_s19 + $0x14] sm:$0xf0] }
  0xec   : > { %1013 = vmatpush.bf16.msra.mxu2 %v5084_v24  ;;  %v6634_v24 = vld [vmem:[%s7647_s23 + $0x14] sm:$0xf0] }
  0xed   : > { %v1560_v15 = vpack.c.bf16 %v1006_v8, %v992_v7  ;;  %1028 = vmatpush.bf16.msra.mxu3 %v5072_v25  ;;  %v5217_v8 = vor.u32 %v6640_v5, %v5214_v6  ;;  %v5426_v25 = vor.u32 %v6693_v19, %v5423_v20  ;;  %v5342_v6 = vor.u32 %v6675_v0, %v5341_v63 }
  0xef   : > { %v1705_v46 = vrot.slane %v1560_v15, 4 }
 0x101   : > { %v1250_v30 = vpop.f32.mrf.mxu0 }
 0x102   : > { %v1251_v31 = vadd.f32 %v1250_v30, %v1073_v27  ;;  %v1264_v32 = vpop.f32.mrf.mxu1  ;;  %v1686_v30 = vrot.slane %v1558_v61, 4 }
 0x103   : > { %v1265_v33 = vadd.f32 %v1264_v32, %v1074_v28  ;;  %v5053_v32 = vld [vmem:[%s7612_s1 + $0x18] sm:$0xf0] }
 0x105   : > { %v1562_v38 = vpack.c.bf16 %v1265_v33, %v1251_v31  ;;  %v6599_v31 = vld [vmem:[%s7612_s1 + $0xc] sm:$0xf] }
 0x106   : > { %v6660_v33 = vld [vmem:[%s7647_s23 + $0xec] sm:$0xf]  ;;  %v5056_v36 = vor.u32 %v6599_v31, %v5053_v32  ;;  %v5407_v31 = vld [vmem:[%s7686_s19 + $0xd8] sm:$0xf0]  ;;  %v5181_v32 = vor.u32 %v6634_v24, %v5180_v23 }
 0x107   : > { %v1689_v43 = vrot.slane %v1562_v38, 4  ;;  %1583 = vmatpush.bf16.xpose.msrb.mxu0 %v1562_v38  ;;  %v6601_v38 = vld [vmem:[%s7612_s1 + $0x14] sm:$0xf0]  ;;  %v5297_v39 = vor.u32 %v6660_v33, %v5294_v34 }
 0x108   : > { %v5052_v44 = vor.u32 %v6601_v38, %v5051_v37  ;;  %1029 = vmatpush.bf16.msra.mxu3 %v5056_v36  ;;  %v6691_v36 = vld [vmem:[%s7686_s19 + $0xd4] sm:$0xf0]  ;;  %v6685_v37 = vld [vmem:[%s7686_s19 + $0xac] sm:$0xf]  ;;  %v5391_v38 = vld [vmem:[%s7686_s19 + $0xb8] sm:$0xf0] }
 0x109   : > { %v1252_v53 = vpop.f32.mrf.mxu0  ;;  %v5394_v40 = vor.u32 %v6685_v37, %v5391_v38 }
 0x10a   : > { %v1253_v54 = vadd.f32 %v1252_v53, %v1073_v27  ;;  %v1266_v55 = vpop.f32.mrf.mxu1  ;;  %v5067_v27 = vld [vmem:[%s7612_s1 + $0x28] sm:$0xf]  ;;  %v5265_v53 = vor.u32 %v6652_v50, %v5262_v51  ;;  %v5359_v50 = vld [vmem:[%s7686_s19 + $0x78] sm:$0xf0] }
 0x10b   : > { %v1267_v57 = vadd.f32 %v1266_v55, %v1074_v28  ;;  %v6605_v28 = vld [vmem:[%s7612_s1 + $0x34] sm:$0xf0]  ;;  %1030 = vmatmul.bf16.vlgmr.msra.gmra.mxu3 %v7657_v62  ;;  %s8184_s1 = scalar_lea.vmem [#allocation12], %s6729_s20 }
 0x10c   : > { %v5068_v35 = vor.u32 %v6605_v28, %v5067_v27  ;;  %1283 = vmatpush.bf16.msrb.mxu3 %v5297_v39  ;;  %v6654_v55 = vld [vmem:[%s7647_s23 + $0xb4] sm:$0xf0]  ;;  %v5421_v27 = vld [vmem:[%s7686_s19 + $0xe8] sm:$0xf] }
 0x10d   : > { %v1564_v1 = vpack.c.bf16 %v1267_v57, %v1253_v54  ;;  %v5260_v54 = vld [vmem:[%s7647_s23 + $0xa8] sm:$0xf]  ;;  %v5246_v57 = vld [vmem:[%s7647_s23 + $0x98] sm:$0xf0]  ;;  %v6695_v28 = vld [vmem:[%s7686_s19 + $0xf4] sm:$0xf0] }
 0x10e   : > { %1584 = vmatmul.bf16.vlgmr.msrb.gmra.mxu0 %v1558_v61  ;;  %1014 = vmatpush.bf16.msra.mxu2 %v5068_v35  ;;  %v5261_v58 = vor.u32 %v6654_v55, %v5260_v54  ;;  %v5249_v59 = vor.u32 %v6648_v56, %v5246_v57  ;;  %v6650_v61 = vld [vmem:[%s7647_s23 + $0x94] sm:$0xf0]  ;;  %v5422_v33 = vor.u32 %v6695_v28, %v5421_v27  ;;  %v5405_v35 = vld [vmem:[%s7686_s19 + $0xc8] sm:$0xf]  ;;  %v6673_v56 = vld [vmem:[%s7686_s19 + $0x4c] sm:$0xf] }
 0x10f   : > { %1698 = vmatpush.bf16.xpose.msra.mxu0 %v1689_v43  ;;  %v1708_v3 = vrot.slane %v1564_v1, 4  ;;  %1596 = vmatpush.bf16.xpose.msrb.mxu1 %v1564_v1  ;;  %v5278_v43 = vld [vmem:[%s7647_s23 + $0xd8] sm:$0xf0]  ;;  %v5245_v1 = vor.u32 %v6650_v61, %v5244_v60  ;;  %v5406_v39 = vor.u32 %v6691_v36, %v5405_v35  ;;  %v5357_v54 = vld [vmem:[%s7686_s19 + $0x68] sm:$0xf] }
 0x110   : > { %v5281_v47 = vor.u32 %v6656_v42, %v5278_v43  ;;  %v6687_v42 = vld [vmem:[%s7686_s19 + $0xb4] sm:$0xf0]  ;;  %v6681_v43 = vld [vmem:[%s7686_s19 + $0x8c] sm:$0xf]  ;;  %v5343_v57 = vld [vmem:[%s7686_s19 + $0x58] sm:$0xf0] }
 0x111   : > { %v6679_v55 = vld [vmem:[%s7686_s19 + $0x74] sm:$0xf0]  ;;  %v5346_v61 = vor.u32 %v6673_v56, %v5343_v57 }
 0x112   : > { %1015 = vmatpush.bf16.msra.mxu2 %v5052_v44  ;;  %1284 = vmatpush.bf16.msrb.mxu3 %v5281_v47  ;;  %v5375_v44 = vld [vmem:[%s7686_s19 + $0x98] sm:$0xf0]  ;;  %v5373_v47 = vld [vmem:[%s7686_s19 + $0x88] sm:$0xf] }
 0x113   : > { %v5374_v51 = vor.u32 %v6683_v48, %v5373_v47 }
 0x115   : > { %1016 = vmatmul.bf16.vlgmr.msra.gmra.mxu2 %v7657_v62 }
 0x116   : > { %1597 = vmatmul.bf16.vlgmr.msrb.gmra.mxu1 %v1560_v15  ;;  %1269 = vmatpush.bf16.msrb.mxu2 %v5293_v45  ;;  %v5196_v15 = vld [vmem:[%s7647_s23 + $0x28] sm:$0xf]  ;;  %v5390_v45 = vor.u32 %v6687_v42, %v5389_v41 }
 0x117   : > { %1717 = vmatpush.bf16.xpose.msra.mxu1 %v1708_v3  ;;  %1285 = vmatpush.bf16.msrb.mxu3 %v5265_v53  ;;  %v5228_v3 = vld [vmem:[%s7647_s23 + $0x68] sm:$0xf]  ;;  %v5197_v21 = vor.u32 %v6638_v16, %v5196_v15  ;;  %v7833_v53 = vld [vmem:[%s1331_s9] sm:$0xf]  ;;  %v5314_v15 = vor.u32 %v6665_v11, %v5311_v12  ;;  %s7894_s23 = scalar_lea.vmem [#allocation9], %s7609_s3  ;;  %v815_v11 = vperm.slane %v7739_v29, 3 }
 0x118   : > { %v5229_v7 = vor.u32 %v6646_v4, %v5228_v3  ;;  %v1335_v60 = vperm.slane %v7833_v53, 1  ;;  %v5309_v16 = vld [vmem:[%s7686_s19 + $0x8] sm:$0xf] }
 0x11a   : > { %1270 = vmatpush.bf16.msrb.mxu2 %v5277_v52  ;;  %v5362_v52 = vor.u32 %v6677_v49, %v5359_v50 }
 0x11b   : > { %1286 = vmatpush.bf16.msrb.mxu3 %v5249_v59  ;;  %v5358_v59 = vor.u32 %v6679_v55, %v5357_v54 }
 0x11e   : > { %1699 = vmatmul.bf16.vlgmr.msra.gmra.mxu0 %v1686_v30  ;;  %1271 = vmatpush.bf16.msrb.mxu2 %v5261_v58  ;;  %v6689_v30 = vld [vmem:[%s7686_s19 + $0xcc] sm:$0xf]  ;;  %v1334_v58 = vperm.slane %v7833_v53, 0 }
 0x11f   : > { %1287 = vmatpush.bf16.msrb.mxu3 %v5233_v2  ;;  %v5410_v34 = vor.u32 %v6689_v30, %v5407_v31  ;;  %v5327_v2 = vld [vmem:[%s7686_s19 + $0x38] sm:$0xf0]  ;;  %v764_v30 = vld [vmem:[%s8625_s29] sm:$0x1] }
 0x120   : > { %v766_v31 = vsub.f32 1.0, %v764_v30 }
 0x121   : > { %v1511_v3 = vpop.f32.mrf.mxu0 }
 0x122   : > { %1272 = vmatpush.bf16.msrb.mxu2 %v5245_v1  ;;  %v6669_v1 = vld [vmem:[%s7686_s19 + $0x2c] sm:$0xf]  ;;  %v1512_v4 = vadd.f32 %v1511_v3, %v1334_v58  ;;  %v1525_v5 = vpop.f32.mrf.mxu1 }
 0x123   : > { %1288 = vmatpush.bf16.msrb.mxu3 %v5217_v8  ;;  %v5330_v8 = vor.u32 %v6669_v1, %v5327_v2 }
 0x126   : > { %1718 = vmatmul.bf16.vlgmr.msra.gmra.mxu1 %v1705_v46  ;;  %1273 = vmatpush.bf16.msrb.mxu2 %v5229_v7  ;;  %v5378_v46 = vor.u32 %v6681_v43, %v5375_v44  ;;  %v1526_v7 = vadd.f32 %v1525_v5, %v1335_v60 }
 0x127   : > { %1289 = vmatpush.bf16.msrb.mxu3 %v5201_v14  ;;  %v5326_v14 = vor.u32 %v6671_v10, %v5325_v9  ;;  %v6703_v9 = vld [vmem:[%s7894_s23 + $0x30] sm:$0xff]  ;;  %v814_v10 = vperm.slane %v7739_v29, 2 }
 0x128   : > { %v6711_v29 = vld [vmem:[%s7894_s23 + $0x70] sm:$0xff] }
 0x129   : > { %v1513_v18 = vpop.f32.mrf.mxu0 }
 0x12a   : > { %1274 = vmatpush.bf16.msrb.mxu2 %v5213_v13  ;;  %v1566_v13 = vpack.c.bf16 %v1526_v7, %v1512_v4  ;;  %v1514_v20 = vadd.f32 %v1513_v18, %v1334_v58  ;;  %v6701_v18 = vld [vmem:[%s7894_s23 + $0x20] sm:$0xff] }
 0x12b   : > { %1290 = vmatpush.bf16.msrb.mxu3 %v5185_v22  ;;  %v5310_v22 = vor.u32 %v6667_v17, %v5309_v16 }
 0x12c   : > { %v1632_v19 = vsel %vm1630_vm0, %v1566_v13, 0  ;;  %v1748_v24 = vrot.slane %v1566_v13, 4 }
 0x12e   : > { %1275 = vmatpush.bf16.msrb.mxu2 %v5197_v21  ;;  %1291 = vmatmul.bf16.vlgmr.msrb.gmra.mxu3 %v7657_v62  ;;  %v1527_v21 = vpop.f32.mrf.mxu1  ;;  %v1753_v28 = vsel %vm1630_vm0, %v1748_v24, 0 }
 0x12f   : > { %1544 = vmatpush.bf16.msra.mxu3 %v5426_v25  ;;  %v1528_v23 = vadd.f32 %v1527_v21, %v1335_v60  ;;  %v1076_v21 = vperm.slane %v7731_v26, 3 }
 0x131   : > { %v7852_v25 = vpack.c.bf16 %v1528_v23, %v1514_v20  ;;  %v1075_v20 = vperm.slane %v7731_v26, 2 }
 0x132   : > { %1276 = vmatpush.bf16.msrb.mxu2 %v5181_v32  ;;  %v768_v32 = vmul.f32 -1e+30, %v766_v31  ;;  %v6698_v31 = vld [vmem:[%s7894_s23 + $0x8] sm:$0xff] }
 0x133   : > { %1545 = vmatpush.bf16.msra.mxu3 %v5410_v34  ;;  %v1651_v27 = vsel %vm1630_vm0, %v7852_v25, 0 }
 0x134   : > { %v7865_v34 = vperm.slane %v768_v32, 0 }
 0x135   : > { %1277 = vmatmul.bf16.vlgmr.msrb.gmra.mxu2 %v7657_v62 }
 0x136   : > { %1530 = vmatpush.bf16.msra.mxu2 %v5422_v33  ;;  %v765_v33 = vld [vmem:[%s8625_s29 + $0x1] sm:$0x1] }
 0x137   : > { %1546 = vmatpush.bf16.msra.mxu3 %v5394_v40  ;;  %v767_v35 = vsub.f32 1.0, %v765_v33 }
 0x139   : > { %v769_v38 = vmul.f32 -1e+30, %v767_v35 }
 0x13a   : > { %1531 = vmatpush.bf16.msra.mxu2 %v5406_v39 }
 0x13b   : > { %1547 = vmatpush.bf16.msra.mxu3 %v5378_v46  ;;  %v7869_v39 = vperm.slane %v769_v38, 0 }
 0x13e   : > { %1532 = vmatpush.bf16.msra.mxu2 %v5390_v45 }
 0x13f   : > { %1548 = vmatpush.bf16.msra.mxu3 %v5362_v52 }
 0x142   : > { %1533 = vmatpush.bf16.msra.mxu2 %v5374_v51 }
 0x143   : > { %1549 = vmatpush.bf16.msra.mxu3 %v5346_v61 }
 0x146   : > { %1534 = vmatpush.bf16.msra.mxu2 %v5358_v59 }
 0x147   : > { %1550 = vmatpush.bf16.msra.mxu3 %v5330_v8  ;;  %v6704_v8 = vld [vmem:[%s7894_s23 + $0x38] sm:$0xff] }
 0x148   : > { %1916 = vmatpush.bf16.msrb.mxu1 %v6704_v8 }
 0x14a   : > { %1535 = vmatpush.bf16.msra.mxu2 %v5342_v6 }
 0x14b   : > { %1551 = vmatpush.bf16.msra.mxu3 %v5314_v15 }
 0x14c   : > { %1917 = vmatpush.bf16.msrb.mxu1 %v6703_v9 }
 0x14e   : > { %1536 = vmatpush.bf16.msra.mxu2 %v5326_v14  ;;  %1552 = vmatmul.bf16.vlgmr.msra.gmra.mxu3 %v7657_v62  ;;  %v6702_v14 = vld [vmem:[%s7894_s23 + $0x28] sm:$0xff] }
 0x14f   : > { %1641 = vmatpush.bf16.msrb.mxu3 %v1632_v19  ;;  %v6700_v19 = vld [vmem:[%s7894_s23 + $0x18] sm:$0xff] }
 0x150   : > { %1918 = vmatpush.bf16.msrb.mxu1 %v6702_v14 }
 0x152   : > { %1537 = vmatpush.bf16.msra.mxu2 %v5310_v22 }
 0x153   : > { %1660 = vmatpush.bf16.msra.mxu3 %v1651_v27 }
 0x154   : > { %1919 = vmatpush.bf16.msrb.mxu1 %v6701_v18 }
 0x155   : > { %1538 = vmatmul.bf16.vlgmr.msra.gmra.mxu2 %v7657_v62 }
 0x156   : > { %1762 = vmatpush.bf16.msrb.mxu2 %v1753_v28  ;;  %v6699_v28 = vld [vmem:[%s7894_s23 + $0x10] sm:$0xff] }
 0x158   : > { %1920 = vmatpush.bf16.msrb.mxu1 %v6700_v19 }
 0x15c   : > { %1921 = vmatpush.bf16.msrb.mxu1 %v6699_v28 }
 0x160   : > { %1922 = vmatpush.bf16.msrb.mxu1 %v6698_v31 }
 0x18b   : > { %v1585_v36 = vpop.f32.mrf.mxu0 }
 0x18c   : > { %v1586_v37 = vadd.f32 %v1585_v36, %v7865_v34 }
 0x18e   : > { %v1603_v62 = vsel %vm1602_vm1, %v1586_v37, -inf  ;;  %v7891_v7 = vpop.f32.mrf.mxu3 }
 0x18f   : > { %1604 = vmax.xlane.f32.xlu1 %v1603_v62  ;;  %v1769_v62 = vrot.slane %v7852_v25, 4 }
 0x193   : > { %v1587_v40 = vpop.f32.mrf.mxu0  ;;  %v1598_v41 = vpop.f32.mrf.mxu1 }
 0x194   : > { %v1599_v42 = vadd.f32 %v1598_v41, %v7869_v39 }
 0x196   : > { %v1606_v43 = vsel %vm1602_vm1, %v1599_v42, -inf  ;;  %v1033_v13 = vpop.f32.mrf.mxu3 }
 0x197   : > { %1607 = vmax.xlane.f32.xlu1 %v1606_v43  ;;  %v1034_v16 = vadd.f32 %v1033_v13, %v815_v11  ;;  %v1336_v43 = vperm.slane %v7833_v53, 2 }
 0x198   : > { %v7889_v6 = vpop.f32.mrf.mxu2 }
 0x19b   : > { %v1600_v44 = vpop.f32.mrf.mxu1  ;;  %v1700_v45 = vpop.f32.mrf.mxu0 }
 0x19c   : > { %v1701_v46 = vadd.f32 %v1700_v45, %v7865_v34  ;;  %v1337_v44 = vperm.slane %v7833_v53, 3 }
 0x19e   : > { %v1723_v47 = vsel %vm1602_vm1, %v1701_v46, -inf }
 0x19f   : > { %1724 = vmax.xlane.f32.xlu0 %v1723_v47 }
 0x1a0   : > { %v1019_v12 = vpop.f32.mrf.mxu2 }
 0x1a1   : > { %v1020_v15 = vadd.f32 %v1019_v12, %v814_v10 }
 0x1a3   : > { %v1702_v48 = vpop.f32.mrf.mxu0  ;;  %v1719_v49 = vpop.f32.mrf.mxu1  ;;  %v7905_v17 = vpack.c.bf16 %v1034_v16, %v1020_v15  ;;  %v6712_v16 = vld [vmem:[%s7894_s23 + $0x78] sm:$0xff] }
 0x1a4   : > { %v7885_v4 = vadd.f32 %v1719_v49, %v7869_v39  ;;  %1854 = vmatpush.bf16.msrb.mxu0 %v6712_v16 }
 0x1a6   : > { %v1726_v5 = vsel %vm1602_vm1, %v7885_v4, -inf }
 0x1a8   : > { %1855 = vmatpush.bf16.msrb.mxu0 %v6711_v29  ;;  %v6718_v29 = vld [vmem:[%s7894_s23 + $0xa8] sm:$0xff] }
 0x1ab   : > { %v1721_v50 = vpop.f32.mrf.mxu1 }
 0x1b1   : > { %v1292_v23 = vpop.f32.mrf.mxu3 }
 0x1b2   : > { %v1293_v27 = vadd.f32 %v1292_v23, %v1076_v21  ;;  %v6709_v23 = vld [vmem:[%s7894_s23 + $0x60] sm:$0xff] }
 0x1b8   : > { %v1278_v22 = vpop.f32.mrf.mxu2 }
 0x1b9   : > { %v1279_v24 = vadd.f32 %v1278_v22, %v1075_v20  ;;  %v1294_v36 = vpop.f32.mrf.mxu3 }
 0x1bb   : > { %v1563_v30 = vpack.c.bf16 %v1293_v27, %v1279_v24 }
 0x1bd   : > { %1937 = vmatpush.bf16.xpose.msra.mxu2 %v1563_v30  ;;  %v2103_v33 = vrot.slane %v1563_v30, 4  ;;  %v6708_v30 = vld [vmem:[%s7894_s23 + $0x58] sm:$0xff] }
 0x1c0   : > { %v1280_v35 = vpop.f32.mrf.mxu2 }
 0x1c1   : > { %v1281_v50 = vadd.f32 %v1280_v35, %v1075_v20 }
 0x1d8   : > { %v1539_v45 = vpop.f32.mrf.mxu2 }
 0x1d9   : > { %v1540_v48 = vadd.f32 %v1539_v45, %v1336_v43 }
 0x1e0   : > { %v1541_v12 = vpop.f32.mrf.mxu2 }
 0x1e1   : > { %v1542_v14 = vadd.f32 %v1541_v12, %v1336_v43 }
 0x202   : > { %v1605_v51 = vpop.xlane.xlu1 %1604 }
 0x203   : > { %v1609_v52 = vsub.f32 %v1586_v37, %v1605_v51  ;;  %v6697_v37 = vld [vmem:[%s7894_s23] sm:$0xff]  ;;  %v1295_v51 = vadd.f32 %v1294_v36, %v1076_v21 }
 0x204   : > { %1923 = vmatpush.bf16.msrb.mxu1 %v6697_v37 }
 0x205   : > { %v1611_v54 = vmul.f32 1.442695, %v1609_v52  ;;  %v1565_v53 = vpack.c.bf16 %v1295_v51, %v1281_v50 }
 0x207   : > { %7094 = vpow2.f32 %v1611_v54 }
 0x208   : > { %2112 = vmatpush.bf16.xpose.msra.mxu1 %v2103_v33  ;;  %v6707_v33 = vld [vmem:[%s7894_s23 + $0x50] sm:$0xff] }
 0x20a   : > { %v1608_v55 = vpop.xlane.xlu1 %1607 }
 0x20b   : > { %v1610_v56 = vsub.f32 %v1599_v42, %v1608_v55  ;;  %v1774_v42 = vsel %vm1630_vm0, %v1769_v62, 0 }
 0x20d   : > { %v7095_v57 = vpop.eup %7094  ;;  %v1613_v58 = vmul.f32 1.442695, %v1610_v56 }
 0x20e   : > { %v1615_v59 = vsel %vm1602_vm1, %v7095_v57, 0.0 }
 0x20f   : > { %7096 = vpow2.f32 %v1613_v58  ;;  %1616 = vadd.xlane.f32.xlu2 %v1615_v59 }
 0x212   : > { %v1725_v60 = vpop.xlane.xlu0 %1724 }
 0x213   : > { %v1729_v61 = vsub.f32 %v1701_v46, %v1725_v60  ;;  %v1553_v46 = vpop.f32.mrf.mxu3 }
 0x214   : > { %v1554_v49 = vadd.f32 %v1553_v46, %v1337_v44 }
 0x215   : > { %v7876_v63 = vpop.eup %7096  ;;  %v1731_v0 = vmul.f32 1.442695, %v1729_v61 }
 0x216   : > { %v1618_v1 = vsel %vm1602_vm1, %v7876_v63, 0.0  ;;  %v7920_v54 = vpack.c.bf16 %v1554_v49, %v1540_v48 }
 0x217   : > { %7098 = vpow2.f32 %v1731_v0  ;;  %1619 = vadd.xlane.f32.xlu2 %v1618_v1 }
 0x218   : > { %v1984_v61 = vsel %vm1630_vm0, %v7920_v54, 0  ;;  %v2162_v37 = vrot.slane %v7920_v54, 4 }
 0x21a   : > { %v2167_v62 = vsel %vm1630_vm0, %v2162_v37, 0 }
 0x21b   : > { %v1555_v8 = vpop.f32.mrf.mxu3 }
 0x21c   : > { %v1556_v13 = vadd.f32 %v1555_v8, %v1337_v44 }
 0x21d   : > { %v7880_v2 = vpop.eup %7098 }
 0x21e   : > { %v1735_v3 = vsel %vm1602_vm1, %v7880_v2, 0.0 }
 0x21f   : > { %1736 = vadd.xlane.f32.xlu0 %v1735_v3  ;;  %v1032_v3 = vadd.f32 %v7891_v7, %v815_v11  ;;  %v6710_v7 = vld [vmem:[%s7894_s23 + $0x68] sm:$0xff] }
 0x220   : > { %1856 = vmatpush.bf16.msrb.mxu0 %v6710_v7 }
 0x224   : > { %1857 = vmatpush.bf16.msrb.mxu0 %v6709_v23 }
 0x227   : > { %1727 = vmax.xlane.f32.xlu0 %v1726_v5  ;;  %v2122_v5 = vrot.slane %v1565_v53, 4 }
 0x228   : > { %1858 = vmatpush.bf16.msrb.mxu0 %v6708_v30 }
 0x22c   : > { %1859 = vmatpush.bf16.msrb.mxu0 %v6707_v33 }
 0x282   : > { %v1617_v32 = vpop.xlane.xlu2 %1616 }
 0x283   : > { %7100 = vrcp.f32 %v1617_v32 }
 0x289   : > { %v7101_v38 = vpop.eup %7100 }
 0x28a   : > { %v1623_v26 = vmul.f32 %v7101_v38, %v7095_v57  ;;  %v1620_v41 = vpop.xlane.xlu2 %1619 }
 0x28b   : > { %7102 = vrcp.f32 %v1620_v41  ;;  %v6706_v41 = vld [vmem:[%s7894_s23 + $0x48] sm:$0xff] }
 0x28c   : > { %v1625_v40 = vpack.c.bf16 %v1623_v26, %v1623_v26  ;;  %1860 = vmatpush.bf16.msrb.mxu0 %v6706_v41 }
 0x28e   : > { %5427 = vmatmul.msk.bf16.vlgmr.msrb.gmra.mxu3 %vm1602_vm1, %v1625_v40 }
 0x28f   : > { %1783 = vmatpush.bf16.msrb.mxu3 %v1774_v42  ;;  %v6705_v42 = vld [vmem:[%s7894_s23 + $0x40] sm:$0xff] }
 0x290   : > { %1861 = vmatpush.bf16.msrb.mxu0 %v6705_v42 }
 0x291   : > { %v7103_v25 = vpop.eup %7102 }
 0x292   : > { %v1737_v47 = vpop.xlane.xlu0 %1736  ;;  %v1624_v52 = vmul.f32 %v7103_v25, %v7876_v63 }
 0x293   : > { %7104 = vrcp.f32 %v1737_v47 }
 0x294   : > { %v1626_v59 = vpack.c.bf16 %v1624_v52, %v1624_v52 }
 0x299   : > { %v7105_v55 = vpop.eup %7104 }
 0x29a   : > { %v1743_v56 = vmul.f32 %v7105_v55, %v7880_v2  ;;  %v1728_v57 = vpop.xlane.xlu0 %1727  ;;  %v1018_v2 = vadd.f32 %v7889_v6, %v814_v10  ;;  %v1569_v6 = vpack.c.bf16 %v1556_v13, %v1542_v14  ;;  %v2119_v14 = vrot.slane %v7905_v17, 4 }
 0x29b   : > { %v1730_v58 = vsub.f32 %v7885_v4, %v1728_v57 }
 0x29c   : > { %v1745_v60 = vpack.c.bf16 %v1743_v56, %v1743_v56  ;;  %v1559_v4 = vpack.c.bf16 %v1032_v3, %v1018_v2  ;;  %v2183_v10 = vrot.slane %v1569_v6, 4  ;;  %v2003_v28 = vsel %vm1630_vm0, %v1569_v6, 0 }
 0x29d   : > { %v1733_v0 = vmul.f32 1.442695, %v1730_v58 }
 0x29e   : > { %5428 = vmatmul.msk.bf16.vlgmr.msra.gmra.mxu3 %vm1602_vm1, %v1626_v59  ;;  %5430 = vmatmul.msk.bf16.vlgmr.msrb.gmra.mxu2 %vm1602_vm1, %v1745_v60  ;;  %v2188_v27 = vsel %vm1630_vm0, %v2183_v10, 0  ;;  %v2100_v36 = vrot.slane %v1559_v4, 4 }
 0x29f   : > { %7106 = vpow2.f32 %v1733_v0  ;;  %1950 = vmatpush.bf16.xpose.msra.mxu3 %v1565_v53  ;;  %1993 = vmatpush.bf16.msrb.mxu2 %v1984_v61 }
 0x2a5   : > { %v7107_v63 = vpop.eup %7106 }
 0x2a6   : > { %v1738_v1 = vsel %vm1602_vm1, %v7107_v63, 0.0 }
 0x2a7   : > { %1739 = vadd.xlane.f32.xlu2 %v1738_v1 }
 0x2ae   : > { %1938 = vmatmul.bf16.vlgmr.msra.gmra.mxu2 %v1559_v4 }
 0x2af   : > { %2131 = vmatpush.bf16.xpose.msra.mxu2 %v2122_v5 }
 0x311   : > { %v1643_v9 = vpop.f32.mrf.mxu3 }
 0x319   : > { %v1645_v15 = vpop.f32.mrf.mxu3 }
 0x31a   : > { %v1740_v18 = vpop.xlane.xlu2 %1739  ;;  %v6720_v15 = vld [vmem:[%s7894_s23 + $0xb8] sm:$0xff] }
 0x31b   : > { %7108 = vrcp.f32 %v1740_v18  ;;  %2083 = vmatpush.bf16.msra.mxu0 %v6720_v15  ;;  %v6719_v18 = vld [vmem:[%s7894_s23 + $0xb0] sm:$0xff] }
 0x31f   : > { %2084 = vmatpush.bf16.msra.mxu0 %v6719_v18 }
 0x321   : > { %v7109_v11 = vpop.eup %7108  ;;  %v1662_v19 = vpop.f32.mrf.mxu3 }
 0x322   : > { %v1764_v20 = vpop.f32.mrf.mxu2  ;;  %v1744_v21 = vmul.f32 %v7109_v11, %v7107_v63  ;;  %v1666_v22 = vpack.c.bf16 %v1662_v19, %v1643_v9  ;;  %v6717_v11 = vld [vmem:[%s7894_s23 + $0xa0] sm:$0xff] }
 0x323   : > { %2085 = vmatpush.bf16.msra.mxu0 %v6718_v29  ;;  %v6760_v29 = vld [vmem:[%s8003_s26 + $0x3bc] sm:$0xf0] }
 0x324   : > { %v1746_v24 = vpack.c.bf16 %v1744_v21, %v1744_v21  ;;  %1924 = vmatmul.bf16.vlgmr.msrb.gmra.mxu1 %v1666_v22  ;;  %v6715_v22 = vld [vmem:[%s7894_s23 + $0x90] sm:$0xff] }
 0x325   : > { %2197 = vmatpush.bf16.msrb.mxu1 %v2188_v27 }
 0x326   : > { %5431 = vmatmul.msk.bf16.vlgmr.msrb.gmra.mxu3 %vm1602_vm1, %v1746_v24  ;;  %v6714_v24 = vld [vmem:[%s7894_s23 + $0x88] sm:$0xff] }
 0x327   : > { %2012 = vmatpush.bf16.msrb.mxu3 %v2003_v28  ;;  %2086 = vmatpush.bf16.msra.mxu0 %v6717_v11  ;;  %v5689_v11 = vld [vmem:[%s8003_s26 + $0x388] sm:$0xf] }
 0x329   : > { %v1664_v31 = vpop.f32.mrf.mxu3 }
 0x32a   : > { %v1766_v32 = vpop.f32.mrf.mxu2 }
 0x332   : > { %v1939_v35 = vpop.f32.mrf.mxu2 }
 0x333   : > { %v1940_v38 = vadd.f32 %v1939_v35, %v7865_v34  ;;  %v6713_v35 = vld [vmem:[%s7894_s23 + $0x80] sm:$0xff] }
 0x334   : > { %2113 = vmatmul.bf16.vlgmr.msra.gmra.mxu1 %v2100_v36 }
 0x335   : > { %v1956_v26 = vsel %vm1602_vm1, %v1940_v38, -inf }
 0x336   : > { %1957 = vmax.xlane.f32.xlu1 %v1956_v26  ;;  %1951 = vmatmul.bf16.vlgmr.msra.gmra.mxu3 %v7905_v17  ;;  %v6716_v17 = vld [vmem:[%s7894_s23 + $0x98] sm:$0xff] }
 0x337   : > { %2176 = vmatpush.bf16.msra.mxu3 %v2167_v62  ;;  %2087 = vmatpush.bf16.msra.mxu0 %v6716_v17 }
 0x33a   : > { %v1941_v40 = vpop.f32.mrf.mxu2 }
 0x33b   : > { %2088 = vmatpush.bf16.msra.mxu0 %v6715_v22  ;;  %v5691_v22 = vld [vmem:[%s8003_s26 + $0x3c8] sm:$0xf0] }
 0x33f   : > { %2089 = vmatpush.bf16.msra.mxu0 %v6714_v24 }
 0x343   : > { %2090 = vmatpush.bf16.msra.mxu0 %v6713_v35  ;;  %v6757_v35 = vld [vmem:[%s8003_s26 + $0x344] sm:$0xf0] }
 0x3a1   : > { %v7951_v43 = vpop.f32.mrf.mxu1 }
 0x3a9   : > { %v1958_v44 = vpop.xlane.xlu1 %1957  ;;  %v1785_v46 = vpop.f32.mrf.mxu3 }
 0x3aa   : > { %v1962_v45 = vsub.f32 %v1940_v38, %v1958_v44  ;;  %v7953_v47 = vpop.f32.mrf.mxu1  ;;  %v1789_v48 = vpack.c.bf16 %v1785_v46, %v1764_v20  ;;  %v6727_v46 = vld [vmem:[%s7894_s23 + $0xf0] sm:$0xff] }
 0x3ac   : > { %v1964_v49 = vmul.f32 1.442695, %v1962_v45  ;;  %1862 = vmatmul.bf16.vlgmr.msrb.gmra.mxu0 %v1789_v48  ;;  %v6728_v45 = vld [vmem:[%s7894_s23 + $0xf8] sm:$0xff]  ;;  %v6726_v48 = vld [vmem:[%s7894_s23 + $0xe8] sm:$0xff] }
 0x3ae   : > { %7110 = vpow2.f32 %v1964_v49  ;;  %v6725_v49 = vld [vmem:[%s7894_s23 + $0xe0] sm:$0xff] }
 0x3b1   : > { %v1787_v25 = vpop.f32.mrf.mxu3 }
 0x3b2   : > { %v2114_v50 = vpop.f32.mrf.mxu1  ;;  %v6724_v25 = vld [vmem:[%s7894_s23 + $0xd8] sm:$0xff] }
 0x3b3   : > { %v2115_v51 = vadd.f32 %v2114_v50, %v7865_v34  ;;  %v6723_v50 = vld [vmem:[%s7894_s23 + $0xd0] sm:$0xff] }
 0x3b4   : > { %v7111_v52 = vpop.eup %7110 }
 0x3b5   : > { %v2137_v54 = vsel %vm1602_vm1, %v2115_v51, -inf  ;;  %v1968_v55 = vsel %vm1602_vm1, %v7111_v52, 0.0 }
 0x3b6   : > { %2138 = vmax.xlane.f32.xlu2 %v2137_v54  ;;  %1969 = vadd.xlane.f32.xlu0 %v1968_v55 }
 0x3b9   : > { %v1952_v56 = vpop.f32.mrf.mxu3 }
 0x3ba   : > { %v2116_v57 = vpop.f32.mrf.mxu1  ;;  %v1953_v58 = vadd.f32 %v1952_v56, %v7869_v39 }
 0x3bb   : > { %v6721_v57 = vld [vmem:[%s7894_s23 + $0xc0] sm:$0xff] }
 0x3bc   : > { %v1959_v53 = vsel %vm1602_vm1, %v1953_v58, -inf }
 0x3bd   : > { %1960 = vmax.xlane.f32.xlu1 %v1959_v53 }
 0x3c1   : > { %v1954_v59 = vpop.f32.mrf.mxu3 }
 0x429   : > { %v2139_v60 = vpop.xlane.xlu2 %2138  ;;  %v1970_v61 = vpop.xlane.xlu0 %1969 }
 0x42a   : > { %v2143_v0 = vsub.f32 %v2115_v51, %v2139_v60  ;;  %7112 = vrcp.f32 %v1970_v61  ;;  %v1863_v60 = vpop.f32.mrf.mxu0 }
 0x42c   : > { %v2145_v34 = vmul.f32 1.442695, %v2143_v0 }
 0x42e   : > { %7114 = vpow2.f32 %v2145_v34  ;;  %v1926_v34 = vadd.f32 %v7951_v43, %v1863_v60 }
 0x430   : > { %v7113_v63 = vpop.eup %7112  ;;  %v1961_v2 = vpop.xlane.xlu1 %1960 }
 0x431   : > { %v1976_v1 = vmul.f32 %v7113_v63, %v7111_v52  ;;  %v1963_v3 = vsub.f32 %v1953_v58, %v1961_v2  ;;  %v6722_v52 = vld [vmem:[%s7894_s23 + $0xc8] sm:$0xff]  ;;  %s5566_s23 = sshll.u32 %s7381_s0, 4 }
 0x432   : > { %v1865_v61 = vpop.f32.mrf.mxu0 }
 0x433   : > { %v1978_v4 = vpack.c.bf16 %v1976_v1, %v1976_v1  ;;  %v1966_v8 = vmul.f32 1.442695, %v1963_v3  ;;  %v7088_v1 = vld [vmem:[%s2284_s28] ss:$0 sm:$0xff]  ;;  %s8626_s28 = sld [smem:[#allocation27_spill]] }
 0x434   : > { %v7115_v5 = vpop.eup %7114 }
 0x435   : > { %5496 = vmatmul.msk.bf16.vlgmr.msrb.gmra.mxu2 %vm1602_vm1, %v1978_v4  ;;  %v2149_v9 = vsel %vm1602_vm1, %v7115_v5, 0.0  ;;  %7116 = vpow2.f32 %v1966_v8  ;;  %v2291_v4 = vld [vmem:[#allocation2] sm:$0xff] }
 0x436   : > { %2150 = vadd.xlane.f32.xlu2 %v2149_v9  ;;  %2268 = vmatpush.bf16.msrb.mxu2 %v6728_v45  ;;  %v1928_v9 = vadd.f32 %v7953_v47, %v1865_v61  ;;  %v5681_v47 = vld [vmem:[%s8003_s26 + $0x380] sm:$0xf] }
 0x439   : > { %s8276_s2 = scalar_lea.vmem %s8626_s28, %s5566_s23 }
 0x43a   : > { %2269 = vmatpush.bf16.msrb.mxu2 %v6727_v46 }
 0x43b   : > { %v7117_v12 = vpop.eup %7116 }
 0x43c   : > { %v1971_v13 = vsel %vm1602_vm1, %v7117_v12, 0.0 }
 0x43d   : > { %1972 = vadd.xlane.f32.xlu1 %v1971_v13 }
 0x43e   : > { %2270 = vmatpush.bf16.msrb.mxu2 %v6726_v48 }
 0x442   : > { %2271 = vmatpush.bf16.msrb.mxu2 %v6725_v49 }
 0x445   : > { %2132 = vmatmul.bf16.vlgmr.msra.gmra.mxu2 %v2119_v14 }
 0x446   : > { %2272 = vmatpush.bf16.msrb.mxu2 %v6724_v25 }
 0x44a   : > { %2273 = vmatpush.bf16.msrb.mxu2 %v6723_v50 }
 0x44e   : > { %2274 = vmatpush.bf16.msrb.mxu2 %v6722_v52 }
 0x452   : > { %2275 = vmatpush.bf16.msrb.mxu2 %v6721_v57 }
 0x4a9   : > { %v2151_v19 = vpop.xlane.xlu2 %2150 }
 0x4b0   : > { %v1973_v16 = vpop.xlane.xlu1 %1972 }
 0x4b1   : > { %7118 = vrcp.f32 %v1973_v16  ;;  %v2292_v16 = vld [vmem:[#allocation2 + $0x8] sm:$0xff] }
 0x4b2   : > { %7120 = vrcp.f32 %v2151_v19  ;;  %v6761_v19 = vld [vmem:[%s8003_s26 + $0x3c4] sm:$0xf0] }
 0x4b3   : > { %v5690_v17 = vor.u32 %v6761_v19, %v5689_v11 }
 0x4b5   : > { %2587 = vmatpush.bf16.msra.mxu1 %v5690_v17  ;;  %v5627_v17 = vld [vmem:[%s8003_s26 + $0x1c8] sm:$0xf0] }
 0x4b7   : > { %v7119_v6 = vpop.eup %7118 }
 0x4b8   : > { %v1995_v7 = vpop.f32.mrf.mxu2  ;;  %v1977_v10 = vmul.f32 %v7119_v6, %v7117_v12  ;;  %v7121_v23 = vpop.eup %7120  ;;  %v6758_v6 = vld [vmem:[%s8003_s26 + $0x384] sm:$0xf] }
 0x4b9   : > { %v2157_v27 = vmul.f32 %v7121_v23, %v7115_v5  ;;  %v5665_v23 = vld [vmem:[%s8003_s26 + $0x300] sm:$0xf] }
 0x4ba   : > { %v1979_v20 = vpack.c.bf16 %v1977_v10, %v1977_v10  ;;  %v5683_v10 = vld [vmem:[%s8003_s26 + $0x3c0] sm:$0xf0] }
 0x4bb   : > { %v2159_v31 = vpack.c.bf16 %v2157_v27, %v2157_v27  ;;  %v6756_v27 = vld [vmem:[%s8003_s26 + $0x33c] sm:$0xf0] }
 0x4bc   : > { %5497 = vmatmul.msk.bf16.vlgmr.msrb.gmra.mxu3 %vm1602_vm1, %v1979_v20  ;;  %v5686_v20 = vor.u32 %v6758_v6, %v5683_v10  ;;  %v5619_v6 = vld [vmem:[%s8003_s26 + $0x1c0] sm:$0xf0]  ;;  %v6745_v10 = vld [vmem:[%s8003_s26 + $0x1c4] sm:$0xf0] }
 0x4be   : > { %2573 = vmatpush.bf16.msrb.mxu0 %v5686_v20  ;;  %v6743_v20 = vld [vmem:[%s8003_s26 + $0x18c] sm:$0xf] }
 0x4c0   : > { %v1997_v21 = vpop.f32.mrf.mxu2 }
 0x4c1   : > { %v6759_v21 = vld [vmem:[%s8003_s26 + $0x38c] sm:$0xf] }
 0x4c2   : > { %v5694_v24 = vor.u32 %v6759_v21, %v5691_v22  ;;  %v5630_v21 = vor.u32 %v6743_v20, %v5627_v17  ;;  %v5601_v22 = vld [vmem:[%s8003_s26 + $0x100] sm:$0xf] }
 0x4c4   : > { %2601 = vmatpush.bf16.msra.mxu2 %v5694_v24  ;;  %v6738_v24 = vld [vmem:[%s8003_s26 + $0x104] sm:$0xf] }
 0x4c8   : > { %v2133_v28 = vpop.f32.mrf.mxu2 }
 0x4c9   : > { %v2134_v30 = vadd.f32 %v2133_v28, %v7869_v39  ;;  %v6754_v28 = vld [vmem:[%s8003_s26 + $0x304] sm:$0xf] }
 0x4cb   : > { %v2140_v32 = vsel %vm1602_vm1, %v2134_v30, -inf }
 0x4cc   : > { %2141 = vmax.xlane.f32.xlu0 %v2140_v32  ;;  %5530 = vmatmul.msk.bf16.vlgmr.msra.gmra.mxu3 %vm1602_vm1, %v2159_v31  ;;  %v5666_v31 = vor.u32 %v6756_v27, %v5665_v23  ;;  %v6740_v23 = vld [vmem:[%s8003_s26 + $0x13c] sm:$0xf0] }
 0x4cd   : > { %v5602_v27 = vor.u32 %v6740_v23, %v5601_v22  ;;  %v6817_v22 = vld [vmem:[%s8003_s26 + $0x2cc] sm:$0xf0]  ;;  %v6815_v23 = vld [vmem:[%s8003_s26 + $0x294] sm:$0xf] }
 0x4d0   : > { %v2135_v33 = vpop.f32.mrf.mxu2 }
 0x4d1   : > { %v5673_v33 = vld [vmem:[%s8003_s26 + $0x308] sm:$0xf] }
 0x53f   : > { %v2142_v36 = vpop.xlane.xlu0 %2141  ;;  %v2014_v38 = vpop.f32.mrf.mxu3 }
 0x540   : > { %v2144_v37 = vsub.f32 %v2134_v30, %v2142_v36  ;;  %v2018_v26 = vpack.c.bf16 %v2014_v38, %v1995_v7  ;;  %v5682_v7 = vor.u32 %v6760_v29, %v5681_v47  ;;  %v5667_v30 = vld [vmem:[%s8003_s26 + $0x340] sm:$0xf0]  ;;  %v6755_v36 = vld [vmem:[%s8003_s26 + $0x30c] sm:$0xf] }
 0x541   : > { %v5670_v32 = vor.u32 %v6754_v28, %v5667_v30  ;;  %v5675_v38 = vld [vmem:[%s8003_s26 + $0x348] sm:$0xf0]  ;;  %v6742_v47 = vld [vmem:[%s8003_s26 + $0x184] sm:$0xf]  ;;  %v5609_v30 = vld [vmem:[%s8003_s26 + $0x108] sm:$0xf] }
 0x542   : > { %v2147_v62 = vmul.f32 1.442695, %v2144_v37  ;;  %2091 = vmatmul.bf16.vlgmr.msra.gmra.mxu0 %v2018_v26  ;;  %2559 = vmatpush.bf16.msrb.mxu3 %v5682_v7  ;;  %v5674_v37 = vor.u32 %v6757_v35, %v5673_v33  ;;  %v5678_v26 = vor.u32 %v6755_v36, %v5675_v38  ;;  %v5625_v7 = vld [vmem:[%s8003_s26 + $0x188] sm:$0xf]  ;;  %v5622_v11 = vor.u32 %v6742_v47, %v5619_v6  ;;  %v5603_v28 = vld [vmem:[%s8003_s26 + $0x140] sm:$0xf0] }
 0x543   : > { %2574 = vmatpush.bf16.msrb.mxu0 %v5670_v32  ;;  %v5626_v19 = vor.u32 %v6745_v10, %v5625_v7  ;;  %v5606_v32 = vor.u32 %v6738_v24, %v5603_v28  ;;  %v6739_v35 = vld [vmem:[%s8003_s26 + $0x10c] sm:$0xf]  ;;  %v5585_v38 = vld [vmem:[%s8003_s26 + $0x80] sm:$0xf]  ;;  %v6819_v47 = vld [vmem:[%s8003_s26 + $0x314] sm:$0xf] }
 0x544   : > { %7122 = vpow2.f32 %v2147_v62  ;;  %v759_v62 = vlaneseq  ;;  %2588 = vmatpush.bf16.msra.mxu1 %v5674_v37  ;;  %2602 = vmatpush.bf16.msra.mxu2 %v5678_v26  ;;  %v5611_v36 = vld [vmem:[%s8003_s26 + $0x148] sm:$0xf0]  ;;  %v6736_v26 = vld [vmem:[%s8003_s26 + $0xbc] sm:$0xf0]  ;;  %v5802_v6 = vld [vmem:[%s8003_s26 + $0x318] sm:$0xf] }
 0x545   : > { %v5614_v37 = vor.u32 %v6739_v35, %v5611_v36  ;;  %v6822_v10 = vld [vmem:[%s8003_s26 + $0x354] sm:$0xf0]  ;;  %v6816_v35 = vld [vmem:[%s8003_s26 + $0x29c] sm:$0xf] }
 0x546   : > { %2560 = vmatpush.bf16.msrb.mxu3 %v5666_v31  ;;  %v6741_v31 = vld [vmem:[%s8003_s26 + $0x144] sm:$0xf0]  ;;  %v5803_v20 = vor.u32 %v6822_v10, %v5802_v6  ;;  %v5786_v28 = vld [vmem:[%s8003_s26 + $0x298] sm:$0xf]  ;;  %v5788_v36 = vld [vmem:[%s8003_s26 + $0x2d8] sm:$0xf0] }
 0x547   : > { %v2016_v39 = vpop.f32.mrf.mxu3  ;;  %v5610_v33 = vor.u32 %v6741_v31, %v5609_v30  ;;  %v6818_v30 = vld [vmem:[%s8003_s26 + $0x2d4] sm:$0xf0]  ;;  %v6801_v10 = vld [vmem:[%s8003_s26 + $0xcc] sm:$0xf0] }
 0x548   : > { %v760_v39 = vand.u32 127, %v759_v62  ;;  %v6734_v62 = vld [vmem:[%s8003_s26 + $0x84] sm:$0xf] }
 0x54a   : > { %v7123_v40 = vpop.eup %7122  ;;  %vm761_vm2 = vcmp.lt.s32.totalorder %v760_v39, 32  ;;  %v5586_v39 = vor.u32 %v6736_v26, %v5585_v38  ;;  %v5791_v38 = vor.u32 %v6816_v35, %v5788_v36  ;;  %v5762_v26 = vld [vmem:[%s8003_s26 + $0x210] sm:$0xf]  ;;  %v6795_v35 = vld [vmem:[%s8003_s26 + $0x14] sm:$0xf] }
 0x54b   : > { %v2152_v41 = vsel %vm1602_vm1, %v7123_v40, 0.0  ;;  %v5700_v36 = vld [vmem:[%s8003_s26 + $0x50] sm:$0xf0] }
 0x54c   : > { %2153 = vadd.xlane.f32.xlu0 %v2152_v41 }
 0x54f   : > { %v2178_v42 = vpop.f32.mrf.mxu3 }
 0x557   : > { %v2180_v44 = vpop.f32.mrf.mxu3 }
 0x558   : > { %v7402_v44 = vmov 0.0  }
 0x559   : > { %v8023_v45 = vsel %vm761_vm2, 1.0, %v7402_v44  ;;  %v6737_v44 = vld [vmem:[%s8003_s26 + $0xc4] sm:$0xf0] }
 0x5bf   : > { %v2154_v51 = vpop.xlane.xlu0 %2153  ;;  %v2092_v0 = vpop.f32.mrf.mxu0 }
 0x5c0   : > { %7124 = vrcp.f32 %v2154_v51  ;;  %v2097_v63 = vadd.f32 %v2092_v0, %v1926_v34  ;;  %v6751_v0 = vld [vmem:[%s8003_s26 + $0x28c] sm:$0xf] }
 0x5c1   : > { %v5659_v34 = vld [vmem:[%s8003_s26 + $0x2c8] sm:$0xf0] }
 0x5c6   : > { %v7125_v54 = vpop.eup %7124 }
 0x5c7   : > { %v2158_v55 = vmul.f32 %v7125_v54, %v7123_v40  ;;  %v2094_v8 = vpop.f32.mrf.mxu0  ;;  %v5649_v54 = vld [vmem:[%s8003_s26 + $0x280] sm:$0xf] }
 0x5c8   : > { %v2098_v13 = vadd.f32 %v2094_v8, %v1928_v9  ;;  %v5641_v8 = vld [vmem:[%s8003_s26 + $0x208] sm:$0xf] }
 0x5c9   : > { %v2160_v56 = vpack.c.bf16 %v2158_v55, %v2158_v55  ;;  %v6752_v55 = vld [vmem:[%s8003_s26 + $0x2bc] sm:$0xf0]  ;;  %v6749_v9 = vld [vmem:[%s8003_s26 + $0x244] sm:$0xf0] }
 0x5ca   : > { %v5650_v57 = vor.u32 %v6752_v55, %v5649_v54  ;;  %v6732_v54 = vld [vmem:[%s8003_s26 + $0x3c] sm:$0xf0]  ;;  %v6730_v55 = vld [vmem:[%s8003_s26 + $0x4] sm:$0xf] }
 0x5cb   : > { %5531 = vmatmul.msk.bf16.vlgmr.msrb.gmra.mxu1 %vm1602_vm1, %v2160_v56  ;;  %v6750_v56 = vld [vmem:[%s8003_s26 + $0x284] sm:$0xf] }
 0x5cc   : > { %2561 = vmatpush.bf16.msrb.mxu3 %v5650_v57  ;;  %v5571_v57 = vld [vmem:[%s8003_s26 + $0x40] sm:$0xf0] }
 0x648   : > { %v2199_v58 = vpop.f32.mrf.mxu1 }
 0x649   : > { %v2203_v53 = vpack.c.bf16 %v2199_v58, %v2178_v42  ;;  %v5651_v58 = vld [vmem:[%s8003_s26 + $0x2c0] sm:$0xf0] }
 0x64a   : > { %v5654_v60 = vor.u32 %v6750_v56, %v5651_v58  ;;  %v5577_v58 = vld [vmem:[%s8003_s26 + $0x8] sm:$0xf] }
 0x64b   : > { %2276 = vmatmul.bf16.vlgmr.msrb.gmra.mxu2 %v2203_v53  ;;  %v5657_v53 = vld [vmem:[%s8003_s26 + $0x288] sm:$0xf] }
 0x64c   : > { %2575 = vmatpush.bf16.msrb.mxu0 %v5654_v60 }
 0x650   : > { %v2201_v59 = vpop.f32.mrf.mxu1 }
 0x651   : > { %v6753_v59 = vld [vmem:[%s8003_s26 + $0x2c4] sm:$0xf0] }
 0x652   : > { %v5658_v61 = vor.u32 %v6753_v59, %v5657_v53  ;;  %v6733_v53 = vld [vmem:[%s8003_s26 + $0x44] sm:$0xf0]  ;;  %v5574_v59 = vor.u32 %v6730_v55, %v5571_v57  ;;  %v5746_v55 = vld [vmem:[%s8003_s26 + $0x190] sm:$0xf]  ;;  %v6807_v57 = vld [vmem:[%s8003_s26 + $0x194] sm:$0xf] }
 0x653   : > { %v5578_v60 = vor.u32 %v6733_v53, %v5577_v58  ;;  %v5748_v53 = vld [vmem:[%s8003_s26 + $0x1d0] sm:$0xf0] }
 0x654   : > { %2589 = vmatpush.bf16.msra.mxu1 %v5658_v61  ;;  %v6731_v61 = vld [vmem:[%s8003_s26 + $0xc] sm:$0xf] }
 0x6ce   : > { %v2277_v2 = vpop.f32.mrf.mxu2 }
 0x6cf   : > { %v2282_v3 = vadd.f32 %v2277_v2, %v2097_v63  ;;  %v5662_v63 = vor.u32 %v6751_v0, %v5659_v34  ;;  %v6748_v2 = vld [vmem:[%s8003_s26 + $0x23c] sm:$0xf0]  ;;  %v5579_v0 = vld [vmem:[%s8003_s26 + $0x48] sm:$0xf0]  ;;  %v5810_v34 = vld [vmem:[%s8003_s26 + $0x390] sm:$0xf] }
 0x6d1   : > { %v2289_v5 = vadd.f32 %v7088_v1, %v2282_v3  ;;  %v6746_v3 = vld [vmem:[%s8003_s26 + $0x204] sm:$0xf]  ;;  %2603 = vmatpush.bf16.msra.mxu2 %v5662_v63  ;;  %v5582_v63 = vor.u32 %v6731_v61, %v5579_v0  ;;  %v5751_v0 = vor.u32 %v6807_v57, %v5748_v53 }
 0x6d3   : > { %v2293_v12 = vadd.f32 %v2291_v4, %v2289_v5  ;;  %v5635_v5 = vld [vmem:[%s8003_s26 + $0x240] sm:$0xf0] }
 0x6d5   : > { %2299 = vadd.xlane.f32.xlu1 %v2293_v12 }
 0x6d6   : > { %v2279_v14 = vpop.f32.mrf.mxu2 }
 0x6d7   : > { %v2283_v15 = vadd.f32 %v2279_v14, %v2098_v13  ;;  %v5642_v13 = vor.u32 %v6749_v9, %v5641_v8  ;;  %v6747_v14 = vld [vmem:[%s8003_s26 + $0x20c] sm:$0xf]  ;;  %v5818_v8 = vld [vmem:[%s8003_s26 + $0x398] sm:$0xf] }
 0x6d8   : > { %v6826_v9 = vld [vmem:[%s8003_s26 + $0x3d4] sm:$0xf0] }
 0x6d9   : > { %v2290_v43 = vadd.f32 %v7088_v1, %v2283_v15  ;;  %v5633_v1 = vld [vmem:[%s8003_s26 + $0x200] sm:$0xf]  ;;  %v5643_v15 = vld [vmem:[%s8003_s26 + $0x248] sm:$0xf0]  ;;  %2590 = vmatpush.bf16.msra.mxu1 %v5642_v13  ;;  %v5819_v13 = vor.u32 %v6826_v9, %v5818_v8  ;;  %v6803_v8 = vld [vmem:[%s8003_s26 + $0x114] sm:$0xf] }
 0x6da   : > { %v5634_v4 = vor.u32 %v6748_v2, %v5633_v1  ;;  %v6825_v1 = vld [vmem:[%s8003_s26 + $0x3cc] sm:$0xf0]  ;;  %v6823_v2 = vld [vmem:[%s8003_s26 + $0x394] sm:$0xf] }
 0x6db   : > { %v2294_v18 = vadd.f32 %v2292_v16, %v2290_v43  ;;  %v5646_v16 = vor.u32 %v6747_v14, %v5643_v15  ;;  %v5617_v43 = vld [vmem:[%s8003_s26 + $0x180] sm:$0xf]  ;;  %v5820_v14 = vld [vmem:[%s8003_s26 + $0x3d8] sm:$0xf0]  ;;  %v5794_v15 = vld [vmem:[%s8003_s26 + $0x310] sm:$0xf] }
 0x6dc   : > { %2562 = vmatpush.bf16.msrb.mxu3 %v5634_v4  ;;  %v5811_v4 = vor.u32 %v6825_v1, %v5810_v34  ;;  %v5756_v1 = vld [vmem:[%s8003_s26 + $0x1d8] sm:$0xf0]  ;;  %v5732_v9 = vld [vmem:[%s8003_s26 + $0x150] sm:$0xf0] }
 0x6dd   : > { %2301 = vadd.xlane.f32.xlu2 %v2294_v18  ;;  %2604 = vmatpush.bf16.msra.mxu2 %v5646_v16  ;;  %v6821_v16 = vld [vmem:[%s8003_s26 + $0x34c] sm:$0xf0] }
 0x6de   : > { %2591 = vmatpush.bf16.msra.mxu1 %v5626_v19  ;;  %v5804_v19 = vld [vmem:[%s8003_s26 + $0x358] sm:$0xf0] }
 0x6e1   : > { %2605 = vmatpush.bf16.msra.mxu2 %v5630_v21  ;;  %v5778_v21 = vld [vmem:[%s8003_s26 + $0x290] sm:$0xf] }
 0x6e2   : > { %2592 = vmatpush.bf16.msra.mxu1 %v5610_v33  ;;  %v5779_v24 = vor.u32 %v6817_v22, %v5778_v21  ;;  %v5787_v33 = vor.u32 %v6818_v30, %v5786_v28  ;;  %v6802_v22 = vld [vmem:[%s8003_s26 + $0xd4] sm:$0xf0]  ;;  %v5698_v30 = vld [vmem:[%s8003_s26 + $0x10] sm:$0xf] }
 0x6e5   : > { %2606 = vmatpush.bf16.msra.mxu2 %v5614_v37 }
 0x748   : > { %v2300_v40 = vpop.xlane.xlu1 %2299 }
 0x749   : > { %v2303_v41 = vmul.f32 0.03125, %v2300_v40  ;;  %v5587_v40 = vld [vmem:[%s8003_s26 + $0xc0] sm:$0xf0] }
 0x74b   : > { %v8021_v42 = vsub.f32 %v2293_v12, %v2303_v41  ;;  %v5638_v12 = vor.u32 %v6746_v3, %v5635_v5  ;;  %v5593_v41 = vld [vmem:[%s8003_s26 + $0x88] sm:$0xf]  ;;  %v5812_v3 = vld [vmem:[%s8003_s26 + $0x3d0] sm:$0xf0] }
 0x74c   : > { %v5815_v5 = vor.u32 %v6823_v2, %v5812_v3  ;;  %v5730_v2 = vld [vmem:[%s8003_s26 + $0x110] sm:$0xf] }
 0x74d   : > { %v2307_v46 = vmul.f32 %v8021_v42, %v8021_v42  ;;  %2576 = vmatpush.bf16.msrb.mxu0 %v5638_v12  ;;  %v6824_v12 = vld [vmem:[%s8003_s26 + $0x39c] sm:$0xf] }
 0x74f   : > { %v2309_v48 = vmul.f32 %v8023_v45, %v2307_v46  ;;  %v5590_v46 = vor.u32 %v6734_v62, %v5587_v40  ;;  %v6813_v62 = vld [vmem:[%s8003_s26 + $0x24c] sm:$0xf0] }
 0x750   : > { %v2302_v49 = vpop.xlane.xlu2 %2301 }
 0x751   : > { %v2304_v25 = vmul.f32 0.03125, %v2302_v49  ;;  %2311 = vadd.xlane.f32.xlu0 %v2309_v48  ;;  %2577 = vmatpush.bf16.msrb.mxu0 %v5622_v11  ;;  %v5594_v48 = vor.u32 %v6737_v44, %v5593_v41  ;;  %v6735_v49 = vld [vmem:[%s8003_s26 + $0x8c] sm:$0xf]  ;;  %v6820_v11 = vld [vmem:[%s8003_s26 + $0x31c] sm:$0xf]  ;;  %v5763_v41 = vor.u32 %v6813_v62, %v5762_v26 }
 0x752   : > { %v5807_v17 = vor.u32 %v6820_v11, %v5804_v19  ;;  %v5764_v44 = vld [vmem:[%s8003_s26 + $0x250] sm:$0xf0]  ;;  %v6798_v26 = vld [vmem:[%s8003_s26 + $0x54] sm:$0xf0] }
 0x753   : > { %v8028_v50 = vsub.f32 %v2294_v18, %v2304_v25  ;;  %v6744_v18 = vld [vmem:[%s8003_s26 + $0x1bc] sm:$0xf0]  ;;  %v5595_v25 = vld [vmem:[%s8003_s26 + $0xc8] sm:$0xf0]  ;;  %2593 = vmatpush.bf16.msra.mxu1 %v5594_v48  ;;  %v6799_v11 = vld [vmem:[%s8003_s26 + $0x94] sm:$0xf] }
 0x754   : > { %v5618_v29 = vor.u32 %v6744_v18, %v5617_v43  ;;  %v5823_v43 = vor.u32 %v6824_v12, %v5820_v14  ;;  %v5795_v18 = vor.u32 %v6821_v16, %v5794_v15  ;;  %v5738_v12 = vld [vmem:[%s8003_s26 + $0x118] sm:$0xf] }
 0x755   : > { %v2308_v51 = vmul.f32 %v8028_v50, %v8028_v50  ;;  %2578 = vmatpush.bf16.msrb.mxu0 %v5606_v32 }
 0x756   : > { %2563 = vmatpush.bf16.msrb.mxu3 %v5618_v29  ;;  %v5796_v29 = vld [vmem:[%s8003_s26 + $0x350] sm:$0xf0] }
 0x757   : > { %v2310_v52 = vmul.f32 %v8023_v45, %v2308_v51  ;;  %v5598_v51 = vor.u32 %v6735_v49, %v5595_v25  ;;  %2594 = vmatpush.bf16.msra.mxu1 %v5578_v60  ;;  %v5799_v7 = vor.u32 %v6819_v47, %v5796_v29  ;;  %v6814_v49 = vld [vmem:[%s8003_s26 + $0x254] sm:$0xf0]  ;;  %v6812_v25 = vld [vmem:[%s8003_s26 + $0x21c] sm:$0xf] }
 0x758   : > { %v6810_v60 = vld [vmem:[%s8003_s26 + $0x1d4] sm:$0xf0]  ;;  %v5740_v47 = vld [vmem:[%s8003_s26 + $0x158] sm:$0xf0] }
 0x759   : > { %2313 = vadd.xlane.f32.xlu1 %v2310_v52  ;;  %2579 = vmatpush.bf16.msrb.mxu0 %v5590_v46  ;;  %v5569_v52 = vld [vmem:[%s8003_s26] sm:$0xf]  ;;  %v5770_v46 = vld [vmem:[%s8003_s26 + $0x218] sm:$0xf] }
 0x75a   : > { %2564 = vmatpush.bf16.msrb.mxu3 %v5602_v27  ;;  %2607 = vmatpush.bf16.msra.mxu2 %v5598_v51  ;;  %v5570_v56 = vor.u32 %v6732_v54, %v5569_v52  ;;  %v5780_v27 = vld [vmem:[%s8003_s26 + $0x2d0] sm:$0xf0]  ;;  %v5772_v51 = vld [vmem:[%s8003_s26 + $0x258] sm:$0xf0]  ;;  %v5771_v52 = vor.u32 %v6814_v49, %v5770_v46 }
 0x75b   : > { %2923 = vmatpush.bf16.msrb.mxu1 %v5819_v13  ;;  %v5783_v32 = vor.u32 %v6815_v23, %v5780_v27  ;;  %v5775_v54 = vor.u32 %v6812_v25, %v5772_v51  ;;  %v6806_v13 = vld [vmem:[%s8003_s26 + $0x154] sm:$0xf0]  ;;  %v6800_v23 = vld [vmem:[%s8003_s26 + $0x9c] sm:$0xf] }
 0x75c   : > { %v5739_v6 = vor.u32 %v6806_v13, %v5738_v12  ;;  %v6857_v12 = vld [vmem:[%s8184_s1 + $0x1f0] sm:$0xff]  ;;  %v6840_v13 = vld [vmem:[%s8184_s1 + $0x168] sm:$0xff] }
 0x75d   : > { %2580 = vmatpush.bf16.msrb.mxu0 %v5574_v59  ;;  %v5754_v59 = vld [vmem:[%s8003_s26 + $0x198] sm:$0xf] }
 0x75e   : > { %2565 = vmatpush.bf16.msrb.mxu3 %v5586_v39  ;;  %2608 = vmatpush.bf16.msra.mxu2 %v5582_v63  ;;  %v6811_v39 = vld [vmem:[%s8003_s26 + $0x214] sm:$0xf]  ;;  %v5755_v34 = vor.u32 %v6810_v60, %v5754_v59  ;;  %v6808_v63 = vld [vmem:[%s8003_s26 + $0x19c] sm:$0xf]  ;;  %v7090_v60 = vld [vmem:[%s2297_s17] ss:$0 sm:$0xff] }
 0x75f   : > { %2924 = vmatpush.bf16.msrb.mxu1 %v5803_v20  ;;  %v5767_v48 = vor.u32 %v6811_v39, %v5764_v44  ;;  %v5716_v20 = vld [vmem:[%s8003_s26 + $0xd0] sm:$0xf0]  ;;  %v6796_v39 = vld [vmem:[%s8003_s26 + $0x1c] sm:$0xf] }
 0x760   : > { %v5719_v28 = vor.u32 %v6799_v11, %v5716_v20  ;;  %v6854_v11 = vld [vmem:[%s8184_s1 + $0x1d8] sm:$0xff]  ;;  %v6845_v20 = vld [vmem:[%s8184_s1 + $0x190] sm:$0xff] }
 0x761   : > { %2909 = vmatpush.bf16.msra.mxu0 %v5815_v5  ;;  %v6805_v5 = vld [vmem:[%s8003_s26 + $0x14c] sm:$0xf0] }
 0x762   : > { %2566 = vmatpush.bf16.msrb.mxu3 %v5570_v56  ;;  %2937 = vmatpush.bf16.msrb.mxu2 %v5823_v43  ;;  %v6809_v56 = vld [vmem:[%s8003_s26 + $0x1cc] sm:$0xf0]  ;;  %v5731_v16 = vor.u32 %v6805_v5, %v5730_v2  ;;  %v5735_v43 = vor.u32 %v6803_v8, %v5732_v9  ;;  %v6850_v2 = vld [vmem:[%s8184_s1 + $0x1b8] sm:$0xff] }
 0x763   : > { %2925 = vmatpush.bf16.msrb.mxu1 %v5787_v33  ;;  %v5747_v58 = vor.u32 %v6809_v56, %v5746_v55  ;;  %v6841_v5 = vld [vmem:[%s8184_s1 + $0x170] sm:$0xff] }
 0x764   : > { %v6849_v8 = vld [vmem:[%s8184_s1 + $0x1b0] sm:$0xff] }
 0x765   : > { %2910 = vmatpush.bf16.msra.mxu0 %v5799_v7  ;;  %v5714_v7 = vld [vmem:[%s8003_s26 + $0x90] sm:$0xf] }
 0x766   : > { %2895 = vmatpush.bf16.msra.mxu3 %v5811_v4  ;;  %2938 = vmatpush.bf16.msrb.mxu2 %v5807_v17  ;;  %v5759_v4 = vor.u32 %v6808_v63, %v5756_v1  ;;  %v5722_v17 = vld [vmem:[%s8003_s26 + $0x98] sm:$0xf]  ;;  %v5715_v27 = vor.u32 %v6801_v10, %v5714_v7  ;;  %v6833_v9 = vld [vmem:[%s8184_s1 + $0x130] sm:$0xff] }
 0x767   : > { %2926 = vmatpush.bf16.msrb.mxu1 %v5771_v52  ;;  %v5723_v33 = vor.u32 %v6802_v22, %v5722_v17  ;;  %v6846_v7 = vld [vmem:[%s8184_s1 + $0x198] sm:$0xff]  ;;  %v6836_v17 = vld [vmem:[%s8184_s1 + $0x148] sm:$0xff]  ;;  %v6829_v22 = vld [vmem:[%s8184_s1 + $0x110] sm:$0xff] }
 0x768   : > { %v6830_v10 = vld [vmem:[%s8184_s1 + $0x118] sm:$0xff] }
 0x769   : > { %2911 = vmatpush.bf16.msra.mxu0 %v5783_v32 }
 0x76a   : > { %2896 = vmatpush.bf16.msra.mxu3 %v5795_v18  ;;  %2939 = vmatpush.bf16.msrb.mxu2 %v5791_v38  ;;  %v6804_v18 = vld [vmem:[%s8003_s26 + $0x11c] sm:$0xf]  ;;  %v5706_v38 = vld [vmem:[%s8003_s26 + $0x18] sm:$0xf] }
 0x76b   : > { %2927 = vmatpush.bf16.msrb.mxu1 %v5755_v34  ;;  %v5743_v19 = vor.u32 %v6804_v18, %v5740_v47  ;;  %v5707_v51 = vor.u32 %v6798_v26, %v5706_v38  ;;  %v6847_v18 = vld [vmem:[%s8184_s1 + $0x1a0] sm:$0xff]  ;;  %v6770_v38 = vld [vmem:[%s8184_s1 + $0x38] sm:$0xff] }
 0x76c   : > { %v6831_v47 = vld [vmem:[%s8184_s1 + $0x120] sm:$0xff]  ;;  %v6794_v26 = vld [vmem:[%s8184_s1 + $0xf8] sm:$0xff] }
 0x76d   : > { %2912 = vmatpush.bf16.msra.mxu0 %v5767_v48  ;;  %v5703_v48 = vor.u32 %v6795_v35, %v5700_v36  ;;  %v6785_v35 = vld [vmem:[%s8184_s1 + $0xb0] sm:$0xff]  ;;  %v6827_v36 = vld [vmem:[%s8184_s1 + $0x100] sm:$0xff] }
 0x76e   : > { %2897 = vmatpush.bf16.msra.mxu3 %v5779_v24  ;;  %2940 = vmatpush.bf16.msrb.mxu2 %v5775_v54  ;;  %v5724_v24 = vld [vmem:[%s8003_s26 + $0xd8] sm:$0xf0] }
 0x76f   : > { %2928 = vmatpush.bf16.msrb.mxu1 %v5739_v6  ;;  %v6838_v6 = vld [vmem:[%s8184_s1 + $0x158] sm:$0xff] }
 0x771   : > { %2913 = vmatpush.bf16.msra.mxu0 %v5751_v0 }
 0x772   : > { %2898 = vmatpush.bf16.msra.mxu3 %v5763_v41  ;;  %2941 = vmatpush.bf16.msrb.mxu2 %v5759_v4  ;;  %v5708_v41 = vld [vmem:[%s8003_s26 + $0x58] sm:$0xf0] }
 0x773   : > { %2929 = vmatpush.bf16.msrb.mxu1 %v5723_v33  ;;  %v5711_v52 = vor.u32 %v6796_v39, %v5708_v41  ;;  %v6858_v4 = vld [vmem:[%s8184_s1 + $0x1f8] sm:$0xff]  ;;  %v6777_v33 = vld [vmem:[%s8184_s1 + $0x70] sm:$0xff]  ;;  %v6784_v39 = vld [vmem:[%s8184_s1 + $0xa8] sm:$0xff] }
 0x774   : > { %v6769_v41 = vld [vmem:[%s8184_s1 + $0x30] sm:$0xff] }
 0x775   : > { %2914 = vmatpush.bf16.msra.mxu0 %v5735_v43  ;;  %v6839_v43 = vld [vmem:[%s8184_s1 + $0x160] sm:$0xff] }
 0x776   : > { %2899 = vmatpush.bf16.msra.mxu3 %v5747_v58  ;;  %2942 = vmatpush.bf16.msrb.mxu2 %v5743_v19  ;;  %v7089_v58 = vld [vmem:[%s2295_s14] ss:$0 sm:$0xff]  ;;  %v6837_v19 = vld [vmem:[%s8184_s1 + $0x150] sm:$0xff]  ;;  %s8630_s14 = sld [smem:[#allocation23_spill]] (!%p6592_p8) }
 0x777   : > { %2930 = vmatpush.bf16.msrb.mxu1 %v5707_v51  ;;  %v6774_v51 = vld [vmem:[%s8184_s1 + $0x58] sm:$0xff] }
 0x779   : > { %2915 = vmatpush.bf16.msra.mxu0 %v5719_v28  ;;  %v6778_v28 = vld [vmem:[%s8184_s1 + $0x78] sm:$0xff] }
 0x77a   : > { %2900 = vmatpush.bf16.msra.mxu3 %v5731_v16  ;;  %v6856_v16 = vld [vmem:[%s8184_s1 + $0x1e8] sm:$0xff] }
 0x77d   : > { %2916 = vmatpush.bf16.msra.mxu0 %v5703_v48  ;;  %v6783_v48 = vld [vmem:[%s8184_s1 + $0xa0] sm:$0xff] }
 0x77e   : > { %2901 = vmatpush.bf16.msra.mxu3 %v5715_v27  ;;  %v6843_v27 = vld [vmem:[%s8184_s1 + $0x180] sm:$0xff] }
 0x7c4   : > { %v2312_v31 = vpop.xlane.xlu0 %2311 }
 0x7c5   : > { %v2315_v37 = vmul.f32 0.03125, %v2312_v31  ;;  %v6797_v31 = vld [vmem:[%s8003_s26 + $0x4c] sm:$0xf0] }
 0x7c6   : > { %v5699_v46 = vor.u32 %v6797_v31, %v5698_v30  ;;  %v6786_v30 = vld [vmem:[%s8184_s1 + $0xb8] sm:$0xff]  ;;  %v6828_v31 = vld [vmem:[%s8184_s1 + $0x108] sm:$0xff] }
 0x7c7   : > { %v8108_v40 = vadd.f32 1e-05, %v2315_v37  ;;  %v5727_v37 = vor.u32 %v6800_v23, %v5724_v24  ;;  %v6853_v23 = vld [vmem:[%s8184_s1 + $0x1d0] sm:$0xff]  ;;  %v6835_v24 = vld [vmem:[%s8184_s1 + $0x140] sm:$0xff] }
 0x7c8   : > { %2902 = vmatpush.bf16.msra.mxu3 %v5699_v46  ;;  %v6775_v46 = vld [vmem:[%s8184_s1 + $0x60] sm:$0xff] }
 0x7c9   : > { %7126 = vrsqrt.f32 %v8108_v40  ;;  %2943 = vmatpush.bf16.msrb.mxu2 %v5727_v37  ;;  %vm2325_vm4 = vweird.f32 %v8108_v40  ;;  %v6851_v37 = vld [vmem:[%s8184_s1 + $0x1c0] sm:$0xff] }
 0x7cc   : > { %v2314_v61 = vpop.xlane.xlu1 %2313 }
 0x7cd   : > { %v2316_v3 = vmul.f32 0.03125, %v2314_v61  ;;  %2944 = vmatpush.bf16.msrb.mxu2 %v5711_v52  ;;  %v6782_v52 = vld [vmem:[%s8184_s1 + $0x98] sm:$0xff] }
 0x7cf   : > { %v8130_v14 = vpop.eup %7126  ;;  %v8132_v15 = vadd.f32 1e-05, %v2316_v3  ;;  %v6834_v3 = vld [vmem:[%s8184_s1 + $0x138] sm:$0xff] }
 0x7d0   : > { %v2320_v29 = vmul.f32 %v8130_v14, %v8108_v40  ;;  %vm2326_vm3 = vweird.f32 %v8130_v14 }
 0x7d1   : > { %7128 = vrsqrt.f32 %v8132_v15  ;;  %vm2327_vm5 = vmor %vm2325_vm4, %vm2326_vm3  ;;  %vm2335_vm7 = vweird.f32 %v8132_v15 }
 0x7d2   : > { %v2321_v21 = vmul.f32 %v8130_v14, %v2320_v29  ;;  %v6855_v29 = vld [vmem:[%s8184_s1 + $0x1e0] sm:$0xff] }
 0x7d4   : > { %v2322_v32 = vmul.f32 0.5, %v2321_v21  ;;  %v6844_v21 = vld [vmem:[%s8184_s1 + $0x188] sm:$0xff] }
 0x7d6   : > { %v2323_v62 = vsub.f32 1.5, %v2322_v32  ;;  %v6852_v32 = vld [vmem:[%s8184_s1 + $0x1c8] sm:$0xff] }
 0x7d7   : > { %v7129_v44 = vpop.eup %7128 }
 0x7d8   : > { %v2324_v49 = vmul.f32 %v8130_v14, %v2323_v62  ;;  %v2330_v25 = vmul.f32 %v7129_v44, %v8132_v15  ;;  %vm2336_vm6 = vweird.f32 %v7129_v44  ;;  %v6832_v15 = vld [vmem:[%s8184_s1 + $0x128] sm:$0xff] }
 0x7d9   : > { %vm2337_vm8 = vmor %vm2335_vm7, %vm2336_vm6  ;;  %v6776_v62 = vld [vmem:[%s8184_s1 + $0x68] sm:$0xff] }
 0x7da   : > { %v2331_v54 = vmul.f32 %v7129_v44, %v2330_v25  ;;  %v2328_v55 = vsel %vm2327_vm5, %v8130_v14, %v2324_v49  ;;  %v6848_v14 = vld [vmem:[%s8184_s1 + $0x1a8] sm:$0xff] }
 0x7db   : > { %v2339_v40 = vmul.f32 %v2328_v55, %v8021_v42  ;;  %v6768_v49 = vld [vmem:[%s8184_s1 + $0x28] sm:$0xff]  ;;  %v6791_v55 = vld [vmem:[%s8184_s1 + $0xe0] sm:$0xff] }
 0x7dc   : > { %v2332_v56 = vmul.f32 0.5, %v2331_v54  ;;  %v6792_v25 = vld [vmem:[%s8184_s1 + $0xe8] sm:$0xff]  ;;  %v6767_v54 = vld [vmem:[%s8184_s1 + $0x20] sm:$0xff] }
 0x7dd   : > { %v2344_v61 = vmul.f32 %v7089_v58, %v2339_v40  ;;  %v6790_v40 = vld [vmem:[%s8184_s1 + $0xd8] sm:$0xff] }
 0x7de   : > { %v2333_v57 = vsub.f32 1.5, %v2332_v56  ;;  %v6773_v56 = vld [vmem:[%s8184_s1 + $0x50] sm:$0xff] }
 0x7df   : > { %v8174_v63 = vadd.f32 %v7090_v60, %v2344_v61  ;;  %v6789_v61 = vld [vmem:[%s8184_s1 + $0xd0] sm:$0xff] }
 0x7e0   : > { %v2334_v53 = vmul.f32 %v7129_v44, %v2333_v57  ;;  %v6781_v57 = vld [vmem:[%s8184_s1 + $0x90] sm:$0xff] }
 0x7e2   : > { %v2338_v59 = vsel %vm2337_vm8, %v7129_v44, %v2334_v53  ;;  %v6793_v44 = vld [vmem:[%s8184_s1 + $0xf0] sm:$0xff]  ;;  %v6772_v53 = vld [vmem:[%s8184_s1 + $0x48] sm:$0xff] }
 0x7e3   : > { %v2340_v0 = vmul.f32 %v2338_v59, %v8028_v50  ;;  %v6842_v50 = vld [vmem:[%s8184_s1 + $0x178] sm:$0xff]  ;;  %v6780_v59 = vld [vmem:[%s8184_s1 + $0x88] sm:$0xff] }
 0x7e5   : > { %v2345_v34 = vmul.f32 %v7089_v58, %v2340_v0  ;;  %v6766_v58 = vld [vmem:[%s8184_s1 + $0x18] sm:$0xff]  ;;  %v6771_v0 = vld [vmem:[%s8184_s1 + $0x40] sm:$0xff] }
 0x7e7   : > { %v8176_v1 = vadd.f32 %v7090_v60, %v2345_v34  ;;  %v6765_v60 = vld [vmem:[%s8184_s1 + $0x10] sm:$0xff]  ;;  %v6779_v34 = vld [vmem:[%s8184_s1 + $0x80] sm:$0xff] }
 0x7e9   : > { %v8180_v42 = vpack.c.bf16 %v8176_v1, %v8174_v63 }
 0x7eb   : > { %2567 = vmatmul.bf16.vlgmr.msrb.gmra.mxu3 %v8180_v42  ;;  %2581 = vmatmul.bf16.vlgmr.msrb.gmra.mxu0 %v8180_v42 }
 0x7ec   : > { %2595 = vmatmul.bf16.vlgmr.msra.gmra.mxu1 %v8180_v42  ;;  %2609 = vmatmul.bf16.vlgmr.msra.gmra.mxu2 %v8180_v42 }
 0x7ed   : > { %3233 = vmatpush.bf16.msrb.mxu0 %v6842_v50  ;;  %3247 = vmatpush.bf16.msra.mxu1 %v6850_v2  ;;  %v6764_v2 = vld [vmem:[%s8184_s1 + $0x8] sm:$0xff] }
 0x7ee   : > { %3219 = vmatpush.bf16.msrb.mxu3 %v6834_v3  ;;  %3261 = vmatpush.bf16.msra.mxu2 %v6858_v4  ;;  %v6788_v3 = vld [vmem:[%s8184_s1 + $0xc8] sm:$0xff] }
 0x7f1   : > { %3234 = vmatpush.bf16.msrb.mxu0 %v6841_v5  ;;  %3248 = vmatpush.bf16.msra.mxu1 %v6849_v8  ;;  %v6763_v5 = vld [vmem:[%s8184_s1] sm:$0xff] }
 0x7f2   : > { %3220 = vmatpush.bf16.msrb.mxu3 %v6833_v9  ;;  %3262 = vmatpush.bf16.msra.mxu2 %v6857_v12  ;;  %v6787_v8 = vld [vmem:[%s8184_s1 + $0xc0] sm:$0xff] }
 0x7f5   : > { %3235 = vmatpush.bf16.msrb.mxu0 %v6840_v13  ;;  %3249 = vmatpush.bf16.msra.mxu1 %v6848_v14 }
 0x7f6   : > { %3221 = vmatpush.bf16.msrb.mxu3 %v6832_v15  ;;  %3263 = vmatpush.bf16.msra.mxu2 %v6856_v16 }
 0x7f9   : > { %3236 = vmatpush.bf16.msrb.mxu0 %v6839_v43  ;;  %3250 = vmatpush.bf16.msra.mxu1 %v6847_v18  ;;  %v2725_v43 = vld [vmem:[%s8276_s2 + $0x4] sm:$0xf] }
 0x7fa   : > { %3222 = vmatpush.bf16.msrb.mxu3 %v6831_v47  ;;  %3264 = vmatpush.bf16.msra.mxu2 %v6855_v29  ;;  %v2728_v29 = vperm.slane %v2725_v43, 1 }
 0x7fb   : > { %2903 = vmatmul.bf16.vlgmr.msra.gmra.mxu3 %v8180_v42  ;;  %2917 = vmatmul.bf16.vlgmr.msra.gmra.mxu0 %v8180_v42 }
 0x7fc   : > { %2931 = vmatmul.bf16.vlgmr.msrb.gmra.mxu1 %v8180_v42  ;;  %2945 = vmatmul.bf16.vlgmr.msrb.gmra.mxu2 %v8180_v42 }
 0x7fd   : > { %3237 = vmatpush.bf16.msrb.mxu0 %v6838_v6  ;;  %3251 = vmatpush.bf16.msra.mxu1 %v6846_v7  ;;  %v2729_v6 = vperm.slane %v2725_v43, 2 }
 0x7fe   : > { %3223 = vmatpush.bf16.msrb.mxu3 %v6830_v10  ;;  %3265 = vmatpush.bf16.msra.mxu2 %v6854_v11 }
 0x801   : > { %3238 = vmatpush.bf16.msrb.mxu0 %v6837_v19  ;;  %3252 = vmatpush.bf16.msra.mxu1 %v6845_v20 }
 0x802   : > { %3224 = vmatpush.bf16.msrb.mxu3 %v6829_v22  ;;  %3266 = vmatpush.bf16.msra.mxu2 %v6853_v23  ;;  %v6887_v23 = vld [vmem:[%s8003_s26 + $0x3a4] sm:$0xf] }
 0x805   : > { %3239 = vmatpush.bf16.msrb.mxu0 %v6836_v17  ;;  %3253 = vmatpush.bf16.msra.mxu1 %v6844_v21  ;;  %v2727_v17 = vperm.slane %v2725_v43, 0 }
 0x806   : > { %3225 = vmatpush.bf16.msrb.mxu3 %v6828_v31  ;;  %3267 = vmatpush.bf16.msra.mxu2 %v6852_v32  ;;  %v6890_v31 = vld [vmem:[%s8003_s26 + $0x3e4] sm:$0xf0] }
 0x809   : > { %3240 = vmatpush.bf16.msrb.mxu0 %v6835_v24  ;;  %3254 = vmatpush.bf16.msra.mxu1 %v6843_v27  ;;  %v6196_v24 = vld [vmem:[%s8003_s26 + $0x3e0] sm:$0xf0]  ;;  %v2730_v27 = vperm.slane %v2725_v43, 3  ;;  %v6882_v43 = vld [vmem:[%s8003_s26 + $0x2e4] sm:$0xf0] }
 0x80a   : > { %3226 = vmatpush.bf16.msrb.mxu3 %v6827_v36  ;;  %3268 = vmatpush.bf16.msra.mxu2 %v6851_v37  ;;  %v6199_v37 = vor.u32 %v6887_v23, %v6196_v24  ;;  %v6875_v23 = vld [vmem:[%s8003_s26 + $0x224] sm:$0xf] }
 0x80b   : > { %v6148_v24 = vld [vmem:[%s8003_s26 + $0x260] sm:$0xf0] }
 0x80d   : > { %3481 = vmatpush.bf16.msra.mxu0 %v6778_v28  ;;  %3495 = vmatpush.bf16.msrb.mxu1 %v6786_v30  ;;  %v6202_v30 = vld [vmem:[%s8003_s26 + $0x3a8] sm:$0xf] }
 0x80e   : > { %3467 = vmatpush.bf16.msra.mxu3 %v6770_v38  ;;  %3509 = vmatpush.bf16.msrb.mxu2 %v6794_v26 }
 0x811   : > { %3482 = vmatpush.bf16.msra.mxu0 %v6777_v33  ;;  %3496 = vmatpush.bf16.msrb.mxu1 %v6785_v35 }
 0x812   : > { %3468 = vmatpush.bf16.msra.mxu3 %v6769_v41  ;;  %3510 = vmatpush.bf16.msrb.mxu2 %v6793_v44  ;;  %v6180_v41 = vld [vmem:[%s8003_s26 + $0x360] sm:$0xf0] }
 0x815   : > { %3483 = vmatpush.bf16.msra.mxu0 %v6776_v62  ;;  %3497 = vmatpush.bf16.msrb.mxu1 %v6784_v39  ;;  %v6203_v62 = vor.u32 %v6890_v31, %v6202_v30  ;;  %v6883_v39 = vld [vmem:[%s8003_s26 + $0x324] sm:$0xf]  ;;  %v6154_v30 = vld [vmem:[%s8003_s26 + $0x228] sm:$0xf] }
 0x816   : > { %3469 = vmatpush.bf16.msra.mxu3 %v6768_v49  ;;  %3511 = vmatpush.bf16.msrb.mxu2 %v6792_v25  ;;  %v6186_v49 = vld [vmem:[%s8003_s26 + $0x328] sm:$0xf] }
 0x817   : > { %v6886_v25 = vld [vmem:[%s8003_s26 + $0x364] sm:$0xf0] }
 0x818   : > { %v6878_v31 = vld [vmem:[%s8003_s26 + $0x264] sm:$0xf0] }
 0x819   : > { %3484 = vmatpush.bf16.msra.mxu0 %v6775_v46  ;;  %3498 = vmatpush.bf16.msrb.mxu1 %v6783_v48 }
 0x81a   : > { %3470 = vmatpush.bf16.msra.mxu3 %v6767_v54  ;;  %3512 = vmatpush.bf16.msrb.mxu2 %v6791_v55  ;;  %v6194_v54 = vld [vmem:[%s8003_s26 + $0x3a0] sm:$0xf] }
 0x81b   : > { %v6889_v55 = vld [vmem:[%s8003_s26 + $0x3dc] sm:$0xf0] }
 0x81d   : > { %3485 = vmatpush.bf16.msra.mxu0 %v6774_v51  ;;  %3499 = vmatpush.bf16.msrb.mxu1 %v6782_v52 }
 0x81e   : > { %3471 = vmatpush.bf16.msra.mxu3 %v6766_v58  ;;  %3513 = vmatpush.bf16.msrb.mxu2 %v6790_v40  ;;  %v6183_v58 = vor.u32 %v6883_v39, %v6180_v41  ;;  %v6888_v40 = vld [vmem:[%s8003_s26 + $0x3ac] sm:$0xf]  ;;  %v6155_v39 = vor.u32 %v6878_v31, %v6154_v30  ;;  %v6132_v41 = vld [vmem:[%s8003_s26 + $0x1e0] sm:$0xf0] }
 0x821   : > { %3486 = vmatpush.bf16.msra.mxu0 %v6773_v56  ;;  %3500 = vmatpush.bf16.msrb.mxu1 %v6781_v57  ;;  %v8292_v56 = vld [vmem:[%s8276_s2] sm:$0xf] }
 0x822   : > { %3472 = vmatpush.bf16.msra.mxu3 %v6765_v60  ;;  %3514 = vmatpush.bf16.msrb.mxu2 %v6789_v61  ;;  %v6187_v61 = vor.u32 %v6886_v25, %v6186_v49  ;;  %v6874_v49 = vld [vmem:[%s8003_s26 + $0x1e4] sm:$0xf0] }
 0x825   : > { %3487 = vmatpush.bf16.msra.mxu0 %v6772_v53  ;;  %3501 = vmatpush.bf16.msrb.mxu1 %v6780_v59  ;;  %v6204_v53 = vld [vmem:[%s8003_s26 + $0x3e8] sm:$0xf0] }
 0x826   : > { %3473 = vmatpush.bf16.msra.mxu3 %v6764_v2  ;;  %3515 = vmatpush.bf16.msrb.mxu2 %v6788_v3 }
 0x829   : > { %3488 = vmatpush.bf16.msra.mxu0 %v6771_v0  ;;  %3502 = vmatpush.bf16.msrb.mxu1 %v6779_v34  ;;  %v6879_v0 = vld [vmem:[%s8003_s26 + $0x2a4] sm:$0xf] }
 0x82a   : > { %3474 = vmatpush.bf16.msra.mxu3 %v6763_v5  ;;  %3516 = vmatpush.bf16.msrb.mxu2 %v6787_v8  ;;  %v6164_v34 = vld [vmem:[%s8003_s26 + $0x2e0] sm:$0xf0]  ;;  %v6195_v5 = vor.u32 %v6889_v55, %v6194_v54  ;;  %v6170_v8 = vld [vmem:[%s8003_s26 + $0x2a8] sm:$0xf]  ;;  %v6146_v54 = vld [vmem:[%s8003_s26 + $0x220] sm:$0xf] }
 0x82b   : > { %v6877_v55 = vld [vmem:[%s8003_s26 + $0x25c] sm:$0xf0] }
 0x868   : > { %v8254_v50 = vpop.f32.mrf.mxu0 }
 0x869   : > { %v8258_v4 = vpop.f32.mrf.mxu1 }
 0x86e   : > { %v8262_v9 = vpop.f32.mrf.mxu3 }
 0x86f   : > { %v8264_v12 = vpop.f32.mrf.mxu2 }
 0x870   : > { %v8266_v13 = vpop.f32.mrf.mxu0 }
 0x871   : > { %v8268_v14 = vpop.f32.mrf.mxu1 }
 0x876   : > { %v8271_v15 = vpop.f32.mrf.mxu3 }
 0x877   : > { %v8278_v16 = vpop.f32.mrf.mxu2 }
 0x878   : > { %v2918_v18 = vpop.f32.mrf.mxu0 }
 0x879   : > { %v2932_v47 = vpop.f32.mrf.mxu1  ;;  %v2919_v10 = vadd.f32 %v2918_v18, %v2728_v29  ;;  %v2392_v18 = vperm.slane %v8292_v56, 1 }
 0x87a   : > { %v2933_v19 = vadd.f32 %v2932_v47, %v2729_v6 }
 0x87b   : > { %v2952_v32 = vmax.f32 %v2919_v10, 0.0  ;;  %v2393_v10 = vperm.slane %v8292_v56, 2 }
 0x87c   : > { %v2953_v35 = vmax.f32 %v2933_v19, 0.0  ;;  %v6167_v19 = vor.u32 %v6879_v0, %v6164_v34  ;;  %v6116_v0 = vld [vmem:[%s8003_s26 + $0x160] sm:$0xf0] }
 0x87e   : > { %v2904_v7 = vpop.f32.mrf.mxu3 }
 0x87f   : > { %v2946_v11 = vpop.f32.mrf.mxu2  ;;  %v2905_v38 = vadd.f32 %v2904_v7, %v2727_v17  ;;  %v6885_v7 = vld [vmem:[%s8003_s26 + $0x35c] sm:$0xf0] }
 0x880   : > { %v2920_v20 = vpop.f32.mrf.mxu0  ;;  %v2947_v44 = vadd.f32 %v2946_v11, %v2730_v27 }
 0x881   : > { %v2921_v21 = vadd.f32 %v2920_v20, %v2728_v29  ;;  %v2934_v22 = vpop.f32.mrf.mxu1  ;;  %v2951_v59 = vmax.f32 %v2905_v38, 0.0  ;;  %v6207_v29 = vor.u32 %v6888_v40, %v6204_v53  ;;  %v6884_v20 = vld [vmem:[%s8003_s26 + $0x32c] sm:$0xf] }
 0x882   : > { %v2935_v28 = vadd.f32 %v2934_v22, %v2729_v6  ;;  %v2954_v2 = vmax.f32 %v2947_v44, 0.0  ;;  %v6178_v6 = vld [vmem:[%s8003_s26 + $0x320] sm:$0xf]  ;;  %v6171_v22 = vor.u32 %v6882_v43, %v6170_v8  ;;  %v6172_v38 = vld [vmem:[%s8003_s26 + $0x2e8] sm:$0xf0]  ;;  %v2394_v44 = vperm.slane %v8292_v56, 3 }
 0x883   : > { %v2956_v33 = vmax.f32 %v2921_v21, 0.0  ;;  %v2585_v21 = vadd.f32 %v8266_v13, %v2392_v18  ;;  %v6876_v40 = vld [vmem:[%s8003_s26 + $0x22c] sm:$0xf]  ;;  %v6130_v43 = vld [vmem:[%s8003_s26 + $0x1a0] sm:$0xf] }
 0x884   : > { %v2957_v36 = vmax.f32 %v2935_v28, 0.0  ;;  %v6179_v28 = vor.u32 %v6885_v7, %v6178_v6  ;;  %v6156_v53 = vld [vmem:[%s8003_s26 + $0x268] sm:$0xf0]  ;;  %v2611_v34 = vadd.f32 %v8264_v12, %v2394_v44 }
 0x885   : > { %v2960_v26 = vpack.c.bf16 %v2956_v33, %v2952_v32  ;;  %v2583_v32 = vadd.f32 %v8254_v50, %v2392_v18  ;;  %v6162_v33 = vld [vmem:[%s8003_s26 + $0x2a0] sm:$0xf]  ;;  %v6871_v50 = vld [vmem:[%s8003_s26 + $0x1a4] sm:$0xf]  ;;  %v6140_v6 = vld [vmem:[%s8003_s26 + $0x1e8] sm:$0xf0] }
 0x886   : > { %v2961_v46 = vpack.c.bf16 %v2957_v36, %v2953_v35  ;;  %v2906_v48 = vpop.f32.mrf.mxu3  ;;  %v6881_v35 = vld [vmem:[%s8003_s26 + $0x2dc] sm:$0xf0]  ;;  %v2597_v36 = vadd.f32 %v8258_v4, %v2393_v10 }
 0x887   : > { %v2907_v51 = vadd.f32 %v2906_v48, %v2727_v17  ;;  %v2948_v52 = vpop.f32.mrf.mxu2  ;;  %3241 = vmatmul.bf16.vlgmr.msrb.gmra.mxu0 %v2960_v26  ;;  %v6188_v17 = vld [vmem:[%s8003_s26 + $0x368] sm:$0xf0]  ;;  %v2391_v26 = vperm.slane %v8292_v56, 0  ;;  %v6163_v4 = vor.u32 %v6881_v35, %v6162_v33  ;;  %v6138_v48 = vld [vmem:[%s8003_s26 + $0x1a8] sm:$0xf]  ;;  %v2616_v25 = vmax.f32 %v2583_v32, 0.0 }
 0x888   : > { %v2949_v57 = vadd.f32 %v2948_v52, %v2730_v27  ;;  %3255 = vmatmul.bf16.vlgmr.msra.gmra.mxu1 %v2961_v46  ;;  %3739 = vmatpush.bf16.msrb.mxu0 %v6199_v37  ;;  %v2599_v27 = vadd.f32 %v8268_v14, %v2393_v10  ;;  %v6191_v13 = vor.u32 %v6884_v20, %v6188_v17  ;;  %v6880_v14 = vld [vmem:[%s8003_s26 + $0x2ac] sm:$0xf]  ;;  %v6873_v18 = vld [vmem:[%s8003_s26 + $0x1dc] sm:$0xf0]  ;;  %v2618_v20 = vmax.f32 %v2611_v34, 0.0  ;;  %v6897_v34 = vld [vmem:[%s8184_s1 + $0x230] sm:$0xff] }
 0x889   : > { %v2955_v60 = vmax.f32 %v2907_v51, 0.0  ;;  %3753 = vmatpush.bf16.msra.mxu1 %v6203_v62  ;;  %v6151_v37 = vor.u32 %v6875_v23, %v6148_v24  ;;  %v2620_v62 = vmax.f32 %v2585_v21, 0.0  ;;  %v2571_v51 = vadd.f32 %v8271_v15, %v2391_v26  ;;  %v6106_v21 = vld [vmem:[%s8003_s26 + $0xa8] sm:$0xf]  ;;  %v6868_v32 = vld [vmem:[%s8003_s26 + $0x12c] sm:$0xf] }
 0x88a   : > { %v2958_v3 = vmax.f32 %v2949_v57, 0.0  ;;  %v2621_v46 = vmax.f32 %v2599_v27, 0.0  ;;  %v6175_v52 = vor.u32 %v6880_v14, %v6172_v38  ;;  %v2617_v57 = vmax.f32 %v2597_v36, 0.0  ;;  %v6114_v27 = vld [vmem:[%s8003_s26 + $0x120] sm:$0xf] }
 0x88b   : > { %v2959_v47 = vpack.c.bf16 %v2955_v60, %v2951_v59  ;;  %v2613_v56 = vadd.f32 %v8278_v16, %v2394_v44  ;;  %v2569_v59 = vadd.f32 %v8262_v9, %v2391_v26  ;;  %v2624_v60 = vpack.c.bf16 %v2620_v62, %v2616_v25  ;;  %v6859_v35 = vld [vmem:[%s8003_s26 + $0x24] sm:$0xf]  ;;  %v6090_v14 = vld [vmem:[%s8003_s26 + $0x28] sm:$0xf]  ;;  %v6098_v62 = vld [vmem:[%s8003_s26 + $0xa0] sm:$0xf] }
 0x88c   : > { %v2962_v11 = vpack.c.bf16 %v2958_v3, %v2954_v2  ;;  %3740 = vmatpush.bf16.msrb.mxu0 %v6183_v58  ;;  %v6135_v58 = vor.u32 %v6871_v50, %v6132_v41  ;;  %v6139_v15 = vor.u32 %v6874_v49, %v6138_v48  ;;  %v2625_v2 = vpack.c.bf16 %v2621_v46, %v2617_v57  ;;  %v6122_v3 = vld [vmem:[%s8003_s26 + $0x128] sm:$0xf]  ;;  %v6084_v36 = vld [vmem:[%s8003_s26 + $0x60] sm:$0xf0]  ;;  %v6864_v41 = vld [vmem:[%s8003_s26 + $0xac] sm:$0xf] }
 0x88d   : > { %3754 = vmatpush.bf16.msra.mxu1 %v6187_v61  ;;  %3227 = vmatmul.bf16.vlgmr.msrb.gmra.mxu3 %v2959_v47  ;;  %v6867_v61 = vld [vmem:[%s8003_s26 + $0x124] sm:$0xf]  ;;  %v6147_v16 = vor.u32 %v6877_v55, %v6146_v54  ;;  %v2619_v8 = vmax.f32 %v2571_v51, 0.0  ;;  %v6159_v9 = vor.u32 %v6876_v40, %v6156_v53  ;;  %v2622_v47 = vmax.f32 %v2613_v56, 0.0  ;;  %v6862_v38 = vld [vmem:[%s8003_s26 + $0x64] sm:$0xf0] }
 0x88e   : > { %3269 = vmatmul.bf16.vlgmr.msra.gmra.mxu2 %v2962_v11  ;;  %3725 = vmatpush.bf16.msrb.mxu3 %v6195_v5  ;;  %v6870_v5 = vld [vmem:[%s8003_s26 + $0x164] sm:$0xf0]  ;;  %v6119_v12 = vor.u32 %v6867_v61, %v6116_v0  ;;  %v2615_v7 = vmax.f32 %v2569_v59, 0.0  ;;  %v6863_v11 = vld [vmem:[%s8003_s26 + $0xa4] sm:$0xf]  ;;  %v6131_v17 = vor.u32 %v6873_v18, %v6130_v43  ;;  %v6087_v50 = vor.u32 %v6859_v35, %v6084_v36  ;;  %v6906_v57 = vld [vmem:[%s8184_s1 + $0x278] sm:$0xff] }
 0x88f   : > { %3767 = vmatpush.bf16.msra.mxu2 %v6207_v29  ;;  %v6872_v29 = vld [vmem:[%s8003_s26 + $0x1ac] sm:$0xf]  ;;  %v6123_v10 = vor.u32 %v6870_v5, %v6122_v3  ;;  %v2626_v30 = vpack.c.bf16 %v2622_v47, %v2618_v20  ;;  %v6091_v46 = vor.u32 %v6862_v38, %v6090_v14  ;;  %v6082_v49 = vld [vmem:[%s8003_s26 + $0x20] sm:$0xf]  ;;  %v6914_v56 = vld [vmem:[%s8184_s1 + $0x2b8] sm:$0xff] }
 0x890   : > { %3741 = vmatpush.bf16.msrb.mxu0 %v6167_v19  ;;  %v6100_v19 = vld [vmem:[%s8003_s26 + $0xe0] sm:$0xf0]  ;;  %v2623_v23 = vpack.c.bf16 %v2619_v8, %v2615_v7  ;;  %v6143_v24 = vor.u32 %v6872_v29, %v6140_v6  ;;  %v6108_v44 = vld [vmem:[%s8003_s26 + $0xe8] sm:$0xf0]  ;;  %v6861_v25 = vld [vmem:[%s8003_s26 + $0x5c] sm:$0xf0] }
 0x891   : > { %3755 = vmatpush.bf16.msra.mxu1 %v6171_v22  ;;  %v6866_v22 = vld [vmem:[%s8003_s26 + $0xe4] sm:$0xf0]  ;;  %v6103_v31 = vor.u32 %v6863_v11, %v6100_v19  ;;  %v6111_v48 = vor.u32 %v6864_v41, %v6108_v44  ;;  %v6860_v51 = vld [vmem:[%s8003_s26 + $0x2c] sm:$0xf]  ;;  %v6083_v54 = vor.u32 %v6861_v25, %v6082_v49  ;;  %v6913_v40 = vld [vmem:[%s8184_s1 + $0x2b0] sm:$0xff] }
 0x892   : > { %3726 = vmatpush.bf16.msrb.mxu3 %v6179_v28  ;;  %v6869_v28 = vld [vmem:[%s8003_s26 + $0x15c] sm:$0xf0]  ;;  %v6107_v33 = vor.u32 %v6866_v22, %v6106_v21  ;;  %v6904_v53 = vld [vmem:[%s8184_s1 + $0x268] sm:$0xff]  ;;  %v6922_v0 = vld [vmem:[%s8184_s1 + $0x2f8] sm:$0xff] }
 0x893   : > { %3768 = vmatpush.bf16.msra.mxu2 %v6191_v13  ;;  %v6124_v13 = vld [vmem:[%s8003_s26 + $0x168] sm:$0xf0]  ;;  %v6911_v61 = vld [vmem:[%s8184_s1 + $0x2a0] sm:$0xff]  ;;  %v6921_v3 = vld [vmem:[%s8184_s1 + $0x2f0] sm:$0xff] }
 0x894   : > { %3742 = vmatpush.bf16.msrb.mxu0 %v6151_v37  ;;  %v6115_v37 = vor.u32 %v6869_v28, %v6114_v27  ;;  %v6127_v26 = vor.u32 %v6868_v32, %v6124_v13  ;;  %v6912_v59 = vld [vmem:[%s8184_s1 + $0x2a8] sm:$0xff]  ;;  %v6901_v8 = vld [vmem:[%s8184_s1 + $0x250] sm:$0xff]  ;;  %v6895_v18 = vld [vmem:[%s8184_s1 + $0x220] sm:$0xff] }
 0x895   : > { %3756 = vmatpush.bf16.msra.mxu1 %v6155_v39  ;;  %v6865_v39 = vld [vmem:[%s8003_s26 + $0xdc] sm:$0xf0]  ;;  %v6896_v5 = vld [vmem:[%s8184_s1 + $0x228] sm:$0xff]  ;;  %v6894_v6 = vld [vmem:[%s8184_s1 + $0x218] sm:$0xff] }
 0x896   : > { %3727 = vmatpush.bf16.msrb.mxu3 %v6163_v4  ;;  %v6099_v4 = vor.u32 %v6865_v39, %v6098_v62  ;;  %v6920_v43 = vld [vmem:[%s8184_s1 + $0x2e8] sm:$0xff]  ;;  %v6919_v29 = vld [vmem:[%s8184_s1 + $0x2e0] sm:$0xff]  ;;  %v6918_v11 = vld [vmem:[%s8184_s1 + $0x2d8] sm:$0xff] }
 0x897   : > { %3769 = vmatpush.bf16.msra.mxu2 %v6175_v52  ;;  %3489 = vmatmul.bf16.vlgmr.msra.gmra.mxu0 %v2624_v60  ;;  %v6092_v52 = vld [vmem:[%s8003_s26 + $0x68] sm:$0xf0]  ;;  %v6898_v60 = vld [vmem:[%s8184_s1 + $0x238] sm:$0xff]  ;;  %v6899_v7 = vld [vmem:[%s8184_s1 + $0x240] sm:$0xff] }
 0x898   : > { %3503 = vmatmul.bf16.vlgmr.msrb.gmra.mxu1 %v2625_v2  ;;  %3743 = vmatpush.bf16.msrb.mxu0 %v6135_v58  ;;  %v6095_v55 = vor.u32 %v6860_v51, %v6092_v52  ;;  %v6905_v58 = vld [vmem:[%s8184_s1 + $0x270] sm:$0xff]  ;;  %v6902_v2 = vld [vmem:[%s8184_s1 + $0x258] sm:$0xff]  ;;  %v6900_v47 = vld [vmem:[%s8184_s1 + $0x248] sm:$0xff] }
 0x899   : > { %3757 = vmatpush.bf16.msra.mxu1 %v6139_v15  ;;  %v6903_v15 = vld [vmem:[%s8184_s1 + $0x260] sm:$0xff]  ;;  %v6951_v19 = vld [vmem:[%s8003_s26 + $0x3b4] sm:$0xf]  ;;  %v6458_v21 = vld [vmem:[%s8003_s26 + $0x3b8] sm:$0xf] }
 0x89a   : > { %3728 = vmatpush.bf16.msrb.mxu3 %v6147_v16  ;;  %v6910_v16 = vld [vmem:[%s8184_s1 + $0x298] sm:$0xff]  ;;  %v6893_v28 = vld [vmem:[%s8184_s1 + $0x210] sm:$0xff]  ;;  %v6916_v14 = vld [vmem:[%s8184_s1 + $0x2c8] sm:$0xff] }
 0x89b   : > { %3770 = vmatpush.bf16.msra.mxu2 %v6159_v9  ;;  %v6909_v9 = vld [vmem:[%s8184_s1 + $0x290] sm:$0xff]  ;;  %v6442_v13 = vld [vmem:[%s8003_s26 + $0x338] sm:$0xf] }
 0x89c   : > { %3744 = vmatpush.bf16.msrb.mxu0 %v6119_v12  ;;  %v6908_v12 = vld [vmem:[%s8184_s1 + $0x288] sm:$0xff]  ;;  %v6436_v32 = vld [vmem:[%s8003_s26 + $0x370] sm:$0xf0]  ;;  %v6426_v62 = vld [vmem:[%s8003_s26 + $0x2b8] sm:$0xf] }
 0x89d   : > { %3758 = vmatpush.bf16.msra.mxu1 %v6123_v10  ;;  %3475 = vmatmul.bf16.vlgmr.msra.gmra.mxu3 %v2623_v23  ;;  %v6907_v10 = vld [vmem:[%s8184_s1 + $0x280] sm:$0xff]  ;;  %v6943_v38 = vld [vmem:[%s8003_s26 + $0x2b4] sm:$0xf]  ;;  %v6946_v39 = vld [vmem:[%s8003_s26 + $0x2f4] sm:$0xf0] }
 0x89e   : > { %3517 = vmatmul.bf16.vlgmr.msrb.gmra.mxu2 %v2626_v30  ;;  %3729 = vmatpush.bf16.msrb.mxu3 %v6131_v17  ;;  %v6452_v17 = vld [vmem:[%s8003_s26 + $0x3f0] sm:$0xf0]  ;;  %v6427_v44 = vor.u32 %v6946_v39, %v6426_v62  ;;  %v6450_v49 = vld [vmem:[%s8003_s26 + $0x3b0] sm:$0xf]  ;;  %v6362_v62 = vld [vmem:[%s8003_s26 + $0xb8] sm:$0xf] }
 0x89f   : > { %3771 = vmatpush.bf16.msra.mxu2 %v6143_v24  ;;  %v6455_v23 = vor.u32 %v6951_v19, %v6452_v17  ;;  %v6954_v24 = vld [vmem:[%s8003_s26 + $0x3f4] sm:$0xf0]  ;;  %v6917_v30 = vld [vmem:[%s8184_s1 + $0x2d0] sm:$0xff] }
 0x8a0   : > { %3745 = vmatpush.bf16.msrb.mxu0 %v6103_v31  ;;  %v6459_v27 = vor.u32 %v6954_v24, %v6458_v21  ;;  %v6947_v31 = vld [vmem:[%s8003_s26 + $0x334] sm:$0xf]  ;;  %v6953_v25 = vld [vmem:[%s8003_s26 + $0x3ec] sm:$0xf0]  ;;  %v6930_v39 = vld [vmem:[%s8003_s26 + $0xf4] sm:$0xf0] }
 0x8a1   : > { %3759 = vmatpush.bf16.msra.mxu1 %v6107_v33  ;;  %v6950_v33 = vld [vmem:[%s8003_s26 + $0x374] sm:$0xf0]  ;;  %v6439_v35 = vor.u32 %v6947_v31, %v6436_v32  ;;  %v6939_v51 = vld [vmem:[%s8003_s26 + $0x234] sm:$0xf]  ;;  %v6945_v19 = vld [vmem:[%s8003_s26 + $0x2ec] sm:$0xf0] }
 0x8a2   : > { %3730 = vmatpush.bf16.msrb.mxu3 %v6115_v37  ;;  %v6443_v36 = vor.u32 %v6950_v33, %v6442_v13  ;;  %v6892_v37 = vld [vmem:[%s8184_s1 + $0x208] sm:$0xff]  ;;  %v6404_v52 = vld [vmem:[%s8003_s26 + $0x270] sm:$0xf0]  ;;  %v6428_v31 = vld [vmem:[%s8003_s26 + $0x2f8] sm:$0xf0] }
 0x8a3   : > { %3772 = vmatpush.bf16.msra.mxu2 %v6127_v26  ;;  %v6420_v26 = vld [vmem:[%s8003_s26 + $0x2f0] sm:$0xf0] }
 0x8a4   : > { %3746 = vmatpush.bf16.msrb.mxu0 %v6087_v50  ;;  %v6423_v41 = vor.u32 %v6943_v38, %v6420_v26  ;;  %v6372_v21 = vld [vmem:[%s8003_s26 + $0x170] sm:$0xf0] }
 0x8a5   : > { %3760 = vmatpush.bf16.msra.mxu1 %v6091_v46  ;;  %v6356_v26 = vld [vmem:[%s8003_s26 + $0xf0] sm:$0xf0] }
 0x8a6   : > { %3731 = vmatpush.bf16.msrb.mxu3 %v6099_v4  ;;  %v6891_v4 = vld [vmem:[%s8184_s1 + $0x200] sm:$0xff] }
 0x8a7   : > { %3773 = vmatpush.bf16.msra.mxu2 %v6111_v48  ;;  %3747 = vmatmul.bf16.vlgmr.msrb.gmra.mxu0 %v8180_v42  ;;  %v6915_v48 = vld [vmem:[%s8184_s1 + $0x2c0] sm:$0xff] }
 0x8a8   : > { %3761 = vmatmul.bf16.vlgmr.msra.gmra.mxu1 %v8180_v42  ;;  %4063 = vmatpush.bf16.msra.mxu0 %v6906_v57  ;;  %v6407_v57 = vor.u32 %v6939_v51, %v6404_v52  ;;  %v6386_v51 = vld [vmem:[%s8003_s26 + $0x1b0] sm:$0xf] }
 0x8a9   : > { %4077 = vmatpush.bf16.msrb.mxu1 %v6914_v56  ;;  %v6410_v56 = vld [vmem:[%s8003_s26 + $0x238] sm:$0xf]  ;;  %v6937_v52 = vld [vmem:[%s8003_s26 + $0x1ec] sm:$0xf0] }
 0x8aa   : > { %3732 = vmatpush.bf16.msrb.mxu3 %v6083_v54 }
 0x8ab   : > { %3774 = vmatpush.bf16.msra.mxu2 %v6095_v55  ;;  %v6451_v55 = vor.u32 %v6953_v25, %v6450_v49 }
 0x8ac   : > { %4064 = vmatpush.bf16.msra.mxu0 %v6905_v58  ;;  %v6942_v58 = vld [vmem:[%s8003_s26 + $0x274] sm:$0xf0] }
 0x8ad   : > { %3733 = vmatmul.bf16.vlgmr.msrb.gmra.mxu3 %v8180_v42  ;;  %4078 = vmatpush.bf16.msrb.mxu1 %v6913_v40 }
 0x8ae   : > { %3775 = vmatmul.bf16.vlgmr.msra.gmra.mxu2 %v8180_v42  ;;  %4049 = vmatpush.bf16.msra.mxu3 %v6898_v60  ;;  %v6952_v60 = vld [vmem:[%s8003_s26 + $0x3bc] sm:$0xf] }
 0x8af   : > { %4091 = vmatpush.bf16.msrb.mxu2 %v6922_v0  ;;  %v6434_v0 = vld [vmem:[%s8003_s26 + $0x330] sm:$0xf] }
 0x8b0   : > { %4065 = vmatpush.bf16.msra.mxu0 %v6904_v53 }
 0x8b1   : > { %4079 = vmatpush.bf16.msrb.mxu1 %v6912_v59  ;;  %v6411_v59 = vor.u32 %v6942_v58, %v6410_v56  ;;  %v6346_v56 = vld [vmem:[%s8003_s26 + $0x38] sm:$0xf] }
 0x8b2   : > { %4050 = vmatpush.bf16.msra.mxu3 %v6897_v34  ;;  %v6949_v34 = vld [vmem:[%s8003_s26 + $0x36c] sm:$0xf0]  ;;  %v6926_v58 = vld [vmem:[%s8003_s26 + $0x74] sm:$0xf0] }
 0x8b3   : > { %4092 = vmatpush.bf16.msrb.mxu2 %v6921_v3  ;;  %v6435_v3 = vor.u32 %v6949_v34, %v6434_v0 }
 0x8b4   : > { %4066 = vmatpush.bf16.msra.mxu0 %v6903_v15  ;;  %v6460_v15 = vld [vmem:[%s8003_s26 + $0x3f8] sm:$0xf0] }
 0x8b5   : > { %4080 = vmatpush.bf16.msrb.mxu1 %v6911_v61  ;;  %v6463_v61 = vor.u32 %v6952_v60, %v6460_v15  ;;  %v6936_v60 = vld [vmem:[%s8003_s26 + $0x1bc] sm:$0xf] }
 0x8b6   : > { %4051 = vmatpush.bf16.msra.mxu3 %v6896_v5  ;;  %v6388_v5 = vld [vmem:[%s8003_s26 + $0x1f0] sm:$0xf0]  ;;  %v6396_v15 = vld [vmem:[%s8003_s26 + $0x1f8] sm:$0xf0] }
 0x8b7   : > { %4093 = vmatpush.bf16.msrb.mxu2 %v6920_v43  ;;  %v6399_v34 = vor.u32 %v6936_v60, %v6396_v15 }
 0x8b8   : > { %4067 = vmatpush.bf16.msra.mxu0 %v6902_v2  ;;  %v6935_v2 = vld [vmem:[%s8003_s26 + $0x1b4] sm:$0xf] }
 0x8b9   : > { %4081 = vmatpush.bf16.msrb.mxu1 %v6910_v16 }
 0x8ba   : > { %4052 = vmatpush.bf16.msra.mxu3 %v6895_v18  ;;  %v6391_v18 = vor.u32 %v6935_v2, %v6388_v5  ;;  %v6370_v2 = vld [vmem:[%s8003_s26 + $0x130] sm:$0xf] }
 0x8bb   : > { %4094 = vmatpush.bf16.msrb.mxu2 %v6919_v29  ;;  %v6444_v29 = vld [vmem:[%s8003_s26 + $0x378] sm:$0xf0] }
 0x8bc   : > { %4068 = vmatpush.bf16.msra.mxu0 %v6901_v8  ;;  %v6394_v8 = vld [vmem:[%s8003_s26 + $0x1b8] sm:$0xf] }
 0x8bd   : > { %4082 = vmatpush.bf16.msrb.mxu1 %v6909_v9  ;;  %v6938_v9 = vld [vmem:[%s8003_s26 + $0x1f4] sm:$0xf0] }
 0x8be   : > { %4053 = vmatpush.bf16.msra.mxu3 %v6894_v6 }
 0x8bf   : > { %4095 = vmatpush.bf16.msrb.mxu2 %v6918_v11  ;;  %v6418_v11 = vld [vmem:[%s8003_s26 + $0x2b0] sm:$0xf] }
 0x8c0   : > { %4069 = vmatpush.bf16.msra.mxu0 %v6900_v47  ;;  %v6395_v47 = vor.u32 %v6938_v9, %v6394_v8  ;;  %v6419_v17 = vor.u32 %v6945_v19, %v6418_v11  ;;  %v6380_v9 = vld [vmem:[%s8003_s26 + $0x178] sm:$0xf0] }
 0x8c1   : > { %4083 = vmatpush.bf16.msrb.mxu1 %v6908_v12  ;;  %v6948_v12 = vld [vmem:[%s8003_s26 + $0x33c] sm:$0xf] }
 0x8c2   : > { %4054 = vmatpush.bf16.msra.mxu3 %v6893_v28  ;;  %v6928_v19 = vld [vmem:[%s8003_s26 + $0xbc] sm:$0xf] }
 0x8c3   : > { %4096 = vmatpush.bf16.msrb.mxu2 %v6917_v30  ;;  %v6944_v30 = vld [vmem:[%s8003_s26 + $0x2bc] sm:$0xf] }
 0x8c4   : > { %4070 = vmatpush.bf16.msra.mxu0 %v6899_v7  ;;  %v6431_v33 = vor.u32 %v6944_v30, %v6428_v31 }
 0x8c5   : > { %4084 = vmatpush.bf16.msrb.mxu1 %v6907_v10  ;;  %v6447_v10 = vor.u32 %v6948_v12, %v6444_v29  ;;  %v6354_v29 = vld [vmem:[%s8003_s26 + $0xb0] sm:$0xf] }
 0x8c6   : > { %4055 = vmatpush.bf16.msra.mxu3 %v6892_v37  ;;  %v6927_v37 = vld [vmem:[%s8003_s26 + $0xb4] sm:$0xf] }
 0x8c7   : > { %4097 = vmatpush.bf16.msrb.mxu2 %v6916_v14 }
 0x8c8   : > { %4323 = vmatpush.bf16.msrb.mxu0 %v6455_v23  ;;  %v6934_v23 = vld [vmem:[%s8003_s26 + $0x174] sm:$0xf0] }
 0x8c9   : > { %4337 = vmatpush.bf16.msra.mxu1 %v6459_v27 }
 0x8ca   : > { %4056 = vmatpush.bf16.msra.mxu3 %v6891_v4  ;;  %v6940_v4 = vld [vmem:[%s8003_s26 + $0x23c] sm:$0xf] }
 0x8cb   : > { %4098 = vmatpush.bf16.msrb.mxu2 %v6915_v48  ;;  %v6412_v48 = vld [vmem:[%s8003_s26 + $0x278] sm:$0xf0] }
 0x8cc   : > { %4324 = vmatpush.bf16.msrb.mxu0 %v6439_v35  ;;  %v6402_v35 = vld [vmem:[%s8003_s26 + $0x230] sm:$0xf]  ;;  %v6415_v25 = vor.u32 %v6940_v4, %v6412_v48 }
 0x8cd   : > { %4338 = vmatpush.bf16.msra.mxu1 %v6443_v36  ;;  %v6941_v36 = vld [vmem:[%s8003_s26 + $0x26c] sm:$0xf0] }
 0x8ce   : > { %4309 = vmatpush.bf16.msrb.mxu3 %v6451_v55  ;;  %v6403_v38 = vor.u32 %v6941_v36, %v6402_v35  ;;  %v6387_v55 = vor.u32 %v6937_v52, %v6386_v51 }
 0x8cf   : > { %4351 = vmatpush.bf16.msra.mxu2 %v6463_v61 }
 0x8d0   : > { %4325 = vmatpush.bf16.msrb.mxu0 %v6423_v41 }
 0x8d1   : > { %4339 = vmatpush.bf16.msra.mxu1 %v6427_v44  ;;  %v6363_v44 = vor.u32 %v6930_v39, %v6362_v62 }
 0x8d2   : > { %4310 = vmatpush.bf16.msrb.mxu3 %v6435_v3  ;;  %v6932_v3 = vld [vmem:[%s8003_s26 + $0x13c] sm:$0xf] }
 0x8d3   : > { %4352 = vmatpush.bf16.msra.mxu2 %v6447_v10  ;;  %v6383_v12 = vor.u32 %v6932_v3, %v6380_v9  ;;  %v6969_v3 = vld [vmem:[%s8184_s1 + $0x370] sm:$0xff]  ;;  %v6976_v9 = vld [vmem:[%s8184_s1 + $0x3a8] sm:$0xff] }
 0x8d4   : > { %4326 = vmatpush.bf16.msrb.mxu0 %v6407_v57  ;;  %v6340_v57 = vld [vmem:[%s8003_s26 + $0x70] sm:$0xf0] }
 0x8d5   : > { %4340 = vmatpush.bf16.msra.mxu1 %v6411_v59  ;;  %v6347_v59 = vor.u32 %v6926_v58, %v6346_v56 }
 0x8d6   : > { %4311 = vmatpush.bf16.msrb.mxu3 %v6419_v17 }
 0x8d7   : > { %4353 = vmatpush.bf16.msra.mxu2 %v6431_v33 }
 0x8d8   : > { %4327 = vmatpush.bf16.msrb.mxu0 %v6391_v18  ;;  %v3555_v18 = vld [vmem:[%s8276_s2 + $0x8] sm:$0xf] }
 0x8d9   : > { %4341 = vmatpush.bf16.msra.mxu1 %v6395_v47 }
 0x8da   : > { %4312 = vmatpush.bf16.msrb.mxu3 %v6403_v38 }
 0x8db   : > { %4354 = vmatpush.bf16.msra.mxu2 %v6415_v25 }
 0x8de   : > { %4313 = vmatpush.bf16.msrb.mxu3 %v6387_v55  ;;  %v3560_v55 = vperm.slane %v3555_v18, 3 }
 0x8df   : > { %4355 = vmatpush.bf16.msra.mxu2 %v6399_v34 }
 0x8e3   : > { %4356 = vmatpush.bf16.msra.mxu2 %v6383_v12  ;;  %v6974_v12 = vld [vmem:[%s8184_s1 + $0x398] sm:$0xff] }
 0x904   : > { %v3242_v20 = vpop.f32.mrf.mxu0 }
 0x905   : > { %v3256_v22 = vpop.f32.mrf.mxu1 }
 0x90c   : > { %v8406_v50 = vpop.f32.mrf.mxu0 }
 0x90d   : > { %v8408_v46 = vpop.f32.mrf.mxu1 }
 0x910   : > { %v3228_v54 = vpop.f32.mrf.mxu3 }
 0x911   : > { %v3243_v40 = vadd.f32 %v3242_v20, %v3228_v54  ;;  %v3270_v53 = vpop.f32.mrf.mxu2  ;;  %v6931_v20 = vld [vmem:[%s8003_s26 + $0x134] sm:$0xf] }
 0x912   : > { %v6375_v27 = vor.u32 %v6931_v20, %v6372_v21  ;;  %v6923_v54 = vld [vmem:[%s8003_s26 + $0x34] sm:$0xf]  ;;  %v6364_v20 = vld [vmem:[%s8003_s26 + $0xf8] sm:$0xf0]  ;;  %v3558_v21 = vperm.slane %v3555_v18, 1 }
 0x913   : > { %v3257_v16 = vadd.f32 %v3256_v22, %v3243_v40  ;;  %v6378_v22 = vld [vmem:[%s8003_s26 + $0x138] sm:$0xf] }
 0x914   : > { %v8426_v43 = vpop.f32.mrf.mxu0  ;;  %v6379_v28 = vor.u32 %v6934_v23, %v6378_v22  ;;  %4328 = vmatpush.bf16.msrb.mxu0 %v6375_v27  ;;  %v6338_v22 = vld [vmem:[%s8003_s26 + $0x30] sm:$0xf] }
 0x915   : > { %v3271_v6 = vadd.f32 %v3270_v53, %v3257_v16  ;;  %v8430_v7 = vpop.f32.mrf.mxu1  ;;  %v6343_v53 = vor.u32 %v6923_v54, %v6340_v57  ;;  %v6933_v16 = vld [vmem:[%s8003_s26 + $0x16c] sm:$0xf0]  ;;  %v3557_v54 = vperm.slane %v3555_v18, 0 }
 0x916   : > { %4342 = vmatpush.bf16.msra.mxu1 %v6379_v28  ;;  %v6371_v8 = vor.u32 %v6933_v16, %v6370_v2  ;;  %v6925_v23 = vld [vmem:[%s8003_s26 + $0x6c] sm:$0xf0]  ;;  %v6367_v28 = vor.u32 %v6928_v19, %v6364_v20  ;;  %v6970_v2 = vld [vmem:[%s8184_s1 + $0x378] sm:$0xff] }
 0x917   : > { %v6978_v16 = vld [vmem:[%s8184_s1 + $0x3b8] sm:$0xff]  ;;  %v6961_v19 = vld [vmem:[%s8184_s1 + $0x330] sm:$0xff] }
 0x918   : > { %v3230_v24 = vpop.f32.mrf.mxu3  ;;  %4314 = vmatpush.bf16.msrb.mxu3 %v6371_v8  ;;  %4357 = vmatpush.bf16.msra.mxu2 %v6367_v28  ;;  %v6968_v8 = vld [vmem:[%s8184_s1 + $0x368] sm:$0xff]  ;;  %v6985_v20 = vld [vmem:[%s8184_s1 + $0x3f0] sm:$0xff]  ;;  %v6959_v28 = vld [vmem:[%s8184_s1 + $0x320] sm:$0xff] }
 0x919   : > { %v3245_v32 = vadd.f32 %v8406_v50, %v3230_v24  ;;  %v3272_v13 = vpop.f32.mrf.mxu2  ;;  %v6359_v50 = vor.u32 %v6927_v37, %v6356_v26  ;;  %v3559_v24 = vperm.slane %v3555_v18, 2  ;;  %v6967_v18 = vld [vmem:[%s8184_s1 + $0x360] sm:$0xff] }
 0x91a   : > { %4343 = vmatpush.bf16.msra.mxu1 %v6363_v44 }
 0x91b   : > { %v3259_v14 = vadd.f32 %v8408_v46, %v3245_v32  ;;  %4329 = vmatpush.bf16.msrb.mxu0 %v6359_v50  ;;  %v6924_v32 = vld [vmem:[%s8003_s26 + $0x3c] sm:$0xf] }
 0x91c   : > { %v8448_v41 = vpop.f32.mrf.mxu0 }
 0x91d   : > { %v3273_v46 = vadd.f32 %v3272_v13, %v3259_v14  ;;  %v3506_v49 = vpop.f32.mrf.mxu1  ;;  %v6339_v13 = vor.u32 %v6925_v23, %v6338_v22  ;;  %v6960_v22 = vld [vmem:[%s8184_s1 + $0x328] sm:$0xff] }
 0x91e   : > { %4344 = vmatpush.bf16.msra.mxu1 %v6347_v59  ;;  %v6984_v23 = vld [vmem:[%s8184_s1 + $0x3e8] sm:$0xff] }
 0x91f   : > { %4330 = vmatpush.bf16.msrb.mxu0 %v6343_v53 }
 0x920   : > { %v3476_v40 = vpop.f32.mrf.mxu3 }
 0x921   : > { %v3477_v61 = vadd.f32 %v3476_v40, %v3271_v6  ;;  %v3518_v0 = vpop.f32.mrf.mxu2  ;;  %v6929_v6 = vld [vmem:[%s8003_s26 + $0xec] sm:$0xf0] }
 0x923   : > { %v3491_v5 = vadd.f32 %v8426_v43, %v3477_v61  ;;  %v6355_v43 = vor.u32 %v6929_v6, %v6354_v29  ;;  %v6962_v29 = vld [vmem:[%s8184_s1 + $0x338] sm:$0xff] }
 0x924   : > { %v3748_v47 = vpop.f32.mrf.mxu0  ;;  %v6986_v6 = vld [vmem:[%s8184_s1 + $0x3f8] sm:$0xff] }
 0x925   : > { %v3505_v10 = vadd.f32 %v8430_v7, %v3491_v5  ;;  %v3762_v11 = vpop.f32.mrf.mxu1  ;;  %v6348_v7 = vld [vmem:[%s8003_s26 + $0x78] sm:$0xf0]  ;;  %4315 = vmatpush.bf16.msrb.mxu3 %v6355_v43  ;;  %v3749_v33 = vadd.f32 %v3748_v47, %v3558_v21  ;;  %v6977_v5 = vld [vmem:[%s8184_s1 + $0x3b0] sm:$0xff]  ;;  %v6964_v43 = vld [vmem:[%s8184_s1 + $0x348] sm:$0xff]  ;;  %s8628_s26 = sld [smem:[#allocation29_spill]] }
 0x926   : > { %v3763_v36 = vadd.f32 %v3762_v11, %v3559_v24  ;;  %v6351_v14 = vor.u32 %v6924_v32, %v6348_v7  ;;  %v6966_v47 = vld [vmem:[%s8184_s1 + $0x358] sm:$0xff]  ;;  %v6973_v11 = vld [vmem:[%s8184_s1 + $0x390] sm:$0xff] }
 0x927   : > { %v8471_v17 = vadd.f32 %v3518_v0, %v3505_v10  ;;  %v3782_v50 = vmax.f32 %v3749_v33, 0.0  ;;  %v6965_v10 = vld [vmem:[%s8184_s1 + $0x350] sm:$0xff]  ;;  %v6958_v7 = vld [vmem:[%s8184_s1 + $0x318] sm:$0xff] }
 0x928   : > { %v3478_v27 = vpop.f32.mrf.mxu3  ;;  %v3783_v48 = vmax.f32 %v3763_v36, 0.0  ;;  %4358 = vmatpush.bf16.msra.mxu2 %v6351_v14  ;;  %v6957_v33 = vld [vmem:[%s8184_s1 + $0x310] sm:$0xff]  ;;  %v6956_v14 = vld [vmem:[%s8184_s1 + $0x308] sm:$0xff] }
 0x929   : > { %v3479_v30 = vadd.f32 %v3478_v27, %v3273_v46  ;;  %v3520_v31 = vpop.f32.mrf.mxu2  ;;  %4316 = vmatpush.bf16.msrb.mxu3 %v6339_v13  ;;  %v6971_v27 = vld [vmem:[%s8184_s1 + $0x380] sm:$0xff]  ;;  %v6982_v13 = vld [vmem:[%s8184_s1 + $0x3d8] sm:$0xff] }
 0x92b   : > { %v3493_v35 = vadd.f32 %v8448_v41, %v3479_v30  ;;  %v6983_v30 = vld [vmem:[%s8184_s1 + $0x3e0] sm:$0xff]  ;;  %s4700_s9 = scalar_lea.vmem %s8628_s26, %s7381_s0 }
 0x92c   : > { %v3750_v37 = vpop.f32.mrf.mxu0 }
 0x92d   : > { %v3507_v38 = vadd.f32 %v3506_v49, %v3493_v35  ;;  %v3751_v26 = vadd.f32 %v3750_v37, %v3558_v21  ;;  %v3764_v62 = vpop.f32.mrf.mxu1  ;;  %v6972_v21 = vld [vmem:[%s8184_s1 + $0x388] sm:$0xff]  ;;  %v6981_v35 = vld [vmem:[%s8184_s1 + $0x3d0] sm:$0xff] }
 0x92e   : > { %v3765_v39 = vadd.f32 %v3764_v62, %v3559_v24  ;;  %v6963_v24 = vld [vmem:[%s8184_s1 + $0x340] sm:$0xff] }
 0x92f   : > { %v8478_v44 = vadd.f32 %v3520_v31, %v3507_v38  ;;  %v3786_v4 = vmax.f32 %v3751_v26, 0.0  ;;  %v6980_v38 = vld [vmem:[%s8184_s1 + $0x3c8] sm:$0xff]  ;;  %v6955_v26 = vld [vmem:[%s8184_s1 + $0x300] sm:$0xff] }
 0x930   : > { %v3787_v46 = vmax.f32 %v3765_v39, 0.0  ;;  %v3734_v25 = vpop.f32.mrf.mxu3  ;;  %v6979_v62 = vld [vmem:[%s8184_s1 + $0x3c0] sm:$0xff]  ;;  %v4139_v39 = vld [vmem:[%s8276_s2 + $0xc] sm:$0xf] }
 0x931   : > { %v3790_v51 = vpack.c.bf16 %v3786_v4, %v3782_v50  ;;  %v3776_v52 = vpop.f32.mrf.mxu2  ;;  %v3735_v49 = vadd.f32 %v3734_v25, %v3557_v54 }
 0x932   : > { %v3791_v41 = vpack.c.bf16 %v3787_v46, %v3783_v48  ;;  %v3777_v57 = vadd.f32 %v3776_v52, %v3560_v55  ;;  %v4142_v46 = vperm.slane %v4139_v39, 1  ;;  %v4143_v52 = vperm.slane %v4139_v39, 2 }
 0x933   : > { %4071 = vmatmul.bf16.vlgmr.msra.gmra.mxu0 %v3790_v51  ;;  %v3781_v59 = vmax.f32 %v3735_v49, 0.0 }
 0x934   : > { %4085 = vmatmul.bf16.vlgmr.msrb.gmra.mxu1 %v3791_v41  ;;  %v3784_v15 = vmax.f32 %v3777_v57, 0.0  ;;  %4647 = vmatpush.bf16.msra.mxu0 %v6970_v2 }
 0x935   : > { %4661 = vmatpush.bf16.msrb.mxu1 %v6978_v16 }
 0x938   : > { %v3736_v56 = vpop.f32.mrf.mxu3  ;;  %4648 = vmatpush.bf16.msra.mxu0 %v6969_v3 }
 0x939   : > { %v3737_v58 = vadd.f32 %v3736_v56, %v3557_v54  ;;  %v3778_v40 = vpop.f32.mrf.mxu2  ;;  %4662 = vmatpush.bf16.msrb.mxu1 %v6977_v5 }
 0x93a   : > { %v3779_v53 = vadd.f32 %v3778_v40, %v3560_v55 }
 0x93b   : > { %v3785_v60 = vmax.f32 %v3737_v58, 0.0 }
 0x93c   : > { %v3788_v61 = vmax.f32 %v3779_v53, 0.0  ;;  %4649 = vmatpush.bf16.msra.mxu0 %v6968_v8 }
 0x93d   : > { %v3789_v0 = vpack.c.bf16 %v3785_v60, %v3781_v59  ;;  %4663 = vmatpush.bf16.msrb.mxu1 %v6976_v9 }
 0x93e   : > { %v3792_v34 = vpack.c.bf16 %v3788_v61, %v3784_v15 }
 0x93f   : > { %4057 = vmatmul.bf16.vlgmr.msra.gmra.mxu3 %v3789_v0 }
 0x940   : > { %4099 = vmatmul.bf16.vlgmr.msrb.gmra.mxu2 %v3792_v34  ;;  %4650 = vmatpush.bf16.msra.mxu0 %v6967_v18 }
 0x941   : > { %4633 = vmatpush.bf16.msra.mxu3 %v6962_v29  ;;  %4675 = vmatpush.bf16.msrb.mxu2 %v6986_v6 }
 0x943   : > { %4331 = vmatmul.bf16.vlgmr.msrb.gmra.mxu0 %v8180_v42 }
 0x944   : > { %4345 = vmatmul.bf16.vlgmr.msra.gmra.mxu1 %v8180_v42  ;;  %4651 = vmatpush.bf16.msra.mxu0 %v6966_v47  ;;  %v4144_v47 = vperm.slane %v4139_v39, 3 }
 0x945   : > { %4634 = vmatpush.bf16.msra.mxu3 %v6961_v19  ;;  %4676 = vmatpush.bf16.msrb.mxu2 %v6985_v20 }
 0x948   : > { %4652 = vmatpush.bf16.msra.mxu0 %v6965_v10 }
 0x949   : > { %4635 = vmatpush.bf16.msra.mxu3 %v6960_v22  ;;  %4677 = vmatpush.bf16.msrb.mxu2 %v6984_v23 }
 0x94c   : > { %4653 = vmatpush.bf16.msra.mxu0 %v6964_v43 }
 0x94d   : > { %4636 = vmatpush.bf16.msra.mxu3 %v6959_v28  ;;  %4678 = vmatpush.bf16.msrb.mxu2 %v6983_v30 }
 0x94f   : > { %4317 = vmatmul.bf16.vlgmr.msrb.gmra.mxu3 %v8180_v42 }
 0x950   : > { %4359 = vmatmul.bf16.vlgmr.msra.gmra.mxu2 %v8180_v42  ;;  %v6975_v42 = vld [vmem:[%s8184_s1 + $0x3a0] sm:$0xff]  ;;  %4654 = vmatpush.bf16.msra.mxu0 %v6963_v24  ;;  %s4702_s1 = scalar_lea.vmem %s8629_s25, %s7381_s0 }
 0x951   : > { %4664 = vmatpush.bf16.msrb.mxu1 %v6975_v42  ;;  %4637 = vmatpush.bf16.msra.mxu3 %v6958_v7  ;;  %v4141_v42 = vperm.slane %v4139_v39, 0 }
 0x952   : > { %4679 = vmatpush.bf16.msrb.mxu2 %v6982_v13  ;;  %v7091_v13 = vld [vmem:[%s4691_s22] ss:$0 sm:$0xff] }
 0x955   : > { %4665 = vmatpush.bf16.msrb.mxu1 %v6974_v12  ;;  %4638 = vmatpush.bf16.msra.mxu3 %v6957_v33 }
 0x956   : > { %4680 = vmatpush.bf16.msrb.mxu2 %v6981_v35 }
 0x959   : > { %4666 = vmatpush.bf16.msrb.mxu1 %v6973_v11  ;;  %4639 = vmatpush.bf16.msra.mxu3 %v6956_v14 }
 0x95a   : > { %4681 = vmatpush.bf16.msrb.mxu2 %v6980_v38 }
 0x95d   : > { %4667 = vmatpush.bf16.msrb.mxu1 %v6972_v21  ;;  %4640 = vmatpush.bf16.msra.mxu3 %v6955_v26 }
 0x95e   : > { %4682 = vmatpush.bf16.msrb.mxu2 %v6979_v62 }
 0x961   : > { %4668 = vmatpush.bf16.msrb.mxu1 %v6971_v27 }
 0x9b0   : > { %v4072_v31 = vpop.f32.mrf.mxu0 }
 0x9b1   : > { %v4086_v32 = vpop.f32.mrf.mxu1 }
 0x9b8   : > { %v4074_v36 = vpop.f32.mrf.mxu0 }
 0x9b9   : > { %v4088_v37 = vpop.f32.mrf.mxu1 }
 0x9c0   : > { %v4332_v50 = vpop.f32.mrf.mxu0 }
 0x9c1   : > { %v4346_v4 = vpop.f32.mrf.mxu1  ;;  %v4333_v54 = vadd.f32 %v4332_v50, %v4142_v46 }
 0x9c2   : > { %v4058_v48 = vpop.f32.mrf.mxu3  ;;  %v4347_v49 = vadd.f32 %v4346_v4, %v4143_v52 }
 0x9c3   : > { %v4073_v25 = vadd.f32 %v4072_v31, %v4058_v48  ;;  %v4100_v51 = vpop.f32.mrf.mxu2  ;;  %v4366_v60 = vmax.f32 %v4333_v54, 0.0 }
 0x9c4   : > { %v4367_v34 = vmax.f32 %v4347_v49, 0.0 }
 0x9c5   : > { %v4087_v41 = vadd.f32 %v4086_v32, %v4073_v25 }
 0x9c7   : > { %v4101_v55 = vadd.f32 %v4100_v51, %v4087_v41 }
 0x9c8   : > { %v4334_v57 = vpop.f32.mrf.mxu0 }
 0x9c9   : > { %v4105_v56 = vadd.f32 %v4101_v55, %v8471_v17  ;;  %v4335_v58 = vadd.f32 %v4334_v57, %v4142_v46  ;;  %v4348_v40 = vpop.f32.mrf.mxu1 }
 0x9ca   : > { %v4349_v53 = vadd.f32 %v4348_v40, %v4143_v52  ;;  %v4060_v59 = vpop.f32.mrf.mxu3 }
 0x9cb   : > { %v4370_v15 = vmax.f32 %v4335_v58, 0.0  ;;  %v4075_v61 = vadd.f32 %v4074_v36, %v4060_v59  ;;  %v4102_v0 = vpop.f32.mrf.mxu2 }
 0x9cc   : > { %v4371_v2 = vmax.f32 %v4349_v53, 0.0 }
 0x9cd   : > { %v4374_v16 = vpack.c.bf16 %v4370_v15, %v4366_v60  ;;  %v4089_v3 = vadd.f32 %v4088_v37, %v4075_v61 }
 0x9ce   : > { %v4375_v5 = vpack.c.bf16 %v4371_v2, %v4367_v34 }
 0x9cf   : > { %v4103_v8 = vadd.f32 %v4102_v0, %v4089_v3  ;;  %4655 = vmatmul.bf16.vlgmr.msra.gmra.mxu0 %v4374_v16 }
 0x9d0   : > { %4669 = vmatmul.bf16.vlgmr.msrb.gmra.mxu1 %v4375_v5  ;;  %v7092_v5 = vld [vmem:[%s4700_s9] ss:$0 sm:$0xff] }
 0x9d1   : > { %v4106_v9 = vadd.f32 %v4103_v8, %v8478_v44 }
 0x9d2   : > { %v4318_v18 = vpop.f32.mrf.mxu3 }
 0x9d3   : > { %v4360_v17 = vpop.f32.mrf.mxu2  ;;  %v4319_v12 = vadd.f32 %v4318_v18, %v4141_v42  ;;  %v7093_v18 = vld [vmem:[%s4702_s1] ss:$0 sm:$0xff] }
 0x9d4   : > { %v4361_v29 = vadd.f32 %v4360_v17, %v4144_v47 }
 0x9d5   : > { %v4365_v20 = vmax.f32 %v4319_v12, 0.0 }
 0x9d6   : > { %v4368_v21 = vmax.f32 %v4361_v29, 0.0 }
 0x9da   : > { %v4320_v6 = vpop.f32.mrf.mxu3 }
 0x9db   : > { %v4321_v10 = vadd.f32 %v4320_v6, %v4141_v42  ;;  %v4362_v11 = vpop.f32.mrf.mxu2 }
 0x9dc   : > { %v4363_v19 = vadd.f32 %v4362_v11, %v4144_v47 }
 0x9dd   : > { %v4369_v43 = vmax.f32 %v4321_v10, 0.0 }
 0x9de   : > { %v4372_v22 = vmax.f32 %v4363_v19, 0.0 }
 0x9df   : > { %v4373_v23 = vpack.c.bf16 %v4369_v43, %v4365_v20 }
 0x9e0   : > { %v4376_v24 = vpack.c.bf16 %v4372_v22, %v4368_v21 }
 0x9e1   : > { %4641 = vmatmul.bf16.vlgmr.msra.gmra.mxu3 %v4373_v23 }
 0x9e2   : > { %4683 = vmatmul.bf16.vlgmr.msrb.gmra.mxu2 %v4376_v24 }
 0xa4c   : > { %v4656_v44 = vpop.f32.mrf.mxu0 }
 0xa4d   : > { %v4670_v27 = vpop.f32.mrf.mxu1 }
 0xa54   : > { %v4658_v35 = vpop.f32.mrf.mxu0 }
 0xa55   : > { %v4672_v38 = vpop.f32.mrf.mxu1 }
 0xa64   : > { %v4642_v28 = vpop.f32.mrf.mxu3 }
 0xa65   : > { %v4657_v30 = vadd.f32 %v4656_v44, %v4642_v28  ;;  %v4684_v31 = vpop.f32.mrf.mxu2 }
 0xa67   : > { %v4671_v32 = vadd.f32 %v4670_v27, %v4657_v30 }
 0xa69   : > { %v4685_v7 = vadd.f32 %v4684_v31, %v4671_v32 }
 0xa6b   : > { %v4689_v33 = vadd.f32 %v4685_v7, %v4105_v56 }
 0xa6c   : > { %v4644_v36 = vpop.f32.mrf.mxu3 }
 0xa6d   : > { %v4659_v37 = vadd.f32 %v4658_v35, %v4644_v36  ;;  %v4696_v14 = vadd.f32 %v7091_v13, %v4689_v33  ;;  %v4686_v39 = vpop.f32.mrf.mxu2 }
 0xa6f   : > { %v4673_v26 = vadd.f32 %v4672_v38, %v4659_v37  ;;  %v4698_v62 = vadd.f32 %v4696_v14, %v8174_v63 }
 0xa71   : > { %v4687_v50 = vadd.f32 %v4686_v39, %v4673_v26  ;;  %4704 = vadd.xlane.f32.xlu2 %v4698_v62 }
 0xa73   : > { %v4690_v4 = vadd.f32 %v4687_v50, %v4106_v9 }
 0xa75   : > { %v4697_v48 = vadd.f32 %v7091_v13, %v4690_v4 }
 0xa77   : > { %v4699_v46 = vadd.f32 %v4697_v48, %v8176_v1 }
 0xa79   : > { %4706 = vadd.xlane.f32.xlu0 %v4699_v46 }
 0xae4   : > { %v4705_v25 = vpop.xlane.xlu2 %4704 }
 0xae5   : > { %v4708_v51 = vmul.f32 0.03125, %v4705_v25 }
 0xae7   : > { %v4710_v52 = vsub.f32 %v4698_v62, %v4708_v51 }
 0xae9   : > { %v4712_v63 = vmul.f32 %v4710_v52, %v4710_v52 }
 0xaeb   : > { %v4714_v41 = vmul.f32 %v8023_v45, %v4712_v63 }
 0xaec   : > { %v4707_v54 = vpop.xlane.xlu0 %4706 }
 0xaed   : > { %v4709_v55 = vmul.f32 0.03125, %v4707_v54  ;;  %4716 = vadd.xlane.f32.xlu1 %v4714_v41 }
 0xaef   : > { %v4711_v49 = vsub.f32 %v4699_v46, %v4709_v55 }
 0xaf1   : > { %v4713_v57 = vmul.f32 %v4711_v49, %v4711_v49 }
 0xaf3   : > { %v4715_v56 = vmul.f32 %v8023_v45, %v4713_v57 }
 0xaf5   : > { %4718 = vadd.xlane.f32.xlu2 %v4715_v56 }
 0xb60   : > { %v4717_v58 = vpop.xlane.xlu1 %4716 }
 0xb61   : > { %v4720_v40 = vmul.f32 0.03125, %v4717_v58 }
 0xb63   : > { %v4722_v53 = vadd.f32 1e-05, %v4720_v40 }
 0xb65   : > { %7130 = vrsqrt.f32 %v4722_v53  ;;  %vm4730_vm10 = vweird.f32 %v4722_v53 }
 0xb68   : > { %v4719_v1 = vpop.xlane.xlu2 %4718 }
 0xb69   : > { %v4721_v59 = vmul.f32 0.03125, %v4719_v1 }
 0xb6b   : > { %v7131_v60 = vpop.eup %7130  ;;  %v4723_v15 = vadd.f32 1e-05, %v4721_v59 }
 0xb6c   : > { %v4725_v61 = vmul.f32 %v7131_v60, %v4722_v53  ;;  %vm4731_vm9 = vweird.f32 %v7131_v60 }
 0xb6d   : > { %7132 = vrsqrt.f32 %v4723_v15  ;;  %vm4732_vm11 = vmor %vm4730_vm10, %vm4731_vm9  ;;  %vm4740_vm13 = vweird.f32 %v4723_v15 }
 0xb6e   : > { %v4726_v0 = vmul.f32 %v7131_v60, %v4725_v61 }
 0xb70   : > { %v4727_v34 = vmul.f32 0.5, %v4726_v0 }
 0xb72   : > { %v4728_v2 = vsub.f32 1.5, %v4727_v34 }
 0xb73   : > { %v7133_v16 = vpop.eup %7132 }
 0xb74   : > { %v4729_v3 = vmul.f32 %v7131_v60, %v4728_v2  ;;  %v4735_v45 = vmul.f32 %v7133_v16, %v4723_v15  ;;  %vm4741_vm12 = vweird.f32 %v7133_v16 }
 0xb75   : > { %vm4742_vm14 = vmor %vm4740_vm13, %vm4741_vm12 }
 0xb76   : > { %v4733_v8 = vsel %vm4732_vm11, %v7131_v60, %v4729_v3  ;;  %v4736_v9 = vmul.f32 %v7133_v16, %v4735_v45 }
 0xb77   : > { %v4744_v17 = vmul.f32 %v4733_v8, %v4710_v52 }
 0xb78   : > { %v4737_v42 = vmul.f32 0.5, %v4736_v9 }
 0xb79   : > { %v4749_v47 = vmul.f32 %v7092_v5, %v4744_v17 }
 0xb7a   : > { %v4738_v12 = vsub.f32 1.5, %v4737_v42 }
 0xb7b   : > { %v8545_v29 = vadd.f32 %v7093_v18, %v4749_v47 }
 0xb7c   : > { %v4739_v6 = vmul.f32 %v7133_v16, %v4738_v12 }
 0xb7d   : > { %4756 = vst [vmem:[#allocation2] sm:$0xff] %v8545_v29 }
 0xb7e   : > { %v4743_v10 = vsel %vm4742_vm14, %v7133_v16, %v4739_v6 }
 0xb7f   : > { %v4745_v11 = vmul.f32 %v4743_v10, %v4711_v49 }
 0xb81   : > { %v4750_v19 = vmul.f32 %v7092_v5, %v4745_v11  ;;  %4761 = sbr.rel (%p6592_p8) target bundleno = 3123 (0xc33), region = 128 }
 0xb83   : > { %v8548_v20 = vadd.f32 %v7093_v18, %v4750_v19 }
 0xb85   : > { %4757 = vst [vmem:[#allocation2 + $0x8] sm:$0xff] %v8548_v20 }
 0xb86   : > { %v4762_v43 = vld [vmem:[%s8630_s14] sm:$0xff]  ;;  %vm4764_vm15 = vcmask 7168   ;;  %v4763_v21 = vld [vmem:[%s8630_s14 + $0x8] sm:$0xff]  ;;  %v7403_v22 = vmov 0  }
 0xb87   : > { %7134 = vset.pattern.permute.xlu0 %v7403_v22  ;;  %v4765_v23 = vsel %vm4764_vm15, %v4762_v43, 0.0  ;;  %v4772_v24 = vsel %vm4764_vm15, %v4763_v21, 0.0 }
 0xb88   : > { %v4766_v44 = vrot.slane %v4765_v23, 4  ;;  %v4773_v27 = vrot.slane %v4772_v24, 4 }
 0xb8a   : > { %v4767_v28 = vadd.f32 %v4766_v44, %v4765_v23  ;;  %v4774_v30 = vadd.f32 %v4773_v27, %v4772_v24 }
 0xb8c   : > { %v4768_v31 = vrot.slane %v4767_v28, 2  ;;  %v4775_v32 = vrot.slane %v4774_v30, 2 }
 0xb8e   : > { %v4769_v7 = vadd.f32 %v4768_v31, %v4767_v28  ;;  %v4776_v13 = vadd.f32 %v4775_v32, %v4774_v30 }
 0xb90   : > { %v4770_v33 = vrot.slane %v4769_v7, 1  ;;  %v4777_v35 = vrot.slane %v4776_v13, 1 }
 0xb92   : > { %v4771_v36 = vadd.f32 %v4770_v33, %v4769_v7  ;;  %v4778_v37 = vadd.f32 %v4777_v35, %v4776_v13 }
 0xb94   : > { %v4779_v14 = vadd.f32 1e-12, %v4771_v36  ;;  %v4780_v38 = vadd.f32 1e-12, %v4778_v37 }
 0xb96   : > { %7135 = vrcp.f32 %v4779_v14  ;;  %v4792_v50 = vand.u32 2147483648, %v4779_v14  ;;  %vm4786_vm0 = vweird.f32 %v4779_v14  ;;  %v4790_v46 = vand.u32 2147483647, %v4779_v14 }
 0xb97   : > { %7137 = vrcp.f32 %v4780_v38  ;;  %vm4801_vm2 = vweird.f32 %v4780_v38  ;;  %v4807_v41 = vand.u32 2147483648, %v4780_v38  ;;  %v4805_v55 = vand.u32 2147483647, %v4780_v38 }
 0xb98   : > { %v4793_v52 = vor.u32 1.1754944e-38, %v4792_v50  ;;  %vm4791_vm5 = vcmp.eq.f32.partialorder %v4790_v46, 8.507059e+37 }
 0xb99   : > { %v4808_v58 = vor.u32 1.1754944e-38, %v4807_v41  ;;  %vm4806_vm7 = vcmp.eq.f32.partialorder %v4805_v55, 8.507059e+37 }
 0xb9c   : > { %v7136_v26 = vpop.eup %7135 }
 0xb9d   : > { %v7138_v62 = vpop.eup %7137  ;;  %v4782_v39 = vmul.f32 %v7136_v26, %v4779_v14  ;;  %vm4787_vm1 = vweird.f32 %v7136_v26 }
 0xb9e   : > { %v4797_v4 = vmul.f32 %v7138_v62, %v4780_v38  ;;  %vm4802_vm3 = vweird.f32 %v7138_v62  ;;  %vm4788_vm4 = vmor %vm4786_vm0, %vm4787_vm1 }
 0xb9f   : > { %v4783_v48 = vsub.f32 1.0, %v4782_v39  ;;  %vm4803_vm6 = vmor %vm4801_vm2, %vm4802_vm3 }
 0xba0   : > { %v4798_v25 = vsub.f32 1.0, %v4797_v4 }
 0xba1   : > { %v4784_v51 = vmul.f32 %v7136_v26, %v4783_v48 }
 0xba2   : > { %v4799_v63 = vmul.f32 %v7138_v62, %v4798_v25 }
 0xba3   : > { %v4785_v54 = vadd.f32 %v7136_v26, %v4784_v51 }
 0xba4   : > { %v4800_v49 = vadd.f32 %v7138_v62, %v4799_v63 }
 0xba5   : > { %v4789_v57 = vsel %vm4788_vm4, %v7136_v26, %v4785_v54 }
 0xba6   : > { %v4794_v56 = vsel %vm4791_vm5, %v4793_v52, %v4789_v57  ;;  %v4804_v53 = vsel %vm4803_vm6, %v7138_v62, %v4800_v49 }
 0xba7   : > { %v4811_v40 = vmul.f32 %v4794_v56, %v4762_v43  ;;  %v4809_v1 = vsel %vm4806_vm7, %v4808_v58, %v4804_v53 }
 0xba8   : > { %v4812_v59 = vmul.f32 %v4809_v1, %v4763_v21 }
 0xba9   : > { %4815 = vperm.xlu0 %7134, %v4811_v40  }
 0xbb1   : > { %4820 = vperm.xlu0 %7134, %v4812_v59  }
 0xc1b   : > { %v4816_v60 = vpop.permute.xlu0 %4815 }
 0xc1c   : > { %v4823_v15 = vmul.f32 %v4816_v60, %v8545_v29 }
 0xc1e   : > { %v4825_v61 = vrot.slane %v4823_v15, 4 }
 0xc20   : > { %v4826_v0 = vadd.f32 %v4825_v61, %v4823_v15 }
 0xc22   : > { %v4827_v34 = vrot.slane %v4826_v0, 2 }
 0xc23   : > { %v4821_v2 = vpop.permute.xlu0 %4820 }
 0xc24   : > { %v4828_v16 = vadd.f32 %v4827_v34, %v4826_v0  ;;  %v4824_v3 = vmul.f32 %v4821_v2, %v8548_v20 }
 0xc26   : > { %v4829_v45 = vrot.slane %v4828_v16, 1  ;;  %v4831_v5 = vrot.slane %v4824_v3, 4 }
 0xc28   : > { %v4830_v8 = vadd.f32 %v4829_v45, %v4828_v16  ;;  %v4832_v9 = vadd.f32 %v4831_v5, %v4824_v3 }
 0xc2a   : > { %4837 = vst [vmem:[#allocation14] sm:$0x1] %v4830_v8  ;;  %v4833_v18 = vrot.slane %v4832_v9, 2 }
 0xc2c   : > { %v4834_v17 = vadd.f32 %v4833_v18, %v4832_v9 }
 0xc2e   : > { %v4835_v42 = vrot.slane %v4834_v17, 1 }
 0xc30   : > { %v4836_v47 = vadd.f32 %v4835_v42, %v4834_v17 }
 0xc32   : > { %4838 = vst [vmem:[#allocation14 + $0x1] sm:$0x1] %v4836_v47 }
 0xc33 PF: > { %s8631_s0 = sld [smem:[#allocation20_spill]]  ;;  %s7404_s1 = smov [#allocation14]  }
 0xc34   : > { %s8633_s4 = sld [smem:[#allocation31_spill]]  ;;  %s4846_s23 = sshll.u32 %s7404_s1, 4  ;;  %s4847_s23 = int_to_ptr.vmem [resolvable:$true] %s4846_s23 }
 0xc35   : > { %s7405_s3 = smov 16   ;;  %s7406_s19 = smov 1  }
 0xc39   : > { %s8632_s17 = sadd.s32 4294967295, %s8631_s0  }
 0xc3a   : > { %p7046_p9 = scmp.eq.s32.totalorder %s8632_s17, 1  ;;  %s4848_s21 = sshll.u32 %s8633_s4, 4  ;;  %s4849_s21 = int_to_ptr.hbm [resolvable:$true] %s4848_s21 }
 0xc3c   : > { %7012 = dma.vmem_to_hbm [thread:$0]  (%p7046_p9), %s4847_s23, 32, %s4849_s21, [#allocation5], %s7405_s3, %s7405_s3, %s7406_s19  }
 0xc3d   : > { %7376 = dma.done.wait (%p7046_p9), [#allocation5], 32  }
 0xc3e   : > { %7378 = vsyncadd (%p7046_p9), [#allocation5], 4294967264 }
 0xc3f PF: > { %s8634_s28 = sld [smem:[#allocation20_spill]]  ;;  %s8635_s0 = smov %s7385_s30 }
 0xc40   : > { %s8636_s30 = smov %s8638_s18 }
 0xc45   : > { %s34_s20 = sadd.s32 1, %s8634_s28  }
 0xc46   : > { %p31_p10 = scmp.ge.s32.totalorder %s34_s20, 4  }
 0xc48   :  { %33 = sbr.rel (!%p31_p10) target bundleno = 18 (0x12), region = 179 }
 0xc4d   :  { %4865 = vsyncpa [#allocation4], 1 }
 0xc4e   :  { %4867 = vsyncpa [#allocation4 + $0x1], 1 }
 0xc4f   :  { %4868 = vsyncpa [#allocation7], 1 }
 0xc50   :  { %4869 = vsyncpa [#allocation10], 1 }
 0xc51   :  { %4870 = vsyncpa [#allocation13], 1 }
 0xc52   :  { %4871 = vsyncpa [#allocation5], 1 }
 0xc53   :  { %4873 = vsyncpa [#allocation5 + $0x1], 1 }

</bundles_post_ra>
